<compile_context>
chip_gen: v7x
topology: tpu7x:2x2x1
jax: 0.10.0
libtpu: 0.0.40
codegen_flags: <defaults>
</compile_context>

<pallas_src>
import math

import jax
import jax.numpy as jnp
from jax import lax
from jax.experimental import pallas as pl
from jax.experimental.pallas import tpu as pltpu


def output_layer_kernel(x_ref, uw_ref, fw_ref, fb_ref, tgt_ref,
                        y_ref, l_ref,
                        m_sc, d_sc, n_sc):
    # x_ref:   (bt, tt, D)  batch / T-chunk tile of inputs (f32 or bf16)
    # uw_ref:  (ty, D)      U.weight tile
    # fw_ref:  (ty, D)      final.weight tile
    # fb_ref:  (1, ty)      final.bias tile (f32)
    # tgt_ref: (bt, ty)     target tile (f32)
    # y_ref:   (bt, ty)     logits out (f32)
    # l_ref:   (bt, ty)     per-element BCE-with-logits terms out (f32)
    # m_sc/d_sc/n_sc: (bt, ty) f32 running max / denominator / numerator
    k = pl.program_id(2)

    @pl.when(k == 0)
    def _init():
        m_sc[...] = jnp.full(m_sc.shape, -jnp.inf, dtype=m_sc.dtype)
        d_sc[...] = jnp.zeros(d_sc.shape, dtype=d_sc.dtype)
        n_sc[...] = jnp.zeros(n_sc.shape, dtype=n_sc.dtype)

    x = x_ref[...]
    # scores[b,t,l] = sum_d x[b,t,d] * U[l,d]            -> (bt, tt, ty)
    # D contracted directly: no x^T transpose / relayout before the MXU.
    scores = lax.dot_general(
        x, uw_ref[...],
        dimension_numbers=(((2,), (1,)), ((), ())),
        preferred_element_type=jnp.float32)
    # xf[b,t,l] = sum_d x[b,t,d] * final.weight[l,d]     -> (bt, tt, ty)
    # Same shape/operand layout as `scores`; replaces the old K=T batched matmul.
    xf = lax.dot_general(
        x, fw_ref[...],
        dimension_numbers=(((2,), (1,)), ((), ())),
        preferred_element_type=jnp.float32)

    # Online softmax over T, fused with the weighted sum of xf.
    m_prev = m_sc[...]
    m_new = jnp.maximum(m_prev, jnp.max(scores, axis=1))       # (bt, ty)
    corr = jnp.exp(m_prev - m_new)                             # (bt, ty)
    p = jnp.exp(scores - m_new[:, None, :])                    # (bt, tt, ty)
    d_sc[...] = corr * d_sc[...] + jnp.sum(p, axis=1)
    n_sc[...] = corr * n_sc[...] + jnp.sum(p * xf, axis=1)
    m_sc[...] = m_new

    @pl.when(k == pl.num_programs(2) - 1)
    def _finalize():
        # Exact reciprocal (approx=True perturbs softmax beyond the test tolerance);
        # now applied once per (bt, ty) element instead of per (bt, T, ty).
        y = n_sc[...] * pl.reciprocal(d_sc[...], approx=False) + fb_ref[...]
        y_ref[...] = y.astype(y_ref.dtype)
        # BCEWithLogits element terms: max(y, 0) - y*t + log(1 + exp(-|y|))
        t = tgt_ref[...]
        l = jnp.maximum(y, 0.0) - y * t + jnp.log1p(jnp.exp(-jnp.abs(y)))
        l_ref[...] = l.astype(l_ref.dtype)


def _pick_tile(dim, pref, align):
    """Largest tile <= pref that divides dim and is a multiple of align; else full dim."""
    t = min(pref, dim)
    t = (t // align) * align
    while t >= align:
        if dim % t == 0:
            return t
        t -= align
    return dim


def _vmem_estimate(bt, tt, ty, D, in_itemsize):
    """Rough per-step VMEM bytes: double-buffered I/O + f32 intermediates + scratch."""
    x_bytes = 2 * bt * tt * D * in_itemsize          # x tile (streamed over T chunks)
    w_bytes = 2 * 2 * ty * D * in_itemsize           # U.weight + final.weight tiles
    io_bytes = 2 * (3 * bt * ty + ty) * 4            # target, logits, BCE terms, bias
    interm = 3 * bt * tt * ty * 4                    # scores / p / xf f32 temporaries
    scratch = 3 * bt * ty * 4                        # online-softmax running state
    return x_bytes + w_bytes + io_bytes + interm + scratch


def _pick_b_tile(B, tt, ty, D, in_itemsize, budget):
    """Largest sublane-aligned divisor of B (or B itself) whose estimate fits budget."""
    cands = sorted({c for c in range(8, B + 1, 8) if B % c == 0} | {B}, reverse=True)
    for bt in cands:
        if _vmem_estimate(bt, tt, ty, D, in_itemsize) <= budget:
            return bt
    return cands[-1]


def output_layer_forward(x, target, u_w, f_w, f_b, *,
                         b_tile=None, y_tile=None, t_tile=None,
                         matmul_dtype=jnp.float32,
                         vmem_budget_bytes=24 * 1024 * 1024):
    """x: (B, T, D), target: (B, Y), u_w/f_w: (Y, D), f_b: (Y,). Returns (logits, loss)."""
    B, T, D = x.shape
    Y = u_w.shape[0]

    # MXU operands may be bf16 (halves the dominant x / weight HBM streams and uses
    # the native bf16 MXU path on v6e/v7x when D is large); all softmax / BCE math
    # and the dot accumulation stay f32.
    x = x.astype(matmul_dtype)
    u_w = u_w.astype(matmul_dtype)
    f_w = f_w.astype(matmul_dtype)
    target = target.astype(jnp.float32)
    fb2 = f_b.reshape(1, Y).astype(jnp.float32)
    in_itemsize = jnp.dtype(matmul_dtype).itemsize

    # Label tile: lane-aligned (128); default keeps Y/ty >= 2 so both v7x cores work.
    ty = y_tile if y_tile is not None else _pick_tile(Y, 256, 128)
    # T chunk: sublane-aligned (8); bounds VMEM independent of sequence length.
    tt = t_tile if t_tile is not None else _pick_tile(T, 512, 8)
    # Batch tile: largest sublane-aligned divisor of B fitting the VMEM budget
    # (minimizes how often the (Y, D) weights are re-streamed from HBM).
    bt = b_tile if b_tile is not None else _pick_b_tile(B, tt, ty, D, in_itemsize,
                                                        vmem_budget_bytes)
    assert B % bt == 0 and Y % ty == 0 and T % tt == 0, "tiles must divide B, Y, T"

    grid = (B // bt, Y // ty, T // tt)

    y, l_elems = pl.pallas_call(
        output_layer_kernel,
        out_shape=(
            jax.ShapeDtypeStruct((B, Y), jnp.float32),
            jax.ShapeDtypeStruct((B, Y), jnp.float32),
        ),
        grid_spec=pltpu.PrefetchScalarGridSpec(
            num_scalar_prefetch=0,
            grid=grid,
            in_specs=[
                pl.BlockSpec((bt, tt, D), lambda i, j, k: (i, k, 0)),  # x (streamed over T)
                pl.BlockSpec((ty, D), lambda i, j, k: (j, 0)),         # U.weight (resident over k)
                pl.BlockSpec((ty, D), lambda i, j, k: (j, 0)),         # final.weight
                pl.BlockSpec((1, ty), lambda i, j, k: (0, j)),         # final.bias
                pl.BlockSpec((bt, ty), lambda i, j, k: (i, j)),        # target
            ],
            out_specs=[
                pl.BlockSpec((bt, ty), lambda i, j, k: (i, j)),        # logits
                pl.BlockSpec((bt, ty), lambda i, j, k: (i, j)),        # BCE terms
            ],
            scratch_shapes=[
                pltpu.VMEM((bt, ty), jnp.float32),   # running max
                pltpu.VMEM((bt, ty), jnp.float32),   # running denominator
                pltpu.VMEM((bt, ty), jnp.float32),   # running numerator
            ],
        ),
        compiler_params=pltpu.CompilerParams(
            dimension_semantics=("parallel", "parallel", "arbitrary"),
            vmem_limit_bytes=32 * 1024 * 1024),
    )(x, u_w, f_w, fb2, target)

    # BCEWithLogitsLoss default reduction='mean' — trivial glue left in JAX.
    loss = jnp.mean(l_elems)
    return y, loss


def reference_forward(x, target, u_w, f_w, f_b):
    scores = jnp.einsum("yd,btd->byt", u_w, x)
    alpha = jax.nn.softmax(scores, axis=2)
    m = jnp.einsum("byt,btd->byd", alpha, x)
    y = jnp.sum(f_w[None] * m, axis=2) + f_b[None]
    l = jnp.maximum(y, 0.0) - y * target + jnp.log1p(jnp.exp(-jnp.abs(y)))
    return y, jnp.mean(l)


if __name__ == "__main__":
    # Small but tiling-exercising shapes.
    B, T, D, Y = 16, 16, 64, 512   # batch, seq_len, input_size, num_labels

    key = jax.random.PRNGKey(0)
    kx, kt, ku, kfw, kfb = jax.random.split(key, 5)

    x = jax.random.normal(kx, (B, T, D), dtype=jnp.float32)
    target = jax.random.bernoulli(kt, p=0.3, shape=(B, Y)).astype(jnp.float32)

    # Deterministic param init mirroring the module's __init__:
    # xavier_uniform for both weight matrices; PyTorch Linear default for bias.
    xav = math.sqrt(6.0 / (D + Y))
    u_w = jax.random.uniform(ku, (Y, D), minval=-xav, maxval=xav, dtype=jnp.float32)
    f_w = jax.random.uniform(kfw, (Y, D), minval=-xav, maxval=xav, dtype=jnp.float32)
    bbound = 1.0 / math.sqrt(D)
    f_b = jax.random.uniform(kfb, (Y,), minval=-bbound, maxval=bbound, dtype=jnp.float32)

    y_ref, loss_ref = reference_forward(x, target, u_w, f_w, f_b)

    # 1) Default tiling (f32 MXU operands): grid (1, 2, 1), full-B batch tile.
    y1, loss1 = output_layer_forward(x, target, u_w, f_w, f_b)
    jax.block_until_ready((y1, loss1))
    assert jnp.allclose(y1, y_ref, atol=1e-3, rtol=1e-3), float(jnp.max(jnp.abs(y1 - y_ref)))
    assert jnp.allclose(loss1, loss_ref, atol=1e-4, rtol=1e-4)

    # 2) Forced multi-tile run to exercise the online-softmax T accumulation:
    #    grid (2, 4, 2) — multiple batch tiles, label tiles and T chunks.
    y2, loss2 = output_layer_forward(x, target, u_w, f_w, f_b,
                                     b_tile=8, y_tile=128, t_tile=8)
    jax.block_until_ready((y2, loss2))
    assert jnp.allclose(y2, y_ref, atol=1e-3, rtol=1e-3), float(jnp.max(jnp.abs(y2 - y_ref)))
    assert jnp.allclose(loss2, loss_ref, atol=1e-4, rtol=1e-4)

    # 3) bf16 MXU operands (f32 accumulation / softmax / BCE) — looser tolerance.
    y3, loss3 = output_layer_forward(x, target, u_w, f_w, f_b,
                                     matmul_dtype=jnp.bfloat16)
    jax.block_until_ready((y3, loss3))
    assert jnp.allclose(y3, y_ref, atol=2e-2, rtol=2e-2), float(jnp.max(jnp.abs(y3 - y_ref)))
    assert jnp.allclose(loss3, loss_ref, atol=5e-3, rtol=5e-3)

    print("KERNEL_OK")
</pallas_src>

<mosaic_0001>
module attributes {stable_mosaic.version = 11 : i64} {
  func.func @output_layer_kernel(%arg0: i32, %arg1: i32, %arg2: i32, %arg3: memref<16x16x64xf32, #tpu.memory_space<vmem>>, %arg4: memref<256x64xf32, #tpu.memory_space<vmem>>, %arg5: memref<256x64xf32, #tpu.memory_space<vmem>>, %arg6: memref<1x256xf32, #tpu.memory_space<vmem>>, %arg7: memref<16x256xf32, #tpu.memory_space<vmem>>, %arg8: memref<16x256xf32, #tpu.memory_space<vmem>>, %arg9: memref<16x256xf32, #tpu.memory_space<vmem>>, %arg10: memref<16x256xf32, #tpu.memory_space<vmem>>, %arg11: memref<16x256xf32, #tpu.memory_space<vmem>>, %arg12: memref<16x256xf32, #tpu.memory_space<vmem>>) attributes {dimension_semantics = [#tpu.dimension_semantics<parallel>, #tpu.dimension_semantics<parallel>, #tpu.dimension_semantics<arbitrary>], iteration_bounds = array<i64: 1, 2, 1>, scalar_prefetch = 0 : i64, scratch_operands = 3 : i64, tpu.core_type = #tpu.core_type<tc>, window_params = [{transform_indices = @transform_0, window_bounds = array<i64: 16, 16, 64>}, {transform_indices = @transform_1, window_bounds = array<i64: 256, 64>}, {transform_indices = @transform_2, window_bounds = array<i64: 256, 64>}, {transform_indices = @transform_3, window_bounds = array<i64: 1, 256>}, {transform_indices = @transform_4, window_bounds = array<i64: 16, 256>}, {transform_indices = @transform_5, window_bounds = array<i64: 16, 256>}, {transform_indices = @transform_6, window_bounds = array<i64: 16, 256>}]} {
    %c0_i32 = arith.constant 0 : i32
    %0 = arith.cmpi eq, %arg2, %c0_i32 : i32
    %1 = arith.extui %0 : i1 to i32
    %c0_i32_0 = arith.constant 0 : i32
    %2 = arith.cmpi ne, %1, %c0_i32_0 : i32
    scf.if %2 {
      %cst_25 = arith.constant 0xFF800000 : f32
      %32 = vector.broadcast %cst_25 : f32 to vector<16x256xf32>
      %c0_26 = arith.constant 0 : index
      %c0_27 = arith.constant 0 : index
      %33 = vector.load %arg10[%c0_26, %c0_27] : memref<16x256xf32, #tpu.memory_space<vmem>>, vector<16x256xf32>
      tpu.vector_store %arg10[%c0_26, %c0_27], %32 {strides = array<i32>} : memref<16x256xf32, #tpu.memory_space<vmem>>, vector<16x256xf32>,
      %cst_28 = arith.constant 0.000000e+00 : f32
      %34 = vector.broadcast %cst_28 : f32 to vector<16x256xf32>
      %c0_29 = arith.constant 0 : index
      %c0_30 = arith.constant 0 : index
      %35 = vector.load %arg11[%c0_29, %c0_30] : memref<16x256xf32, #tpu.memory_space<vmem>>, vector<16x256xf32>
      tpu.vector_store %arg11[%c0_29, %c0_30], %34 {strides = array<i32>} : memref<16x256xf32, #tpu.memory_space<vmem>>, vector<16x256xf32>,
      %cst_31 = arith.constant 0.000000e+00 : f32
      %36 = vector.broadcast %cst_31 : f32 to vector<16x256xf32>
      %c0_32 = arith.constant 0 : index
      %c0_33 = arith.constant 0 : index
      %37 = vector.load %arg12[%c0_32, %c0_33] : memref<16x256xf32, #tpu.memory_space<vmem>>, vector<16x256xf32>
      tpu.vector_store %arg12[%c0_32, %c0_33], %36 {strides = array<i32>} : memref<16x256xf32, #tpu.memory_space<vmem>>, vector<16x256xf32>,
    } else {
    }
    %c0 = arith.constant 0 : index
    %c0_1 = arith.constant 0 : index
    %c0_2 = arith.constant 0 : index
    %3 = vector.load %arg3[%c0, %c0_1, %c0_2] : memref<16x16x64xf32, #tpu.memory_space<vmem>>, vector<16x16x64xf32>
    %c0_3 = arith.constant 0 : index
    %c0_4 = arith.constant 0 : index
    %4 = vector.load %arg4[%c0_3, %c0_4] : memref<256x64xf32, #tpu.memory_space<vmem>>, vector<256x64xf32>
    %cst = arith.constant dense<0.000000e+00> : vector<16x16x256xf32>
    %5 = tpu.matmul %3, %4, %cst {dimension_numbers = #tpu.dot_dimension_numbers<[2], [1], [0, 1], [0], [0, 0, 0, 1, 1, 0], [], []>} : vector<16x16x64xf32>, vector<256x64xf32>, vector<16x16x256xf32> -> vector<16x16x256xf32>
    %c0_5 = arith.constant 0 : index
    %c0_6 = arith.constant 0 : index
    %6 = vector.load %arg5[%c0_5, %c0_6] : memref<256x64xf32, #tpu.memory_space<vmem>>, vector<256x64xf32>
    %cst_7 = arith.constant dense<0.000000e+00> : vector<16x16x256xf32>
    %7 = tpu.matmul %3, %6, %cst_7 {dimension_numbers = #tpu.dot_dimension_numbers<[2], [1], [0, 1], [0], [0, 0, 0, 1, 1, 0], [], []>} : vector<16x16x64xf32>, vector<256x64xf32>, vector<16x16x256xf32> -> vector<16x16x256xf32>
    %c0_8 = arith.constant 0 : index
    %c0_9 = arith.constant 0 : index
    %8 = vector.load %arg10[%c0_8, %c0_9] : memref<16x256xf32, #tpu.memory_space<vmem>>, vector<16x256xf32>
    %cst_10 = arith.constant dense<0xFF800000> : vector<16x256xf32>
    %9 = vector.multi_reduction <maximumf>, %5, %cst_10 [1] : vector<16x16x256xf32> to vector<16x256xf32>
    %10 = arith.maximumf %8, %9 : vector<16x256xf32>
    %11 = arith.subf %8, %10 : vector<16x256xf32>
    %12 = math.exp %11 : vector<16x256xf32>
    %13 = vector.shape_cast %10 : vector<16x256xf32> to vector<16x1x256xf32>
    %14 = vector.broadcast %13 : vector<16x1x256xf32> to vector<16x16x256xf32>
    %15 = arith.subf %5, %14 : vector<16x16x256xf32>
    %16 = math.exp %15 : vector<16x16x256xf32>
    %c0_11 = arith.constant 0 : index
    %c0_12 = arith.constant 0 : index
    %17 = vector.load %arg11[%c0_11, %c0_12] : memref<16x256xf32, #tpu.memory_space<vmem>>, vector<16x256xf32>
    %18 = arith.mulf %12, %17 : vector<16x256xf32>
    %cst_13 = arith.constant dense<0.000000e+00> : vector<16x256xf32>
    %19 = vector.multi_reduction <add>, %16, %cst_13 [1] : vector<16x16x256xf32> to vector<16x256xf32>
    %20 = arith.addf %18, %19 : vector<16x256xf32>
    %c0_14 = arith.constant 0 : index
    %c0_15 = arith.constant 0 : index
    %21 = vector.load %arg11[%c0_14, %c0_15] : memref<16x256xf32, #tpu.memory_space<vmem>>, vector<16x256xf32>
    tpu.vector_store %arg11[%c0_14, %c0_15], %20 {strides = array<i32>} : memref<16x256xf32, #tpu.memory_space<vmem>>, vector<16x256xf32>,
    %c0_16 = arith.constant 0 : index
    %c0_17 = arith.constant 0 : index
    %22 = vector.load %arg12[%c0_16, %c0_17] : memref<16x256xf32, #tpu.memory_space<vmem>>, vector<16x256xf32>
    %23 = arith.mulf %12, %22 : vector<16x256xf32>
    %24 = arith.mulf %16, %7 : vector<16x16x256xf32>
    %cst_18 = arith.constant dense<0.000000e+00> : vector<16x256xf32>
    %25 = vector.multi_reduction <add>, %24, %cst_18 [1] : vector<16x16x256xf32> to vector<16x256xf32>
    %26 = arith.addf %23, %25 : vector<16x256xf32>
    %c0_19 = arith.constant 0 : index
    %c0_20 = arith.constant 0 : index
    %27 = vector.load %arg12[%c0_19, %c0_20] : memref<16x256xf32, #tpu.memory_space<vmem>>, vector<16x256xf32>
    tpu.vector_store %arg12[%c0_19, %c0_20], %26 {strides = array<i32>} : memref<16x256xf32, #tpu.memory_space<vmem>>, vector<16x256xf32>,
    %c0_21 = arith.constant 0 : index
    %c0_22 = arith.constant 0 : index
    %28 = vector.load %arg10[%c0_21, %c0_22] : memref<16x256xf32, #tpu.memory_space<vmem>>, vector<16x256xf32>
    tpu.vector_store %arg10[%c0_21, %c0_22], %10 {strides = array<i32>} : memref<16x256xf32, #tpu.memory_space<vmem>>, vector<16x256xf32>,
    %c0_i32_23 = arith.constant 0 : i32
    %29 = arith.cmpi eq, %arg2, %c0_i32_23 : i32
    %30 = arith.extui %29 : i1 to i32
    %c0_i32_24 = arith.constant 0 : i32
    %31 = arith.cmpi ne, %30, %c0_i32_24 : i32
    scf.if %31 {
      %c0_25 = arith.constant 0 : index
      %c0_26 = arith.constant 0 : index
      %32 = vector.load %arg12[%c0_25, %c0_26] : memref<16x256xf32, #tpu.memory_space<vmem>>, vector<16x256xf32>
      %c0_27 = arith.constant 0 : index
      %c0_28 = arith.constant 0 : index
      %33 = vector.load %arg11[%c0_27, %c0_28] : memref<16x256xf32, #tpu.memory_space<vmem>>, vector<16x256xf32>
      %34 = tpu.reciprocal %33 : vector<16x256xf32> -> vector<16x256xf32>
      %35 = arith.mulf %32, %34 : vector<16x256xf32>
      %c0_29 = arith.constant 0 : index
      %c0_30 = arith.constant 0 : index
      %36 = vector.load %arg6[%c0_29, %c0_30] : memref<1x256xf32, #tpu.memory_space<vmem>>, vector<1x256xf32>
      %37 = vector.broadcast %36 : vector<1x256xf32> to vector<16x256xf32>
      %38 = arith.addf %35, %37 : vector<16x256xf32>
      %c0_31 = arith.constant 0 : index
      %c0_32 = arith.constant 0 : index
      %39 = vector.load %arg8[%c0_31, %c0_32] : memref<16x256xf32, #tpu.memory_space<vmem>>, vector<16x256xf32>
      tpu.vector_store %arg8[%c0_31, %c0_32], %38 {strides = array<i32>} : memref<16x256xf32, #tpu.memory_space<vmem>>, vector<16x256xf32>,
      %c0_33 = arith.constant 0 : index
      %c0_34 = arith.constant 0 : index
      %40 = vector.load %arg7[%c0_33, %c0_34] : memref<16x256xf32, #tpu.memory_space<vmem>>, vector<16x256xf32>
      %cst_35 = arith.constant 0.000000e+00 : f32
      %41 = vector.broadcast %cst_35 : f32 to vector<16x256xf32>
      %42 = arith.maximumf %38, %41 : vector<16x256xf32>
      %43 = arith.mulf %38, %40 : vector<16x256xf32>
      %44 = arith.subf %42, %43 : vector<16x256xf32>
      %45 = math.absf %38 : vector<16x256xf32>
      %cst_36 = arith.constant 0.000000e+00 : f32
      %46 = vector.broadcast %cst_36 : f32 to vector<16x256xf32>
      %47 = arith.subf %46, %45 : vector<16x256xf32>
      %48 = math.exp %47 : vector<16x256xf32>
      %49 = math.log1p %48 : vector<16x256xf32>
      %50 = arith.addf %44, %49 : vector<16x256xf32>
      %c0_37 = arith.constant 0 : index
      %c0_38 = arith.constant 0 : index
      %51 = vector.load %arg9[%c0_37, %c0_38] : memref<16x256xf32, #tpu.memory_space<vmem>>, vector<16x256xf32>
      tpu.vector_store %arg9[%c0_37, %c0_38], %50 {strides = array<i32>} : memref<16x256xf32, #tpu.memory_space<vmem>>, vector<16x256xf32>,
    } else {
    }
    return
  }
  func.func @transform_0(%arg0: i32, %arg1: i32, %arg2: i32) -> (i32, i32, i32) {
    %c0_i32 = arith.constant 0 : i32
    %c0_i32_0 = arith.constant 0 : i32
    return %arg0, %arg2, %c0_i32 : i32, i32, i32
  }
  func.func @transform_1(%arg0: i32, %arg1: i32, %arg2: i32) -> (i32, i32) {
    %c0_i32 = arith.constant 0 : i32
    %c0_i32_0 = arith.constant 0 : i32
    return %arg1, %c0_i32 : i32, i32
  }
  func.func @transform_2(%arg0: i32, %arg1: i32, %arg2: i32) -> (i32, i32) {
    %c0_i32 = arith.constant 0 : i32
    %c0_i32_0 = arith.constant 0 : i32
    return %arg1, %c0_i32 : i32, i32
  }
  func.func @transform_3(%arg0: i32, %arg1: i32, %arg2: i32) -> (i32, i32) {
    %c0_i32 = arith.constant 0 : i32
    %c0_i32_0 = arith.constant 0 : i32
    return %c0_i32, %arg1 : i32, i32
  }
  func.func @transform_4(%arg0: i32, %arg1: i32, %arg2: i32) -> (i32, i32) {
    %c0_i32 = arith.constant 0 : i32
    return %arg0, %arg1 : i32, i32
  }
  func.func @transform_5(%arg0: i32, %arg1: i32, %arg2: i32) -> (i32, i32) {
    %c0_i32 = arith.constant 0 : i32
    return %arg0, %arg1 : i32, i32
  }
  func.func @transform_6(%arg0: i32, %arg1: i32, %arg2: i32) -> (i32, i32) {
    %c0_i32 = arith.constant 0 : i32
    return %arg0, %arg1 : i32, i32
  }
}

</mosaic_0001>

<bundles_post_ra>
// kernel: tpu_custom_call.1
= control target key start
LH: loop header
LB: loop body
LE: loop exit
PB: predicated region body
PF: predicated region fallthrough
CT: control target
= control target key end

     0   :  { %12 = vsyncpa [#allocation7], 0  ;;  %s5486_s0 = inlined_call_operand.vmem [shape: f32[16,16,64], index: 0, kind: input, shape index: {}]   ;;  %s5487_s1 = inlined_call_operand.vmem [shape: f32[512,64], index: 1, kind: input, shape index: {}]   ;;  %s5488_s2 = inlined_call_operand.vmem [shape: f32[512,64], index: 2, kind: input, shape index: {}]   ;;  %s5489_s3 = inlined_call_operand.vmem [shape: f32[1,512], index: 3, kind: input, shape index: {}]   ;;  %s5490_s4 = inlined_call_operand.vmem [shape: f32[16,512], index: 4, kind: input, shape index: {}]   ;;  %s5491_s5 = inlined_call_operand.hbm [shape: f32[16,512], index: 5, kind: output, shape index: {0}]   ;;  %s5492_s6 = inlined_call_operand.hbm [shape: f32[16,512], index: 6, kind: output, shape index: {1}]  }
   0x1   :  { %14 = vsyncpa [#allocation7 + $0x1], 0 }
   0x2   :  { %15 = vsyncpa [#allocation9], 0 }
   0x3   :  { %17 = vsyncpa [#allocation9 + $0x1], 0  ;;  %s3938_s21 = smov 0   ;;  %s3940_s22 = smov 0  }
   0x4   :  { %s3942_s23 = smov 0   ;;  %s3944_s24 = smov 0  }
   0x5   :  { %s3946_s25 = smov 0   ;;  %s3948_s26 = smov 0  }
   0x6 LB: > { %s3117_s27 = sadd.s32 4294967295, %s3895_s26   ;;  %s3118_s28 = sadd.s32 4294967294, %s3895_s26   ;;  %s3895_s26 = sphi %s3948_s26, %s23_s26   ;;  %s3891_s25 = sphi %s3946_s25, %s5761_s25   ;;  %s3887_s24 = sphi %s3944_s24, %s5760_s24   ;;  %s3883_s23 = sphi %s3942_s23, %s5759_s23   ;;  %s3879_s22 = sphi %s3940_s22, %s5758_s22   ;;  %s3875_s21 = sphi %s3938_s21, %s5757_s21  }
   0x7   : > { %s38_s29 = sadd.s32 1, %s3891_s25  ;;  %s157_s30 = sadd.s32 1, %s3883_s23 }
   0x8   : > { %p40_p0 = scmp.ge.s32.totalorder %s38_s29, 2  ;;  %p164_p1 = scmp.ne.s32.totalorder %s3883_s23, %s3879_s22 }
   0x9   : > { %p165_p2 = scmp.eq.s32.totalorder %s3895_s26, 0  ;;  %p196_p3 = scmp.eq.s32.totalorder %s3117_s27, 1 }
   0xa   : > { %s5763_s29 = smov (%p40_p0, %s38_s29), 0  ;;  %p201_p6 = scmp.ne.s32.totalorder %s3879_s22, %s3875_s21 }
   0xb   : > { %p166_p4 = por %p165_p2, %p164_p1  ;;  %p3977_p5 = por %p196_p3, %p164_p1 }
   0xc   : > { %s153_s8 = ssub.s32 %s3891_s25, %s5763_s29  ;;  %p202_p8 = scmp.eq.s32.totalorder %s3118_s28, 1 }
   0xd   : > { %p155_p7 = scmp.eq.s32.totalorder %s153_s8, 0  ;;  %p3121_p10 = scmp.ge.s32.totalorder %s3895_s26, 2 }
   0xe   : > { %p3988_p9 = por %p202_p8, %p201_p6 }
   0xf   : > { %s3986_s9 = scalar_select %p155_p7, %s3883_s23, %s157_s30  }
  0x10   : > { %261 = sbr.rel (%p3121_p10) target bundleno = 30 (0x1e), region = 20 }
  0x17   : > { %290 = sbr.rel (!%p166_p4) target bundleno = 30 (0x1e), region = 36  ;;  %s292_s11 = sand.u32 (%p166_p4), 1, %s3883_s23  }
  0x18   : > { %s3270_s12 = sshll.u32 (%p166_p4), %s3891_s25, 4  ;;  %s3122_s13 = sshll.u32 (%p166_p4), %s292_s11, 5 }
  0x19   : > { %s300_s16 = scalar_lea.vmem (%p166_p4), %s5490_s4, %s3270_s12  ;;  %s294_s17 = scalar_lea.vmem (%p166_p4), [#allocation5], %s3122_s13 }
  0x1a   : > { %v313_v0 = vld [vmem:[%s300_s16] sm:$0xff] (%p166_p4)  ;;  %v315_v1 = vld [vmem:[%s300_s16 + $0x8] sm:$0xff] (%p166_p4) }
  0x1b   : > { %v317_v2 = vld [vmem:[%s300_s16 + $0x20] sm:$0xff] (%p166_p4)  ;;  %314 = vst [vmem:[%s294_s17] sm:$0xff] (%p166_p4), %v313_v0  ;;  %316 = vst [vmem:[%s294_s17 + $0x8] sm:$0xff] (%p166_p4), %v315_v1  ;;  %v319_v3 = vld [vmem:[%s300_s16 + $0x28] sm:$0xff] (%p166_p4) }
  0x1c   : > { %318 = vst [vmem:[%s294_s17 + $0x10] sm:$0xff] (%p166_p4), %v317_v2  ;;  %320 = vst [vmem:[%s294_s17 + $0x18] sm:$0xff] (%p166_p4), %v319_v3 }
  0x1e PF: > { %p3125_p11 = scmp.ge.s32.totalorder %s3895_s26, 1  ;;  %p325_p12 = scmp.lt.s32.totalorder %s3895_s26, 3 }
  0x20   : > { %p326_p13 = pnand %p3125_p11, %p325_p12 }
  0x22   : > { %329 = sbr.rel (%p326_p13) target bundleno = 739 (0x2e3), region = 59 }
  0x29   : > { %s3129_s18 = sshll.u32 %s3887_s24, 5  ;;  %vm505_vm0 = vcmask 523264   ;;  %v4006_v4 = vld [vmem:[%s5486_s0] sm:$0xff]  ;;  %vm1600_vm2 = vcmask 1041409   ;;  %vm1602_vm3 = vcmask 1042434   ;;  %vm1604_vm4 = vcmask 1043459  }
  0x2a   : > { %p403_p0 = scmp.lt.s32.totalorder %s3129_s18, 63  ;;  %3305 = vmatprep.mubr.msk.f32.mxu0 %vm505_vm0, %v4006_v4  ;;  %3401 = vmatprep.mubr.msk.f32.mxu1 %vm505_vm0, %v4006_v4  ;;  %vm4019_vm1 = vmpackc.low %vm505_vm0, %vm505_vm0  ;;  %v445_v5 = vld [vmem:[%s5486_s0 + $0x20] sm:$0xff]  ;;  %vm1606_vm5 = vcmask 1044484   ;;  %vm1608_vm6 = vcmask 1045509   ;;  %vm1610_vm7 = vcmask 1046534   ;;  %vm1612_vm8 = vcmask 1047559  }
  0x2b   : > { %s3133_s20 = sshll.u32 %s3887_s24, 1  ;;  %s5028_s11 = sand.u32 1, %s3879_s22  }
  0x2c   : > { %s5765_s18 = smov (!%p403_p0, %s3129_s18), 63  ;;  %p4933_p1 = scmp.lt.s32.totalorder %s3133_s20, 3 }
  0x2d   : > { %s3130_s27 = sshll.u32 %s5765_s18, 3  ;;  %s5038_s12 = sshll.u32 %s5028_s11, 5 }
  0x2e   : > { %s4015_s8 = scalar_lea.vmem %s5487_s1, %s3130_s27  ;;  %s4040_s13 = scalar_lea.vmem %s5488_s2, %s3130_s27 }
  0x2f   : > { %v489_v6 = vld [vmem:[%s4015_s8 + $0x80] sm:$0xff]  ;;  %v490_v7 = vld [vmem:[%s4015_s8 + $0x88] sm:$0xff]  ;;  %v491_v11 = vld [vmem:[%s4015_s8 + $0x90] sm:$0xff]  ;;  %s5767_s20 = smov (!%p4933_p1, %s3133_s20), 3  ;;  %s5071_s14 = scalar_lea.vmem [#allocation5], %s5038_s12 }
  0x30   : > { %v473_v8 = vld [vmem:[%s4015_s8] sm:$0xff]  ;;  %v3465_v9 = vpack.c.bf16 %v490_v7, %v489_v6  ;;  %v474_v10 = vld [vmem:[%s4015_s8 + $0x8] sm:$0xff]  ;;  %v492_v12 = vld [vmem:[%s4015_s8 + $0x98] sm:$0xff]  ;;  %s5352_s15 = scalar_lea.vmem [#allocation8], %s5038_s12  ;;  %s5543_s16 = sshll.u32 %s3887_s24, 8 }
  0x31   : > { %v3468_v13 = vpack.c.bf16 %v474_v10, %v473_v8  ;;  %v3471_v14 = vpack.c.bf16 %v492_v12, %v491_v11  ;;  %v475_v15 = vld [vmem:[%s4015_s8 + $0x10] sm:$0xff]  ;;  %v476_v16 = vld [vmem:[%s4015_s8 + $0x18] sm:$0xff]  ;;  %v493_v17 = vld [vmem:[%s4015_s8 + $0xa0] sm:$0xff]  ;;  %s3898_s30 = smov [#allocation6]  }
  0x32   : > { %3467 = vmatprep.subr.msk.bf16.mxu0 %vm4019_vm1, %v3465_v9  ;;  %v494_v18 = vld [vmem:[%s4015_s8 + $0xa8] sm:$0xff]  ;;  %v3474_v19 = vpack.c.bf16 %v476_v16, %v475_v15  ;;  %v971_v20 = vld [vmem:[%s4040_s13 + $0x80] sm:$0xff]  ;;  %v973_v27 = vld [vmem:[%s4040_s13 + $0x90] sm:$0xff] }
  0x33   : > { %3470 = vmatpush3.bf16.xpose.msk.msra.mxu0 %vm4019_vm1, %v3468_v13  ;;  %v972_v21 = vld [vmem:[%s4040_s13 + $0x88] sm:$0xff]  ;;  %v955_v22 = vld [vmem:[%s4040_s13] sm:$0xff]  ;;  %v3477_v23 = vpack.c.bf16 %v494_v18, %v493_v17  ;;  %v974_v28 = vld [vmem:[%s4040_s13 + $0x98] sm:$0xff] }
  0x34   : > { %3473 = vmatprep.subr.msk.bf16.mxu0 %vm4019_vm1, %v3471_v14  ;;  %v3513_v24 = vpack.c.bf16 %v972_v21, %v971_v20  ;;  %v956_v25 = vld [vmem:[%s4040_s13 + $0x8] sm:$0xff]  ;;  %v477_v29 = vld [vmem:[%s4015_s8 + $0x20] sm:$0xff]  ;;  %v3519_v31 = vpack.c.bf16 %v974_v28, %v973_v27  ;;  %v495_v32 = vld [vmem:[%s4015_s8 + $0xb0] sm:$0xff] }
  0x35   : > { %v3516_v26 = vpack.c.bf16 %v956_v25, %v955_v22  ;;  %v478_v30 = vld [vmem:[%s4015_s8 + $0x28] sm:$0xff]  ;;  %v957_v33 = vld [vmem:[%s4040_s13 + $0x10] sm:$0xff]  ;;  %v958_v34 = vld [vmem:[%s4040_s13 + $0x18] sm:$0xff] }
  0x36   : > { %3515 = vmatprep.subr.msk.bf16.mxu1 %vm4019_vm1, %v3513_v24  ;;  %v496_v35 = vld [vmem:[%s4015_s8 + $0xb8] sm:$0xff]  ;;  %v975_v36 = vld [vmem:[%s4040_s13 + $0xa0] sm:$0xff]  ;;  %v976_v37 = vld [vmem:[%s4040_s13 + $0xa8] sm:$0xff]  ;;  %v3480_v38 = vpack.c.bf16 %v478_v30, %v477_v29  ;;  %v3522_v39 = vpack.c.bf16 %v958_v34, %v957_v33 }
  0x37   : > { %3518 = vmatpush3.bf16.xpose.msk.msra.mxu1 %vm4019_vm1, %v3516_v26  ;;  %v3483_v40 = vpack.c.bf16 %v496_v35, %v495_v32  ;;  %v3525_v41 = vpack.c.bf16 %v976_v37, %v975_v36  ;;  %v479_v42 = vld [vmem:[%s4015_s8 + $0x30] sm:$0xff]  ;;  %v480_v43 = vld [vmem:[%s4015_s8 + $0x38] sm:$0xff]  ;;  %v497_v44 = vld [vmem:[%s4015_s8 + $0xc0] sm:$0xff] }
  0x38   : > { %3521 = vmatprep.subr.msk.bf16.mxu1 %vm4019_vm1, %v3519_v31  ;;  %v959_v45 = vld [vmem:[%s4040_s13 + $0x20] sm:$0xff]  ;;  %v960_v46 = vld [vmem:[%s4040_s13 + $0x28] sm:$0xff]  ;;  %v977_v48 = vld [vmem:[%s4040_s13 + $0xb0] sm:$0xff]  ;;  %v3486_v50 = vpack.c.bf16 %v480_v43, %v479_v42 }
  0x39   : > { %v498_v47 = vld [vmem:[%s4015_s8 + $0xc8] sm:$0xff]  ;;  %v978_v49 = vld [vmem:[%s4040_s13 + $0xb8] sm:$0xff]  ;;  %v3528_v51 = vpack.c.bf16 %v960_v46, %v959_v45  ;;  %v481_v54 = vld [vmem:[%s4015_s8 + $0x40] sm:$0xff] }
  0x3a   : > { %v3489_v52 = vpack.c.bf16 %v498_v47, %v497_v44  ;;  %v3531_v53 = vpack.c.bf16 %v978_v49, %v977_v48  ;;  %v482_v55 = vld [vmem:[%s4015_s8 + $0x48] sm:$0xff]  ;;  %v499_v56 = vld [vmem:[%s4015_s8 + $0xd0] sm:$0xff]  ;;  %v962_v58 = vld [vmem:[%s4040_s13 + $0x38] sm:$0xff] }
  0x3b   : > { %3476 = vmatpush3.bf16.xpose.msk.msra.mxu0 %vm4019_vm1, %v3474_v19  ;;  %v961_v57 = vld [vmem:[%s4040_s13 + $0x30] sm:$0xff]  ;;  %v500_v59 = vld [vmem:[%s4015_s8 + $0xd8] sm:$0xff]  ;;  %v979_v60 = vld [vmem:[%s4040_s13 + $0xc0] sm:$0xff]  ;;  %v3492_v62 = vpack.c.bf16 %v482_v55, %v481_v54 }
  0x3c   : > { %3479 = vmatprep.subr.msk.bf16.mxu0 %vm4019_vm1, %v3477_v23  ;;  %v980_v61 = vld [vmem:[%s4040_s13 + $0xc8] sm:$0xff]  ;;  %v3534_v63 = vpack.c.bf16 %v962_v58, %v961_v57  ;;  %v3495_v0 = vpack.c.bf16 %v500_v59, %v499_v56  ;;  %v483_v2 = vld [vmem:[%s4015_s8 + $0x50] sm:$0xff]  ;;  %v484_v3 = vld [vmem:[%s4015_s8 + $0x58] sm:$0xff] }
  0x3d   : > { %v3537_v1 = vpack.c.bf16 %v980_v61, %v979_v60  ;;  %v501_v6 = vld [vmem:[%s4015_s8 + $0xe0] sm:$0xff]  ;;  %v964_v8 = vld [vmem:[%s4040_s13 + $0x48] sm:$0xff]  ;;  %v981_v10 = vld [vmem:[%s4040_s13 + $0xd0] sm:$0xff]  ;;  %v3498_v12 = vpack.c.bf16 %v484_v3, %v483_v2 }
  0x3e   : > { %v963_v7 = vld [vmem:[%s4040_s13 + $0x40] sm:$0xff]  ;;  %v502_v9 = vld [vmem:[%s4015_s8 + $0xe8] sm:$0xff]  ;;  %v982_v11 = vld [vmem:[%s4040_s13 + $0xd8] sm:$0xff] }
  0x3f   : > { %3524 = vmatpush3.bf16.xpose.msk.msra.mxu1 %vm4019_vm1, %v3522_v39  ;;  %v3540_v13 = vpack.c.bf16 %v964_v8, %v963_v7  ;;  %v3501_v14 = vpack.c.bf16 %v502_v9, %v501_v6  ;;  %v3543_v15 = vpack.c.bf16 %v982_v11, %v981_v10  ;;  %v485_v16 = vld [vmem:[%s4015_s8 + $0x60] sm:$0xff]  ;;  %v486_v17 = vld [vmem:[%s4015_s8 + $0x68] sm:$0xff]  ;;  %v503_v18 = vld [vmem:[%s4015_s8 + $0xf0] sm:$0xff] }
  0x40   : > { %3527 = vmatprep.subr.msk.bf16.mxu1 %vm4019_vm1, %v3525_v41  ;;  %v965_v19 = vld [vmem:[%s4040_s13 + $0x50] sm:$0xff]  ;;  %v966_v20 = vld [vmem:[%s4040_s13 + $0x58] sm:$0xff]  ;;  %v983_v22 = vld [vmem:[%s4040_s13 + $0xe0] sm:$0xff]  ;;  %v3504_v24 = vpack.c.bf16 %v486_v17, %v485_v16 }
  0x41   : > { %v504_v21 = vld [vmem:[%s4015_s8 + $0xf8] sm:$0xff]  ;;  %v984_v23 = vld [vmem:[%s4040_s13 + $0xe8] sm:$0xff]  ;;  %v3546_v25 = vpack.c.bf16 %v966_v20, %v965_v19  ;;  %v487_v28 = vld [vmem:[%s4015_s8 + $0x70] sm:$0xff] }
  0x42   : > { %v3507_v26 = vpack.c.bf16 %v504_v21, %v503_v18  ;;  %v3549_v27 = vpack.c.bf16 %v984_v23, %v983_v22  ;;  %v488_v29 = vld [vmem:[%s4015_s8 + $0x78] sm:$0xff]  ;;  %v967_v30 = vld [vmem:[%s4040_s13 + $0x60] sm:$0xff]  ;;  %v968_v31 = vld [vmem:[%s4040_s13 + $0x68] sm:$0xff]  ;;  %s417_s8 = scalar_lea.vmem %s5489_s3, %s5767_s20  ;;  %s5381_s20 = scalar_lea.hbm %s5491_s5, %s5543_s16 }
  0x43   : > { %3482 = vmatpush3.bf16.xpose.msk.msra.mxu0 %vm4019_vm1, %v3480_v38  ;;  %v985_v32 = vld [vmem:[%s4040_s13 + $0xf0] sm:$0xff]  ;;  %v986_v33 = vld [vmem:[%s4040_s13 + $0xf8] sm:$0xff]  ;;  %v3510_v34 = vpack.c.bf16 %v488_v29, %v487_v28  ;;  %v3552_v35 = vpack.c.bf16 %v968_v31, %v967_v30  ;;  %v449_v45 = vld [vmem:[%s5486_s0 + $0x40] sm:$0xff] }
  0x44   : > { %3485 = vmatprep.subr.msk.bf16.mxu0 %vm4019_vm1, %v3483_v40  ;;  %v3555_v36 = vpack.c.bf16 %v986_v33, %v985_v32  ;;  %v969_v37 = vld [vmem:[%s4040_s13 + $0x70] sm:$0xff]  ;;  %v970_v38 = vld [vmem:[%s4040_s13 + $0x78] sm:$0xff]  ;;  %v442_v40 = vld [vmem:[%s5486_s0 + $0x8] sm:$0xff]  ;;  %s5049_s13 = scalar_lea.vmem [#allocation6], %s5038_s12 }
  0x45   : > { %v3558_v39 = vpack.c.bf16 %v970_v38, %v969_v37  ;;  %v443_v41 = vld [vmem:[%s5486_s0 + $0x10] sm:$0xff]  ;;  %v444_v42 = vld [vmem:[%s5486_s0 + $0x18] sm:$0xff]  ;;  %v450_v46 = vld [vmem:[%s5486_s0 + $0x48] sm:$0xff]  ;;  %s2924_s17 = sshll.u32 %s5049_s13, 4  ;;  %s5383_s17 = int_to_ptr.vmem [resolvable:$true] %s2924_s17 }
  0x46   : > { %v447_v43 = vld [vmem:[%s5486_s0 + $0x30] sm:$0xff]  ;;  %v448_v44 = vld [vmem:[%s5486_s0 + $0x38] sm:$0xff]  ;;  %v453_v49 = vld [vmem:[%s5486_s0 + $0x60] sm:$0xff]  ;;  %s3785_s28 = scalar_lea.vmem %s5383_s17, 512 }
  0x47   : > { %3530 = vmatpush3.bf16.xpose.msk.msra.mxu1 %vm4019_vm1, %v3528_v51  ;;  %v451_v47 = vld [vmem:[%s5486_s0 + $0x50] sm:$0xff]  ;;  %v452_v48 = vld [vmem:[%s5486_s0 + $0x58] sm:$0xff]  ;;  %v458_v54 = vld [vmem:[%s5486_s0 + $0x88] sm:$0xff]  ;;  %p3786_p2 = scmp.ne.s32.totalorder %s5383_s17, %s3785_s28 }
  0x48   : > { %3533 = vmatprep.subr.msk.bf16.mxu1 %vm4019_vm1, %v3531_v53  ;;  %v455_v51 = vld [vmem:[%s5486_s0 + $0x70] sm:$0xff]  ;;  %v457_v53 = vld [vmem:[%s5486_s0 + $0x80] sm:$0xff]  ;;  %v460_v56 = vld [vmem:[%s5486_s0 + $0x98] sm:$0xff] }
  0x49   : > { %v459_v55 = vld [vmem:[%s5486_s0 + $0x90] sm:$0xff]  ;;  %v461_v57 = vld [vmem:[%s5486_s0 + $0xa0] sm:$0xff]  ;;  %v462_v58 = vld [vmem:[%s5486_s0 + $0xa8] sm:$0xff]  ;;  %p3787_p3 = pnand %p3786_p2, %p3977_p5 }
  0x4a   : > { %v463_v59 = vld [vmem:[%s5486_s0 + $0xb0] sm:$0xff]  ;;  %v464_v60 = vld [vmem:[%s5486_s0 + $0xb8] sm:$0xff]  ;;  %v465_v61 = vld [vmem:[%s5486_s0 + $0xc0] sm:$0xff] }
  0x4b   : > { %3488 = vmatpush3.bf16.xpose.msk.msra.mxu0 %vm4019_vm1, %v3486_v50  ;;  %v454_v50 = vld [vmem:[%s5486_s0 + $0x68] sm:$0xff]  ;;  %v471_v3 = vld [vmem:[%s5486_s0 + $0xf0] sm:$0xff]  ;;  %v472_v6 = vld [vmem:[%s5486_s0 + $0xf8] sm:$0xff]  ;;  %p3788_p4 = pneg %p3787_p3 }
  0x4c   : > { %3491 = vmatprep.subr.msk.bf16.mxu0 %vm4019_vm1, %v3489_v52  ;;  %v456_v52 = vld [vmem:[%s5486_s0 + $0x78] sm:$0xff]  ;;  %v470_v2 = vld [vmem:[%s5486_s0 + $0xe8] sm:$0xff] }
  0x4f   : > { %3536 = vmatpush3.bf16.xpose.msk.msra.mxu1 %vm4019_vm1, %v3534_v63  ;;  %v467_v63 = vld [vmem:[%s5486_s0 + $0xd0] sm:$0xff] }
  0x50   : > { %3539 = vmatprep.subr.msk.bf16.mxu1 %vm4019_vm1, %v3537_v1  ;;  %v469_v1 = vld [vmem:[%s5486_s0 + $0xe0] sm:$0xff] }
  0x53   : > { %3494 = vmatpush3.bf16.xpose.msk.msra.mxu0 %vm4019_vm1, %v3492_v62  ;;  %v466_v62 = vld [vmem:[%s5486_s0 + $0xc8] sm:$0xff] }
  0x54   : > { %3497 = vmatprep.subr.msk.bf16.mxu0 %vm4019_vm1, %v3495_v0  ;;  %v468_v0 = vld [vmem:[%s5486_s0 + $0xd8] sm:$0xff] }
  0x57   : > { %3542 = vmatpush3.bf16.xpose.msk.msra.mxu1 %vm4019_vm1, %v3540_v13 }
  0x58   : > { %3545 = vmatprep.subr.msk.bf16.mxu1 %vm4019_vm1, %v3543_v15 }
  0x5b   : > { %3500 = vmatpush3.bf16.xpose.msk.msra.mxu0 %vm4019_vm1, %v3498_v12 }
  0x5c   : > { %3503 = vmatprep.subr.msk.bf16.mxu0 %vm4019_vm1, %v3501_v14 }
  0x5f   : > { %3548 = vmatpush3.bf16.xpose.msk.msra.mxu1 %vm4019_vm1, %v3546_v25 }
  0x60   : > { %3551 = vmatprep.subr.msk.bf16.mxu1 %vm4019_vm1, %v3549_v27 }
  0x63   : > { %3506 = vmatpush3.bf16.xpose.msk.msra.mxu0 %vm4019_vm1, %v3504_v24 }
  0x64   : > { %3509 = vmatprep.subr.msk.bf16.mxu0 %vm4019_vm1, %v3507_v26 }
  0x67   : > { %3554 = vmatpush3.bf16.xpose.msk.msra.mxu1 %vm4019_vm1, %v3552_v35 }
  0x68   : > { %3557 = vmatprep.subr.msk.bf16.mxu1 %vm4019_vm1, %v3555_v36 }
  0x6b   : > { %3512 = vmatpush3.bf16.xpose.msk.msra.mxu0 %vm4019_vm1, %v3510_v34 }
  0x6f   : > { %3560 = vmatpush3.bf16.xpose.msk.msra.mxu1 %vm4019_vm1, %v3558_v39 }
  0x72   : > { %3306 = vmatmul.mubr.msk.f32.vlgmr.msra.gmra.mrb[0].mxu0 %vm505_vm0, %v4006_v4 }
  0x73   : > { %3307 = vmatprep.mubr.msk.f32.mxu0 %vm505_vm0, %v442_v40 }
  0x76   : > { %3308 = vmatmul.mubr.msk.f32.gmra.mrb[2].mxu0 %vm505_vm0, %v442_v40  ;;  %3402 = vmatmul.mubr.msk.f32.vlgmr.msra.gmra.mrb[0].mxu1 %vm505_vm0, %v4006_v4  ;;  %v446_v4 = vld [vmem:[%s5486_s0 + $0x28] sm:$0xff] }
  0x77   : > { %3309 = vmatprep.mubr.msk.f32.mxu0 %vm505_vm0, %v443_v41  ;;  %3403 = vmatprep.mubr.msk.f32.mxu1 %vm505_vm0, %v442_v40 }
  0x7a   : > { %3310 = vmatmul.mubr.msk.f32.gmra.mrb[4].mxu0 %vm505_vm0, %v443_v41  ;;  %3404 = vmatmul.mubr.msk.f32.gmra.mrb[2].mxu1 %vm505_vm0, %v442_v40 }
  0x7b   : > { %3311 = vmatprep.mubr.msk.f32.mxu0 %vm505_vm0, %v444_v42  ;;  %3405 = vmatprep.mubr.msk.f32.mxu1 %vm505_vm0, %v443_v41 }
  0x7e   : > { %3312 = vmatmul.mubr.msk.f32.gmra.mrb[6].mxu0 %vm505_vm0, %v444_v42  ;;  %3406 = vmatmul.mubr.msk.f32.gmra.mrb[4].mxu1 %vm505_vm0, %v443_v41 }
  0x7f   : > { %3313 = vmatprep.mubr.msk.f32.mxu0 %vm505_vm0, %v445_v5  ;;  %3407 = vmatprep.mubr.msk.f32.mxu1 %vm505_vm0, %v444_v42 }
  0x82   : > { %3314 = vmatmul.mubr.msk.f32.gmra.mrb[8].mxu0 %vm505_vm0, %v445_v5  ;;  %3408 = vmatmul.mubr.msk.f32.gmra.mrb[6].mxu1 %vm505_vm0, %v444_v42 }
  0x83   : > { %3315 = vmatprep.mubr.msk.f32.mxu0 %vm505_vm0, %v446_v4  ;;  %3409 = vmatprep.mubr.msk.f32.mxu1 %vm505_vm0, %v445_v5 }
  0x86   : > { %3316 = vmatmul.mubr.msk.f32.gmra.mrb[10].mxu0 %vm505_vm0, %v446_v4  ;;  %3410 = vmatmul.mubr.msk.f32.gmra.mrb[8].mxu1 %vm505_vm0, %v445_v5 }
  0x87   : > { %3317 = vmatprep.mubr.msk.f32.mxu0 %vm505_vm0, %v447_v43  ;;  %3411 = vmatprep.mubr.msk.f32.mxu1 %vm505_vm0, %v446_v4 }
  0x8a   : > { %3318 = vmatmul.mubr.msk.f32.gmra.mrb[12].mxu0 %vm505_vm0, %v447_v43  ;;  %3412 = vmatmul.mubr.msk.f32.gmra.mrb[10].mxu1 %vm505_vm0, %v446_v4 }
  0x8b   : > { %3319 = vmatprep.mubr.msk.f32.mxu0 %vm505_vm0, %v448_v44  ;;  %3413 = vmatprep.mubr.msk.f32.mxu1 %vm505_vm0, %v447_v43 }
  0x8e   : > { %3320 = vmatmul.mubr.msk.f32.gmra.mrb[14].mxu0 %vm505_vm0, %v448_v44  ;;  %3414 = vmatmul.mubr.msk.f32.gmra.mrb[12].mxu1 %vm505_vm0, %v447_v43 }
  0x8f   : > { %3321 = vmatprep.mubr.msk.f32.mxu0 %vm505_vm0, %v449_v45  ;;  %3415 = vmatprep.mubr.msk.f32.mxu1 %vm505_vm0, %v448_v44 }
  0x92   : > { %3322 = vmatmul.mubr.msk.f32.gmra.mrb[16].mxu0 %vm505_vm0, %v449_v45  ;;  %3416 = vmatmul.mubr.msk.f32.gmra.mrb[14].mxu1 %vm505_vm0, %v448_v44 }
  0x93   : > { %3323 = vmatprep.mubr.msk.f32.mxu0 %vm505_vm0, %v450_v46  ;;  %3417 = vmatprep.mubr.msk.f32.mxu1 %vm505_vm0, %v449_v45 }
  0x96   : > { %3324 = vmatmul.mubr.msk.f32.gmra.mrb[18].mxu0 %vm505_vm0, %v450_v46  ;;  %3418 = vmatmul.mubr.msk.f32.gmra.mrb[16].mxu1 %vm505_vm0, %v449_v45 }
  0x97   : > { %3325 = vmatprep.mubr.msk.f32.mxu0 %vm505_vm0, %v451_v47  ;;  %3419 = vmatprep.mubr.msk.f32.mxu1 %vm505_vm0, %v450_v46 }
  0x9a   : > { %3326 = vmatmul.mubr.msk.f32.gmra.mrb[20].mxu0 %vm505_vm0, %v451_v47  ;;  %3420 = vmatmul.mubr.msk.f32.gmra.mrb[18].mxu1 %vm505_vm0, %v450_v46 }
  0x9b   : > { %3327 = vmatprep.mubr.msk.f32.mxu0 %vm505_vm0, %v452_v48  ;;  %3421 = vmatprep.mubr.msk.f32.mxu1 %vm505_vm0, %v451_v47 }
  0x9e   : > { %3328 = vmatmul.mubr.msk.f32.gmra.mrb[22].mxu0 %vm505_vm0, %v452_v48  ;;  %3422 = vmatmul.mubr.msk.f32.gmra.mrb[20].mxu1 %vm505_vm0, %v451_v47 }
  0x9f   : > { %3329 = vmatprep.mubr.msk.f32.mxu0 %vm505_vm0, %v453_v49  ;;  %3423 = vmatprep.mubr.msk.f32.mxu1 %vm505_vm0, %v452_v48 }
  0xa2   : > { %3330 = vmatmul.mubr.msk.f32.gmra.mrb[24].mxu0 %vm505_vm0, %v453_v49  ;;  %3424 = vmatmul.mubr.msk.f32.gmra.mrb[22].mxu1 %vm505_vm0, %v452_v48 }
  0xa3   : > { %3331 = vmatprep.mubr.msk.f32.mxu0 %vm505_vm0, %v454_v50  ;;  %3425 = vmatprep.mubr.msk.f32.mxu1 %vm505_vm0, %v453_v49 }
  0xa6   : > { %3332 = vmatmul.mubr.msk.f32.gmra.mrb[26].mxu0 %vm505_vm0, %v454_v50  ;;  %3426 = vmatmul.mubr.msk.f32.gmra.mrb[24].mxu1 %vm505_vm0, %v453_v49 }
  0xa7   : > { %3333 = vmatprep.mubr.msk.f32.mxu0 %vm505_vm0, %v455_v51  ;;  %3427 = vmatprep.mubr.msk.f32.mxu1 %vm505_vm0, %v454_v50 }
  0xaa   : > { %3334 = vmatmul.mubr.msk.f32.gmra.mrb[28].mxu0 %vm505_vm0, %v455_v51  ;;  %3428 = vmatmul.mubr.msk.f32.gmra.mrb[26].mxu1 %vm505_vm0, %v454_v50 }
  0xab   : > { %3335 = vmatprep.mubr.msk.f32.mxu0 %vm505_vm0, %v456_v52  ;;  %3429 = vmatprep.mubr.msk.f32.mxu1 %vm505_vm0, %v455_v51 }
  0xae   : > { %3336 = vmatmul.mubr.msk.f32.gmra.mrb[30].mxu0 %vm505_vm0, %v456_v52  ;;  %3430 = vmatmul.mubr.msk.f32.gmra.mrb[28].mxu1 %vm505_vm0, %v455_v51 }
  0xaf   : > { %3337 = vmatprep.mubr.msk.f32.mxu0 %vm505_vm0, %v457_v53  ;;  %3431 = vmatprep.mubr.msk.f32.mxu1 %vm505_vm0, %v456_v52 }
  0xb2   : > { %3338 = vmatmul.mubr.msk.f32.gmra.mrb[32].mxu0 %vm505_vm0, %v457_v53  ;;  %3432 = vmatmul.mubr.msk.f32.gmra.mrb[30].mxu1 %vm505_vm0, %v456_v52 }
  0xb3   : > { %3339 = vmatprep.mubr.msk.f32.mxu0 %vm505_vm0, %v458_v54  ;;  %3433 = vmatprep.mubr.msk.f32.mxu1 %vm505_vm0, %v457_v53 }
  0xb6   : > { %3340 = vmatmul.mubr.msk.f32.gmra.mrb[34].mxu0 %vm505_vm0, %v458_v54  ;;  %3434 = vmatmul.mubr.msk.f32.gmra.mrb[32].mxu1 %vm505_vm0, %v457_v53 }
  0xb7   : > { %3341 = vmatprep.mubr.msk.f32.mxu0 %vm505_vm0, %v459_v55  ;;  %3435 = vmatprep.mubr.msk.f32.mxu1 %vm505_vm0, %v458_v54 }
  0xba   : > { %3342 = vmatmul.mubr.msk.f32.gmra.mrb[36].mxu0 %vm505_vm0, %v459_v55  ;;  %3436 = vmatmul.mubr.msk.f32.gmra.mrb[34].mxu1 %vm505_vm0, %v458_v54 }
  0xbb   : > { %3343 = vmatprep.mubr.msk.f32.mxu0 %vm505_vm0, %v460_v56  ;;  %3437 = vmatprep.mubr.msk.f32.mxu1 %vm505_vm0, %v459_v55 }
  0xbe   : > { %3344 = vmatmul.mubr.msk.f32.gmra.mrb[38].mxu0 %vm505_vm0, %v460_v56  ;;  %3438 = vmatmul.mubr.msk.f32.gmra.mrb[36].mxu1 %vm505_vm0, %v459_v55 }
  0xbf   : > { %3345 = vmatprep.mubr.msk.f32.mxu0 %vm505_vm0, %v461_v57  ;;  %3439 = vmatprep.mubr.msk.f32.mxu1 %vm505_vm0, %v460_v56 }
  0xc2   : > { %3346 = vmatmul.mubr.msk.f32.gmra.mrb[40].mxu0 %vm505_vm0, %v461_v57  ;;  %3440 = vmatmul.mubr.msk.f32.gmra.mrb[38].mxu1 %vm505_vm0, %v460_v56 }
  0xc3   : > { %3347 = vmatprep.mubr.msk.f32.mxu0 %vm505_vm0, %v462_v58  ;;  %3441 = vmatprep.mubr.msk.f32.mxu1 %vm505_vm0, %v461_v57 }
  0xc6   : > { %3348 = vmatmul.mubr.msk.f32.gmra.mrb[42].mxu0 %vm505_vm0, %v462_v58  ;;  %3442 = vmatmul.mubr.msk.f32.gmra.mrb[40].mxu1 %vm505_vm0, %v461_v57 }
  0xc7   : > { %3349 = vmatprep.mubr.msk.f32.mxu0 %vm505_vm0, %v463_v59  ;;  %3443 = vmatprep.mubr.msk.f32.mxu1 %vm505_vm0, %v462_v58 }
  0xca   : > { %3350 = vmatmul.mubr.msk.f32.gmra.mrb[44].mxu0 %vm505_vm0, %v463_v59  ;;  %3444 = vmatmul.mubr.msk.f32.gmra.mrb[42].mxu1 %vm505_vm0, %v462_v58 }
  0xcb   : > { %3351 = vmatprep.mubr.msk.f32.mxu0 %vm505_vm0, %v464_v60  ;;  %3445 = vmatprep.mubr.msk.f32.mxu1 %vm505_vm0, %v463_v59 }
  0xce   : > { %3352 = vmatmul.mubr.msk.f32.gmra.mrb[46].mxu0 %vm505_vm0, %v464_v60  ;;  %3446 = vmatmul.mubr.msk.f32.gmra.mrb[44].mxu1 %vm505_vm0, %v463_v59 }
  0xcf   : > { %3353 = vmatprep.mubr.msk.f32.mxu0 %vm505_vm0, %v465_v61  ;;  %3447 = vmatprep.mubr.msk.f32.mxu1 %vm505_vm0, %v464_v60 }
  0xd2   : > { %3354 = vmatmul.mubr.msk.f32.gmra.mrb[48].mxu0 %vm505_vm0, %v465_v61  ;;  %3448 = vmatmul.mubr.msk.f32.gmra.mrb[46].mxu1 %vm505_vm0, %v464_v60 }
  0xd3   : > { %3355 = vmatprep.mubr.msk.f32.mxu0 %vm505_vm0, %v466_v62  ;;  %3449 = vmatprep.mubr.msk.f32.mxu1 %vm505_vm0, %v465_v61 }
  0xd6   : > { %3356 = vmatmul.mubr.msk.f32.gmra.mrb[50].mxu0 %vm505_vm0, %v466_v62  ;;  %3450 = vmatmul.mubr.msk.f32.gmra.mrb[48].mxu1 %vm505_vm0, %v465_v61 }
  0xd7   : > { %3357 = vmatprep.mubr.msk.f32.mxu0 %vm505_vm0, %v467_v63  ;;  %3451 = vmatprep.mubr.msk.f32.mxu1 %vm505_vm0, %v466_v62 }
  0xda   : > { %3358 = vmatmul.mubr.msk.f32.gmra.mrb[52].mxu0 %vm505_vm0, %v467_v63  ;;  %3452 = vmatmul.mubr.msk.f32.gmra.mrb[50].mxu1 %vm505_vm0, %v466_v62 }
  0xdb   : > { %3359 = vmatprep.mubr.msk.f32.mxu0 %vm505_vm0, %v468_v0  ;;  %3453 = vmatprep.mubr.msk.f32.mxu1 %vm505_vm0, %v467_v63 }
  0xde   : > { %3360 = vmatmul.mubr.msk.f32.gmra.mrb[54].mxu0 %vm505_vm0, %v468_v0  ;;  %3454 = vmatmul.mubr.msk.f32.gmra.mrb[52].mxu1 %vm505_vm0, %v467_v63 }
  0xdf   : > { %3361 = vmatprep.mubr.msk.f32.mxu0 %vm505_vm0, %v469_v1  ;;  %3455 = vmatprep.mubr.msk.f32.mxu1 %vm505_vm0, %v468_v0 }
  0xe2   : > { %3362 = vmatmul.mubr.msk.f32.gmra.mrb[56].mxu0 %vm505_vm0, %v469_v1  ;;  %3456 = vmatmul.mubr.msk.f32.gmra.mrb[54].mxu1 %vm505_vm0, %v468_v0 }
  0xe3   : > { %3363 = vmatprep.mubr.msk.f32.mxu0 %vm505_vm0, %v470_v2  ;;  %3457 = vmatprep.mubr.msk.f32.mxu1 %vm505_vm0, %v469_v1 }
  0xe6   : > { %3364 = vmatmul.mubr.msk.f32.gmra.mrb[58].mxu0 %vm505_vm0, %v470_v2  ;;  %3458 = vmatmul.mubr.msk.f32.gmra.mrb[56].mxu1 %vm505_vm0, %v469_v1 }
  0xe7   : > { %3365 = vmatprep.mubr.msk.f32.mxu0 %vm505_vm0, %v471_v3  ;;  %3459 = vmatprep.mubr.msk.f32.mxu1 %vm505_vm0, %v470_v2 }
  0xea   : > { %3366 = vmatmul.mubr.msk.f32.gmra.mrb[60].mxu0 %vm505_vm0, %v471_v3  ;;  %3460 = vmatmul.mubr.msk.f32.gmra.mrb[58].mxu1 %vm505_vm0, %v470_v2 }
  0xeb   : > { %3367 = vmatprep.mubr.msk.f32.mxu0 %vm505_vm0, %v472_v6  ;;  %3461 = vmatprep.mubr.msk.f32.mxu1 %vm505_vm0, %v471_v3 }
  0xee   : > { %3368 = vmatmul.mubr.msk.f32.gmra.mrb[62].mxu0 %vm505_vm0, %v472_v6  ;;  %3462 = vmatmul.mubr.msk.f32.gmra.mrb[60].mxu1 %vm505_vm0, %v471_v3 }
  0xef   : > { %3463 = vmatprep.mubr.msk.f32.mxu1 %vm505_vm0, %v472_v6 }
  0xf2   : > { %3464 = vmatmul.mubr.msk.f32.gmra.mrb[62].mxu1 %vm505_vm0, %v472_v6 }
 0x145   : > { %v4377_v7 = vpop.f32.mrb[0].mxu0 }
 0x146   : > { %v4379_v8 = vpop.f32.mrb[1].mxu0 }
 0x149   : > { %v4381_v9 = vpop.f32.mrb[2].mxu0  ;;  %v4391_v16 = vpop.f32.mrb[0].mxu1 }
 0x14a   : > { %v1344_v10 = vmax.f32 %v4377_v7, %v4381_v9  ;;  %v4385_v11 = vpop.f32.mrb[3].mxu0  ;;  %v4395_v19 = vpop.f32.mrb[1].mxu1 }
 0x14b   : > { %v1351_v12 = vmax.f32 %v4379_v8, %v4385_v11 }
 0x14c   : > { %v1345_v13 = vrot.slane %v1344_v10, 4 }
 0x14d   : > { %v1352_v14 = vrot.slane %v1351_v12, 4  ;;  %v4389_v15 = vpop.f32.mrb[4].mxu0  ;;  %v4399_v22 = vpop.f32.mrb[2].mxu1 }
 0x14e   : > { %v1346_v17 = vmax.f32 %v1344_v10, %v1345_v13  ;;  %v4393_v18 = vpop.f32.mrb[5].mxu0  ;;  %v4405_v26 = vpop.f32.mrb[3].mxu1 }
 0x14f   : > { %v1353_v20 = vmax.f32 %v1351_v12, %v1352_v14 }
 0x150   : > { %v1347_v23 = vrot.slane %v1346_v17, 2 }
 0x151   : > { %v4397_v21 = vpop.f32.mrb[6].mxu0  ;;  %v1354_v27 = vrot.slane %v1353_v20, 2  ;;  %v4411_v32 = vpop.f32.mrb[4].mxu1 }
 0x152   : > { %v1358_v24 = vmax.f32 %v4389_v15, %v4397_v21  ;;  %v4403_v25 = vpop.f32.mrb[7].mxu0  ;;  %v1348_v33 = vmax.f32 %v1346_v17, %v1347_v23  ;;  %v4415_v36 = vpop.f32.mrb[5].mxu1 }
 0x153   : > { %v1365_v28 = vmax.f32 %v4393_v18, %v4403_v25  ;;  %v1355_v37 = vmax.f32 %v1353_v20, %v1354_v27 }
 0x154   : > { %v1359_v29 = vrot.slane %v1358_v24, 4  ;;  %v1349_v5 = vrot.slane %v1348_v33, 1 }
 0x155   : > { %v1366_v30 = vrot.slane %v1365_v28, 4  ;;  %v4409_v31 = vpop.f32.mrb[8].mxu0  ;;  %v4419_v42 = vpop.f32.mrb[6].mxu1  ;;  %v1356_v46 = vrot.slane %v1355_v37, 1 }
 0x156   : > { %v1360_v34 = vmax.f32 %v1358_v24, %v1359_v29  ;;  %v4413_v35 = vpop.f32.mrb[9].mxu0  ;;  %v4425_v45 = vpop.f32.mrb[7].mxu1  ;;  %v1350_v55 = vmax.f32 %v1348_v33, %v1349_v5 }
 0x157   : > { %v1367_v38 = vmax.f32 %v1365_v28, %v1366_v30  ;;  %v1357_v60 = vmax.f32 %v1355_v37, %v1356_v46 }
 0x158   : > { %v1361_v39 = vrot.slane %v1360_v34, 2 }
 0x159   : > { %v1368_v40 = vrot.slane %v1367_v38, 2  ;;  %v4417_v41 = vpop.f32.mrb[10].mxu0  ;;  %v4431_v54 = vpop.f32.mrb[8].mxu1 }
 0x15a   : > { %v1362_v4 = vmax.f32 %v1360_v34, %v1361_v39  ;;  %v1372_v43 = vmax.f32 %v4409_v31, %v4417_v41  ;;  %v4423_v44 = vpop.f32.mrb[11].mxu0  ;;  %v4435_v59 = vpop.f32.mrb[9].mxu1 }
 0x15b   : > { %v1369_v47 = vmax.f32 %v1367_v38, %v1368_v40  ;;  %v1379_v48 = vmax.f32 %v4413_v35, %v4423_v44 }
 0x15c   : > { %v1363_v49 = vrot.slane %v1362_v4, 1  ;;  %v1373_v50 = vrot.slane %v1372_v43, 4 }
 0x15d   : > { %v1370_v51 = vrot.slane %v1369_v47, 1  ;;  %v1380_v52 = vrot.slane %v1379_v48, 4  ;;  %v4429_v53 = vpop.f32.mrb[12].mxu0  ;;  %v4441_v6 = vpop.f32.mrb[10].mxu1 }
 0x15e   : > { %v1364_v56 = vmax.f32 %v1362_v4, %v1363_v49  ;;  %v1374_v57 = vmax.f32 %v1372_v43, %v1373_v50  ;;  %v4433_v58 = vpop.f32.mrb[13].mxu0  ;;  %v4447_v14 = vpop.f32.mrb[11].mxu1 }
 0x15f   : > { %v1371_v61 = vmax.f32 %v1369_v47, %v1370_v51  ;;  %v1381_v62 = vmax.f32 %v1379_v48, %v1380_v52 }
 0x160   : > { %v1601_v63 = vsel %vm1600_vm2, %v1364_v56, %v1350_v55  ;;  %v1375_v0 = vrot.slane %v1374_v57, 2 }
 0x161   : > { %v1614_v1 = vsel %vm1600_vm2, %v1371_v61, %v1357_v60  ;;  %v1382_v2 = vrot.slane %v1381_v62, 2  ;;  %v4439_v3 = vpop.f32.mrb[14].mxu0  ;;  %v4453_v30 = vpop.f32.mrb[12].mxu1 }
 0x162   : > { %v1376_v10 = vmax.f32 %v1374_v57, %v1375_v0  ;;  %v1386_v12 = vmax.f32 %v4429_v53, %v4439_v3  ;;  %v4445_v13 = vpop.f32.mrb[15].mxu0  ;;  %v4457_v38 = vpop.f32.mrb[13].mxu1 }
 0x163   : > { %v1383_v17 = vmax.f32 %v1381_v62, %v1382_v2  ;;  %v1393_v20 = vmax.f32 %v4433_v58, %v4445_v13  ;;  %5550 = vst [vmem:[#allocation14_spill] sm:$0xff] %v4457_v38 }
 0x164   : > { %v1377_v23 = vrot.slane %v1376_v10, 1  ;;  %v1387_v24 = vrot.slane %v1386_v12, 4 }
 0x165   : > { %v1384_v27 = vrot.slane %v1383_v17, 1  ;;  %v1394_v28 = vrot.slane %v1393_v20, 4  ;;  %v4451_v29 = vpop.f32.mrb[16].mxu0  ;;  %v4463_v48 = vpop.f32.mrb[14].mxu1 }
 0x166   : > { %5548 = vst [vmem:[#allocation12_spill] sm:$0xff] %v4451_v29  ;;  %v1378_v33 = vmax.f32 %v1376_v10, %v1377_v23  ;;  %v1388_v34 = vmax.f32 %v1386_v12, %v1387_v24  ;;  %v4455_v37 = vpop.f32.mrb[17].mxu0  ;;  %5552 = vst [vmem:[#allocation16_spill] sm:$0xff] %v4463_v48  ;;  %v4469_v52 = vpop.f32.mrb[15].mxu1 }
 0x167   : > { %5549 = vst [vmem:[#allocation13_spill] sm:$0xff] %v4455_v37  ;;  %v1385_v39 = vmax.f32 %v1383_v17, %v1384_v27  ;;  %v1395_v40 = vmax.f32 %v1393_v20, %v1394_v28  ;;  %5554 = vst [vmem:[#allocation18_spill] sm:$0xff] %v4469_v52 }
 0x168   : > { %v1603_v5 = vsel %vm1602_vm3, %v1378_v33, %v1601_v63  ;;  %v1389_v4 = vrot.slane %v1388_v34, 2 }
 0x169   : > { %v1615_v43 = vsel %vm1602_vm3, %v1385_v39, %v1614_v1  ;;  %v1396_v46 = vrot.slane %v1395_v40, 2  ;;  %v4461_v47 = vpop.f32.mrb[18].mxu0  ;;  %v4475_v0 = vpop.f32.mrb[16].mxu1 }
 0x16a   : > { %5551 = vst [vmem:[#allocation15_spill] sm:$0xff] %v4461_v47  ;;  %v1390_v49 = vmax.f32 %v1388_v34, %v1389_v4  ;;  %v1400_v50 = vmax.f32 %v4451_v29, %v4461_v47  ;;  %v4467_v51 = vpop.f32.mrb[19].mxu0  ;;  %5556 = vst [vmem:[#allocation20_spill] sm:$0xff] %v4475_v0  ;;  %v4479_v12 = vpop.f32.mrb[17].mxu1 }
 0x16b   : > { %5553 = vst [vmem:[#allocation17_spill] sm:$0xff] %v4467_v51  ;;  %v1397_v55 = vmax.f32 %v1395_v40, %v1396_v46  ;;  %v1407_v56 = vmax.f32 %v4455_v37, %v4467_v51  ;;  %5558 = vst [vmem:[#allocation22_spill] sm:$0xff] %v4479_v12 }
 0x16c   : > { %v1391_v57 = vrot.slane %v1390_v49, 1  ;;  %v1401_v60 = vrot.slane %v1400_v50, 4 }
 0x16d   : > { %v1398_v61 = vrot.slane %v1397_v55, 1  ;;  %v1408_v62 = vrot.slane %v1407_v56, 4  ;;  %v4473_v63 = vpop.f32.mrb[20].mxu0  ;;  %v4485_v34 = vpop.f32.mrb[18].mxu1 }
 0x16e   : > { %5555 = vst [vmem:[#allocation19_spill] sm:$0xff] %v4473_v63  ;;  %v1392_v1 = vmax.f32 %v1390_v49, %v1391_v57  ;;  %v1402_v2 = vmax.f32 %v1400_v50, %v1401_v60  ;;  %v4477_v10 = vpop.f32.mrb[21].mxu0  ;;  %5560 = vst [vmem:[#allocation24_spill] sm:$0xff] %v4485_v34  ;;  %v4491_v46 = vpop.f32.mrb[19].mxu1 }
 0x16f   : > { %5557 = vst [vmem:[#allocation21_spill] sm:$0xff] %v4477_v10  ;;  %v1399_v17 = vmax.f32 %v1397_v55, %v1398_v61  ;;  %v1409_v20 = vmax.f32 %v1407_v56, %v1408_v62  ;;  %5562 = vst [vmem:[#allocation26_spill] sm:$0xff] %v4491_v46 }
 0x170   : > { %v1605_v23 = vsel %vm1604_vm4, %v1392_v1, %v1603_v5  ;;  %v1403_v24 = vrot.slane %v1402_v2, 2 }
 0x171   : > { %v1616_v27 = vsel %vm1604_vm4, %v1399_v17, %v1615_v43  ;;  %v1410_v28 = vrot.slane %v1409_v20, 2  ;;  %v4483_v33 = vpop.f32.mrb[22].mxu0  ;;  %v4497_v60 = vpop.f32.mrb[20].mxu1 }
 0x172   : > { %5559 = vst [vmem:[#allocation23_spill] sm:$0xff] %v4483_v33  ;;  %v1404_v39 = vmax.f32 %v1402_v2, %v1403_v24  ;;  %v1414_v40 = vmax.f32 %v4473_v63, %v4483_v33  ;;  %v4489_v4 = vpop.f32.mrb[23].mxu0  ;;  %5564 = vst [vmem:[#allocation28_spill] sm:$0xff] %v4497_v60  ;;  %v4501_v2 = vpop.f32.mrb[21].mxu1  ;;  %v1664_v33 = vlaneseq }
 0x173   : > { %5561 = vst [vmem:[#allocation25_spill] sm:$0xff] %v4489_v4  ;;  %v1411_v49 = vmax.f32 %v1409_v20, %v1410_v28  ;;  %v1421_v5 = vmax.f32 %v4477_v10, %v4489_v4  ;;  %5566 = vst [vmem:[#allocation30_spill] sm:$0xff] %v4501_v2 }
 0x174   : > { %v1405_v50 = vrot.slane %v1404_v39, 1  ;;  %v1415_v55 = vrot.slane %v1414_v40, 4 }
 0x175   : > { %v1412_v43 = vrot.slane %v1411_v49, 1  ;;  %v1422_v56 = vrot.slane %v1421_v5, 4  ;;  %v4495_v57 = vpop.f32.mrb[24].mxu0  ;;  %v4507_v4 = vpop.f32.mrb[22].mxu1 }
 0x176   : > { %5563 = vst [vmem:[#allocation27_spill] sm:$0xff] %v4495_v57  ;;  %v1406_v61 = vmax.f32 %v1404_v39, %v1405_v50  ;;  %v1416_v62 = vmax.f32 %v1414_v40, %v1415_v55  ;;  %v4499_v1 = vpop.f32.mrb[25].mxu0  ;;  %5568 = vst [vmem:[#allocation32_spill] sm:$0xff] %v4507_v4  ;;  %v4513_v50 = vpop.f32.mrb[23].mxu1 }
 0x177   : > { %5565 = vst [vmem:[#allocation29_spill] sm:$0xff] %v4499_v1  ;;  %v1413_v17 = vmax.f32 %v1411_v49, %v1412_v43  ;;  %v1423_v20 = vmax.f32 %v1421_v5, %v1422_v56  ;;  %5570 = vst [vmem:[#allocation34_spill] sm:$0xff] %v4513_v50 }
 0x178   : > { %v1607_v24 = vsel %vm1606_vm5, %v1406_v61, %v1605_v23  ;;  %v1417_v28 = vrot.slane %v1416_v62, 2 }
 0x179   : > { %v1617_v46 = vsel %vm1606_vm5, %v1413_v17, %v1616_v27  ;;  %v1424_v34 = vrot.slane %v1423_v20, 2  ;;  %v4505_v12 = vpop.f32.mrb[26].mxu0  ;;  %v4519_v61 = vpop.f32.mrb[24].mxu1 }
 0x17a   : > { %5567 = vst [vmem:[#allocation31_spill] sm:$0xff] %v4505_v12  ;;  %v1418_v0 = vmax.f32 %v1416_v62, %v1417_v28  ;;  %v1428_v39 = vmax.f32 %v4495_v57, %v4505_v12  ;;  %v4511_v40 = vpop.f32.mrb[27].mxu0  ;;  %5571 = vst [vmem:[#allocation35_spill] sm:$0xff] %v4519_v61  ;;  %v4523_v2 = vpop.f32.mrb[25].mxu1  ;;  %v3897_v61 = vmov 1966171168  }
 0x17b   : > { %5569 = vst [vmem:[#allocation33_spill] sm:$0xff] %v4511_v40  ;;  %v1425_v49 = vmax.f32 %v1423_v20, %v1424_v34  ;;  %v1435_v23 = vmax.f32 %v4499_v1, %v4511_v40  ;;  %5572 = vst [vmem:[#allocation36_spill] sm:$0xff] %v4523_v2  ;;  %v1662_v10 = vunpack.c.l.s4 %v3897_v61 }
 0x17c   : > { %v1419_v5 = vrot.slane %v1418_v0, 1  ;;  %v1429_v55 = vrot.slane %v1428_v39, 4 }
 0x17d   : > { %v1426_v27 = vrot.slane %v1425_v49, 1  ;;  %v1436_v43 = vrot.slane %v1435_v23, 4  ;;  %v4517_v56 = vpop.f32.mrb[28].mxu0  ;;  %v4529_v12 = vpop.f32.mrb[26].mxu1 }
 0x17e   : > { %v1420_v62 = vmax.f32 %v1418_v0, %v1419_v5  ;;  %v1430_v17 = vmax.f32 %v1428_v39, %v1429_v55  ;;  %v4521_v28 = vpop.f32.mrb[29].mxu0  ;;  %5573 = vst [vmem:[#allocation37_spill] sm:$0xff] %v4529_v12  ;;  %v4535_v5 = vpop.f32.mrb[27].mxu1 }
 0x17f   : > { %v1427_v50 = vmax.f32 %v1425_v49, %v1426_v27  ;;  %v1437_v34 = vmax.f32 %v1435_v23, %v1436_v43  ;;  %5574 = vst [vmem:[#allocation38_spill] sm:$0xff] %v4535_v5 }
 0x180   : > { %v1609_v20 = vsel %vm1608_vm6, %v1420_v62, %v1607_v24  ;;  %v1431_v40 = vrot.slane %v1430_v17, 2 }
 0x181   : > { %v1618_v4 = vsel %vm1608_vm6, %v1427_v50, %v1617_v46  ;;  %v1438_v1 = vrot.slane %v1437_v34, 2  ;;  %v4527_v60 = vpop.f32.mrb[30].mxu0  ;;  %v4541_v43 = vpop.f32.mrb[28].mxu1 }
 0x182   : > { %v1432_v57 = vmax.f32 %v1430_v17, %v1431_v40  ;;  %v1442_v0 = vmax.f32 %v4517_v56, %v4527_v60  ;;  %v4533_v39 = vpop.f32.mrb[31].mxu0  ;;  %5576 = vst [vmem:[#allocation40_spill] sm:$0xff] %v4541_v43  ;;  %v4545_v12 = vpop.f32.mrb[29].mxu1 }
 0x183   : > { %v1439_v49 = vmax.f32 %v1437_v34, %v1438_v1  ;;  %v1449_v24 = vmax.f32 %v4521_v28, %v4533_v39  ;;  %5578 = vst [vmem:[#allocation42_spill] sm:$0xff] %v4545_v12 }
 0x184   : > { %v1433_v23 = vrot.slane %v1432_v57, 1  ;;  %v1443_v46 = vrot.slane %v1442_v0, 4 }
 0x185   : > { %v1440_v50 = vrot.slane %v1439_v49, 1  ;;  %v1450_v55 = vrot.slane %v1449_v24, 4  ;;  %v4539_v27 = vpop.f32.mrb[32].mxu0  ;;  %v4551_v43 = vpop.f32.mrb[30].mxu1 }
 0x186   : > { %5575 = vst [vmem:[#allocation39_spill] sm:$0xff] %v4539_v27  ;;  %v1434_v40 = vmax.f32 %v1432_v57, %v1433_v23  ;;  %v1444_v62 = vmax.f32 %v1442_v0, %v1443_v46  ;;  %v4543_v17 = vpop.f32.mrb[33].mxu0  ;;  %5580 = vst [vmem:[#allocation44_spill] sm:$0xff] %v4551_v43  ;;  %v1663_v46 = vunpack.c.0.s8 %v1662_v10 }
 0x187   : > { %5577 = vst [vmem:[#allocation41_spill] sm:$0xff] %v4543_v17  ;;  %v1441_v5 = vmax.f32 %v1439_v49, %v1440_v50  ;;  %v1451_v1 = vmax.f32 %v1449_v24, %v1450_v55  ;;  %v4557_v49 = vpop.f32.mrb[31].mxu1 }
 0x188   : > { %v1611_v34 = vsel %vm1610_vm7, %v1434_v40, %v1609_v20  ;;  %v1445_v2 = vrot.slane %v1444_v62, 2  ;;  %5582 = vst [vmem:[#allocation46_spill] sm:$0xff] %v4557_v49 }
 0x189   : > { %v1619_v63 = vsel %vm1610_vm7, %v1441_v5, %v1618_v4  ;;  %v1452_v52 = vrot.slane %v1451_v1, 2  ;;  %v4549_v51 = vpop.f32.mrb[34].mxu0  ;;  %v1665_v4 = vshrl.u32 %v1664_v33, 7 }
 0x18a   : > { %5579 = vst [vmem:[#allocation43_spill] sm:$0xff] %v4549_v51  ;;  %v1446_v57 = vmax.f32 %v1444_v62, %v1445_v2  ;;  %v1456_v0 = vmax.f32 %v4539_v27, %v4549_v51  ;;  %v4555_v23 = vpop.f32.mrb[35].mxu0 }
 0x18b   : > { %5581 = vst [vmem:[#allocation45_spill] sm:$0xff] %v4555_v23  ;;  %v1453_v20 = vmax.f32 %v1451_v1, %v1452_v52  ;;  %v1463_v61 = vmax.f32 %v4543_v17, %v4555_v23  ;;  %v4566_v1 = vsub.s32 %v1663_v46, %v1665_v4  ;;  %v4568_v23 = vsub.s32 0, %v1665_v4 }
 0x18c   : > { %v1447_v24 = vrot.slane %v1446_v57, 1  ;;  %v1457_v5 = vrot.slane %v1456_v0, 4  ;;  %v4571_v49 = vsub.s32 1, %v1665_v4 }
 0x18d   : > { %v1454_v50 = vrot.slane %v1453_v20, 1  ;;  %v1464_v55 = vrot.slane %v1463_v61, 4  ;;  %v4561_v40 = vpop.f32.mrb[36].mxu0  ;;  %5585 = vst [vmem:[#allocation49_spill] sm:$0xff] %v4566_v1 }
 0x18e   : > { %5583 = vst [vmem:[#allocation47_spill] sm:$0xff] %v4561_v40  ;;  %v1448_v2 = vmax.f32 %v1446_v57, %v1447_v24  ;;  %v1458_v62 = vmax.f32 %v1456_v0, %v1457_v5  ;;  %v4563_v51 = vpop.f32.mrb[37].mxu0 }
 0x18f   : > { %5584 = vst [vmem:[#allocation48_spill] sm:$0xff] %v4563_v51  ;;  %v1455_v27 = vmax.f32 %v1453_v20, %v1454_v50  ;;  %v1465_v43 = vmax.f32 %v1463_v61, %v1464_v55 }
 0x190   : > { %v1613_v52 = vsel %vm1612_vm8, %v1448_v2, %v1611_v34  ;;  %v1459_v10 = vrot.slane %v1458_v62, 2 }
 0x191   : > { %v1643_v33 = vsub.f32 -inf, %v1613_v52  ;;  %v1620_v17 = vsel %vm1612_vm8, %v1455_v27, %v1619_v63  ;;  %v1466_v12 = vrot.slane %v1465_v43, 2  ;;  %v4573_v47 = vpop.f32.mrb[38].mxu0 }
 0x192   : > { %5586 = vst [vmem:[#allocation50_spill] sm:$0xff] %v4573_v47  ;;  %v1644_v57 = vsub.f32 -inf, %v1620_v17  ;;  %v1659_v0 = vcombine.low %v1613_v52, %v1620_v17  ;;  %v1660_v24 = vcombine.high %v1613_v52, %v1620_v17  ;;  %v1460_v20 = vmax.f32 %v1458_v62, %v1459_v10  ;;  %v4575_v61 = vpop.f32.mrb[39].mxu0 }
 0x193   : > { %5587 = vst [vmem:[#allocation51_spill] sm:$0xff] %v4575_v61  ;;  %v1647_v34 = vmul.f32 1.442695, %v1643_v33  ;;  %v1467_v46 = vmax.f32 %v1465_v43, %v1466_v12  ;;  %v1470_v5 = vmax.f32 %v4561_v40, %v4573_v47  ;;  %v1477_v50 = vmax.f32 %v4563_v51, %v4575_v61 }
 0x194   : > { %v1649_v63 = vmul.f32 1.442695, %v1644_v57  ;;  %v1667_v27 = vrot.slane %v1659_v0, %v4566_v1  ;;  %v1674_v4 = vrot.slane %v1660_v24, %v4566_v1  ;;  %v1461_v55 = vrot.slane %v1460_v20, 1 }
 0x195   : > { %v1468_v2 = vrot.slane %v1467_v46, 1  ;;  %v1471_v37 = vrot.slane %v1470_v5, 4  ;;  %v1478_v17 = vrot.slane %v1477_v50, 4  ;;  %v4583_v62 = vpop.f32.mrb[40].mxu0  ;;  %3625 = vpow2.f32 %v1647_v34 }
 0x196   : > { %5588 = vst [vmem:[#allocation52_spill] sm:$0xff] %v4583_v62  ;;  %v1675_v52 = vcombine.high %v1667_v27, %v1667_v27  ;;  %v1676_v12 = vcombine.high %v1674_v4, %v1674_v4  ;;  %v1683_v43 = vrot.slane %v1667_v27, %v4566_v1  ;;  %v4586_v10 = vpop.f32.mrb[41].mxu0  ;;  %3627 = vpow2.f32 %v1649_v63 }
 0x197   : > { %5589 = vst [vmem:[#allocation53_spill] sm:$0xff] %v4586_v10  ;;  %v4589_v33 = vrot.slane %v1674_v4, %v4566_v1  ;;  %v4591_v57 = vmax.f32 %v1460_v20, %v1461_v55  ;;  %v1472_v0 = vmax.f32 %v1470_v5, %v1471_v37  ;;  %v4601_v27 = vmax.f32 %v1467_v46, %v1468_v2 }
 0x198   : > { %v4594_v24 = vrot.slane %v1676_v12, %v4566_v1  ;;  %v1762_v61 = vrot.slane %v1683_v43, %v4568_v23  ;;  %v1766_v34 = vrot.slane %v1683_v43, %v4571_v49  ;;  %v4599_v47 = vrot.slane %v1675_v52, %v4566_v1  ;;  %v4620_v1 = vpop.f32.mrb[32].mxu1 }
 0x199   : > { %v1705_v51 = vcombine.high %v1683_v43, %v1683_v43  ;;  %v1473_v63 = vrot.slane %v1472_v0, 2  ;;  %v1479_v40 = vmax.f32 %v1477_v50, %v1478_v17  ;;  %v4603_v4 = vpop.f32.mrb[42].mxu0  ;;  %5593 = vst [vmem:[#allocation57_spill] sm:$0xff] %v4620_v1  ;;  %v4626_v29 = vpop.f32.mrb[33].mxu1 }
 0x19a   : > { %5590 = vst [vmem:[#allocation54_spill] sm:$0xff] %v4594_v24  ;;  %5591 = vst [vmem:[#allocation55_spill] sm:$0xff] %v4603_v4  ;;  %v1708_v37 = vcombine.high %v4594_v24, %v4594_v24  ;;  %v1919_v20 = vsub.f32 %v4377_v7, %v1762_v61  ;;  %v1920_v5 = vsub.f32 %v4379_v8, %v1766_v34  ;;  %v4610_v12 = vpop.f32.mrb[43].mxu0 }
 0x19b   : > { %v1921_v55 = vsub.f32 %v4381_v9, %v1762_v61  ;;  %5592 = vst [vmem:[#allocation56_spill] sm:$0xff] %v4610_v12  ;;  %v1922_v52 = vsub.f32 %v4385_v11, %v1766_v34  ;;  %v1770_v46 = vrot.slane %v4599_v47, %v4568_v23  ;;  %v1774_v50 = vrot.slane %v4599_v47, %v4571_v49 }
 0x19c   : > { %v1778_v2 = vrot.slane %v1705_v51, %v4568_v23  ;;  %v1818_v17 = vrot.slane %v1708_v37, %v4568_v23  ;;  %v1822_v7 = vrot.slane %v1708_v37, %v4571_v49  ;;  %v1983_v43 = vmul.f32 1.442695, %v1919_v20  ;;  %5594 = vst [vmem:[#allocation58_spill] sm:$0xff] %v4626_v29 }
 0x19d   : > { %v1985_v8 = vmul.f32 1.442695, %v1920_v5  ;;  %v1987_v9 = vmul.f32 1.442695, %v1921_v55  ;;  %v1989_v61 = vmul.f32 1.442695, %v1922_v52  ;;  %v1923_v11 = vsub.f32 %v4389_v15, %v1770_v46 }
 0x19e   : > { %v1924_v34 = vsub.f32 %v4393_v18, %v1774_v50  ;;  %v4624_v24 = vpop.f32.mrb[44].mxu0  ;;  %v1947_v48 = vsub.f32 %v4517_v56, %v1818_v17  ;;  %v1948_v38 = vsub.f32 %v4521_v28, %v1822_v7  ;;  %v1949_v37 = vsub.f32 %v4527_v60, %v1818_v17 }
 0x19f   : > { %v1950_v20 = vsub.f32 %v4533_v39, %v1822_v7  ;;  %v4632_v5 = vpop.f32.mrb[45].mxu0  ;;  %3629 = vpow2.f32 %v1983_v43  ;;  %v1991_v55 = vmul.f32 1.442695, %v1923_v11  ;;  %v1925_v15 = vsub.f32 %v4397_v21, %v1770_v46  ;;  %v4639_v52 = vpop.eup %3625 }
 0x1a0   : > { %v4637_v18 = vrot.slane %v4589_v33, %v4568_v23  ;;  %3631 = vpow2.f32 %v1985_v8  ;;  %v2039_v56 = vmul.f32 1.442695, %v1947_v48  ;;  %v2041_v29 = vmul.f32 1.442695, %v1948_v38  ;;  %v4641_v1 = vpop.eup %3627  ;;  %v4651_v38 = vpop.f32.mrb[34].mxu1 }
 0x1a1   : > { %v1993_v28 = vmul.f32 1.442695, %v1924_v34  ;;  %5595 = vst [vmem:[#allocation59_spill] sm:$0xff] %v4641_v1  ;;  %3633 = vpow2.f32 %v1987_v9  ;;  %v2043_v60 = vmul.f32 1.442695, %v1949_v37  ;;  %v1926_v17 = vsub.f32 %v4403_v25, %v1774_v50  ;;  %v4644_v7 = vpop.f32.mrb[46].mxu0 }
 0x1a2   : > { %v2045_v39 = vmul.f32 1.442695, %v1950_v20  ;;  %3635 = vpow2.f32 %v1989_v61  ;;  %v1927_v21 = vsub.f32 %v4409_v31, %v1778_v2  ;;  %v1782_v46 = vrot.slane %v1705_v51, %v4571_v49  ;;  %v4649_v8 = vpop.f32.mrb[47].mxu0  ;;  %5596 = vst [vmem:[#allocation60_spill] sm:$0xff] %v4651_v38  ;;  %v4653_v34 = vpop.f32.mrb[35].mxu1 }
 0x1a3   : > { %v1929_v43 = vsub.f32 %v4417_v41, %v1778_v2  ;;  %3637 = vpow2.f32 %v2039_v56  ;;  %v1995_v48 = vmul.f32 1.442695, %v1925_v15  ;;  %v1474_v9 = vmax.f32 %v1472_v0, %v1473_v63  ;;  %5597 = vst [vmem:[#allocation61_spill] sm:$0xff] %v4653_v34  ;;  %v4656_v31 = vpop.f32.mrb[36].mxu1 }
 0x1a4   : > { %v1480_v11 = vrot.slane %v1479_v40, 2  ;;  %3639 = vpow2.f32 %v2041_v29  ;;  %v1997_v25 = vmul.f32 1.442695, %v1926_v17  ;;  %v1999_v50 = vmul.f32 1.442695, %v1927_v21  ;;  %5598 = vst [vmem:[#allocation62_spill] sm:$0xff] %v4656_v31 }
 0x1a5   : > { %v1928_v61 = vsub.f32 %v4413_v35, %v1782_v46  ;;  %3641 = vpow2.f32 %v2043_v60  ;;  %v1930_v41 = vsub.f32 %v4423_v44, %v1782_v46  ;;  %v1475_v51 = vrot.slane %v1474_v9, 1  ;;  %v4659_v37 = vpop.f32.mrb[48].mxu0  ;;  %v4661_v20 = vpop.f32.mrb[37].mxu1 }
 0x1a6   : > { %v1481_v2 = vmax.f32 %v1479_v40, %v1480_v11  ;;  %5599 = vst [vmem:[#allocation63_spill] sm:$0xff] %v4661_v20  ;;  %3643 = vpow2.f32 %v2045_v39  ;;  %v2003_v0 = vmul.f32 1.442695, %v1929_v43  ;;  %v1707_v29 = vcombine.high %v4599_v47, %v4599_v47  ;;  %v4669_v35 = vpop.f32.mrb[49].mxu0  ;;  %v4675_v17 = vpop.f32.mrb[38].mxu1 }
 0x1a7   : > { %v4667_v63 = vmax.f32 %v4583_v62, %v4603_v4  ;;  %3645 = vpow2.f32 %v1991_v55  ;;  %v2001_v15 = vmul.f32 1.442695, %v1928_v61  ;;  %v1476_v44 = vmax.f32 %v1474_v9, %v1475_v51  ;;  %5600 = vst [vmem:[#allocation64_spill] sm:$0xff] %v4675_v17  ;;  %v4687_v43 = vpop.f32.mrb[39].mxu1 }
 0x1a8   : > { %v1482_v56 = vrot.slane %v1481_v2, 1  ;;  %3647 = vpow2.f32 %v1993_v28  ;;  %v2005_v40 = vmul.f32 1.442695, %v1930_v41  ;;  %v1786_v60 = vrot.slane %v1707_v29, %v4568_v23  ;;  %5602 = vst [vmem:[#allocation66_spill] sm:$0xff] %v4687_v43 }
 0x1a9   : > { %v4673_v39 = vrot.slane %v1707_v29, %v4571_v49  ;;  %v3630_v47 = vpop.eup %3629  ;;  %3649 = vpow2.f32 %v1995_v48  ;;  %v4679_v21 = vsel %vm1600_vm2, %v1476_v44, %v4591_v57  ;;  %v4683_v55 = vmax.f32 %v4586_v10, %v4610_v12  ;;  %v4685_v28 = vpop.f32.mrb[50].mxu0 }
 0x1aa   : > { %v1483_v46 = vmax.f32 %v1481_v2, %v1482_v56  ;;  %5601 = vst [vmem:[#allocation65_spill] sm:$0xff] %v4685_v28  ;;  %v3632_v9 = vpop.eup %3631  ;;  %v2423_v11 = vmul.f32 %v3630_v47, %v4391_v16  ;;  %3651 = vpow2.f32 %v1997_v25  ;;  %v1931_v61 = vsub.f32 %v4429_v53, %v1786_v60  ;;  %v4693_v57 = vpop.f32.mrb[51].mxu0 }
 0x1ab   : > { %v1932_v48 = vsub.f32 %v4433_v58, %v4673_v39  ;;  %5603 = vst [vmem:[#allocation67_spill] sm:$0xff] %v4693_v57  ;;  %v3634_v41 = vpop.eup %3633  ;;  %v2424_v51 = vmul.f32 %v3632_v9, %v4395_v19  ;;  %3653 = vpow2.f32 %v1999_v50  ;;  %v1933_v29 = vsub.f32 %v4439_v3, %v1786_v60  ;;  %v4703_v58 = vpop.f32.mrb[40].mxu1 }
 0x1ac   : > { %v4698_v2 = vsel %vm1600_vm2, %v1483_v46, %v4601_v27  ;;  %v3636_v44 = vpop.eup %3635  ;;  %v2119_v16 = vadd.f32 %v3634_v41, %v3630_v47  ;;  %v2425_v25 = vmul.f32 %v3634_v41, %v4399_v22  ;;  %v2007_v53 = vmul.f32 1.442695, %v1931_v61  ;;  %5604 = vst [vmem:[#allocation68_spill] sm:$0xff] %v4703_v58 }
 0x1ad   : > { %v1485_v56 = vrot.slane %v4667_v63, 4  ;;  %v4705_v43 = vpop.eup %3637  ;;  %v2126_v17 = vadd.f32 %v3636_v44, %v3632_v9  ;;  %v2426_v19 = vmul.f32 %v3636_v44, %v4405_v26  ;;  %3655 = vpow2.f32 %v2001_v15  ;;  %v4708_v27 = vpop.f32.mrb[52].mxu0 }
 0x1ae   : > { %v2009_v50 = vmul.f32 1.442695, %v1932_v48  ;;  %5605 = vst [vmem:[#allocation69_spill] sm:$0xff] %v4708_v27  ;;  %v4710_v46 = vpop.eup %3639  ;;  %v2120_v3 = vrot.slane %v2119_v16, 4  ;;  %v2487_v60 = vadd.f32 %v2425_v25, %v2423_v11  ;;  %3657 = vpow2.f32 %v2003_v0  ;;  %v4712_v47 = vpop.f32.mrb[53].mxu0 }
 0x1af   : > { %v2011_v22 = vmul.f32 1.442695, %v1933_v29  ;;  %5606 = vst [vmem:[#allocation70_spill] sm:$0xff] %v4712_v47  ;;  %v4714_v61 = vpop.eup %3641  ;;  %v2127_v41 = vrot.slane %v2126_v17, 4  ;;  %v2494_v58 = vadd.f32 %v2426_v19, %v2424_v51  ;;  %3659 = vpow2.f32 %v2005_v40  ;;  %v4724_v0 = vpop.f32.mrb[41].mxu1 }
 0x1b0   : > { %v1934_v26 = vsub.f32 %v4445_v13, %v4673_v39  ;;  %v4718_v15 = vpop.eup %3643  ;;  %v4720_v9 = vadd.f32 %v2120_v3, %v2119_v16  ;;  %v2217_v48 = vadd.f32 %v4714_v61, %v4705_v43  ;;  %v2488_v11 = vrot.slane %v2487_v60, 4  ;;  %5608 = vst [vmem:[#allocation72_spill] sm:$0xff] %v4724_v0 }
 0x1b1   : > { %5607 = vst [vmem:[#allocation71_spill] sm:$0xff] %v4718_v15  ;;  %3661 = vpow2.f32 %v2007_v53  ;;  %v3646_v29 = vpop.eup %3645  ;;  %v4726_v44 = vadd.f32 %v2127_v41, %v2126_v17  ;;  %v2224_v40 = vadd.f32 %v4718_v15, %v4710_v46  ;;  %v2495_v51 = vrot.slane %v2494_v58, 4  ;;  %v4730_v13 = vpop.f32.mrb[54].mxu0 }
 0x1b2   : > { %3663 = vpow2.f32 %v2009_v50  ;;  %5609 = vst [vmem:[#allocation73_spill] sm:$0xff] %v4730_v13  ;;  %v3648_v39 = vpop.eup %3647  ;;  %v2218_v16 = vrot.slane %v2217_v48, 4  ;;  %v2427_v25 = vmul.f32 %v3646_v29, %v4411_v32  ;;  %v2489_v19 = vadd.f32 %v2488_v11, %v2487_v60  ;;  %v4733_v3 = vpop.f32.mrb[55].mxu0 }
 0x1b3   : > { %3665 = vpow2.f32 %v2011_v22  ;;  %5610 = vst [vmem:[#allocation74_spill] sm:$0xff] %v4733_v3  ;;  %v3650_v53 = vpop.eup %3649  ;;  %v2225_v0 = vrot.slane %v2224_v40, 4  ;;  %v2428_v17 = vmul.f32 %v3648_v39, %v4415_v36  ;;  %v2496_v41 = vadd.f32 %v2495_v51, %v2494_v58  ;;  %v4745_v36 = vpop.f32.mrb[42].mxu1 }
 0x1b4   : > { %v4736_v20 = vmul.f32 1.442695, %v1934_v26  ;;  %v3652_v31 = vpop.eup %3651  ;;  %v2133_v34 = vadd.f32 %v3650_v53, %v3646_v29  ;;  %v2429_v50 = vmul.f32 %v3650_v53, %v4419_v42  ;;  %v2490_v38 = vrot.slane %v2489_v19, 2  ;;  %5612 = vst [vmem:[#allocation76_spill] sm:$0xff] %v4745_v36 }
 0x1b5   : > { %v4740_v12 = vmax.f32 %v4667_v63, %v1485_v56  ;;  %v3654_v32 = vpop.eup %3653  ;;  %v2226_v60 = vadd.f32 %v2225_v0, %v2224_v40  ;;  %v2140_v22 = vadd.f32 %v3652_v31, %v3648_v39  ;;  %v2430_v11 = vmul.f32 %v3652_v31, %v4425_v45  ;;  %v4743_v10 = vpop.f32.mrb[56].mxu0 }
 0x1b6   : > { %v2497_v4 = vrot.slane %v2496_v41, 2  ;;  %5611 = vst [vmem:[#allocation75_spill] sm:$0xff] %v4743_v10  ;;  %v4747_v58 = vadd.f32 %v2218_v16, %v2217_v48  ;;  %v2134_v26 = vrot.slane %v2133_v34, 4  ;;  %v2491_v29 = vadd.f32 %v2490_v38, %v2489_v19  ;;  %v4749_v42 = vpop.f32.mrb[57].mxu0  ;;  %v4751_v40 = vpop.f32.mrb[43].mxu1 }
 0x1b7   : > { %v2501_v51 = vadd.f32 %v2429_v50, %v2427_v25  ;;  %5613 = vst [vmem:[#allocation77_spill] sm:$0xff] %v4749_v42  ;;  %v3656_v53 = vpop.eup %3655  ;;  %v2227_v63 = vrot.slane %v2226_v60, 2  ;;  %v2141_v56 = vrot.slane %v2140_v22, 4  ;;  %v2508_v0 = vadd.f32 %v2430_v11, %v2428_v17  ;;  %5614 = vst [vmem:[#allocation78_spill] sm:$0xff] %v4751_v40  ;;  %v4763_v27 = vpop.f32.mrb[44].mxu1 }
 0x1b8   : > { %v2498_v62 = vadd.f32 %v2497_v4, %v2496_v41  ;;  %v3658_v45 = vpop.eup %3657  ;;  %v2135_v31 = vadd.f32 %v2134_v26, %v2133_v34  ;;  %v2492_v39 = vrot.slane %v2491_v29, 1  ;;  %v2431_v36 = vmul.f32 %v3654_v32, %v4431_v54  ;;  %5617 = vst [vmem:[#allocation81_spill] sm:$0xff] %v4763_v27 }
 0x1b9   : > { %v2502_v10 = vrot.slane %v2501_v51, 4  ;;  %v3660_v48 = vpop.eup %3659  ;;  %v2228_v16 = vadd.f32 %v2227_v63, %v2226_v60  ;;  %v2142_v47 = vadd.f32 %v2141_v56, %v2140_v22  ;;  %v2509_v25 = vrot.slane %v2508_v0, 4  ;;  %v4754_v19 = vpop.f32.mrb[58].mxu0 }
 0x1ba   : > { %v2499_v38 = vrot.slane %v2498_v62, 1  ;;  %5615 = vst [vmem:[#allocation79_spill] sm:$0xff] %v4754_v19  ;;  %v2136_v4 = vrot.slane %v2135_v31, 2  ;;  %v2432_v41 = vmul.f32 %v3656_v53, %v4435_v59  ;;  %v4758_v11 = vpop.f32.mrb[59].mxu0  ;;  %v2493_v54 = vadd.f32 %v2492_v39, %v2491_v29 }
 0x1bb   : > { %v3662_v50 = vpop.eup %3661  ;;  %v2503_v17 = vadd.f32 %v2502_v10, %v2501_v51  ;;  %5616 = vst [vmem:[#allocation80_spill] sm:$0xff] %v4758_v11  ;;  %v2229_v26 = vrot.slane %v2228_v16, 1  ;;  %v2143_v40 = vrot.slane %v2142_v47, 2  ;;  %v2510_v60 = vadd.f32 %v2509_v25, %v2508_v0  ;;  %v4769_v0 = vpop.f32.mrb[45].mxu1 }
 0x1bc   : > { %v4760_v34 = vpop.eup %3663  ;;  %v2137_v63 = vadd.f32 %v2136_v4, %v2135_v31  ;;  %v2147_v3 = vadd.f32 %v3658_v45, %v3654_v32  ;;  %v2433_v19 = vmul.f32 %v3658_v45, %v4441_v6  ;;  %v2500_v10 = vadd.f32 %v2499_v38, %v2498_v62  ;;  %5618 = vst [vmem:[#allocation82_spill] sm:$0xff] %v4769_v0 }
 0x1bd   : > { %v3666_v22 = vpop.eup %3665  ;;  %v2504_v56 = vrot.slane %v2503_v17, 2  ;;  %v2144_v42 = vadd.f32 %v2143_v40, %v2142_v47  ;;  %v2511_v51 = vrot.slane %v2510_v60, 2  ;;  %v2154_v59 = vadd.f32 %v3660_v48, %v3656_v53  ;;  %v4765_v13 = vpop.f32.mrb[60].mxu0 }
 0x1be   : > { %v2138_v11 = vrot.slane %v2137_v63, 1  ;;  %v2148_v1 = vrot.slane %v2147_v3, 4  ;;  %v2515_v29 = vadd.f32 %v2433_v19, %v2431_v36  ;;  %v4767_v39 = vpop.f32.mrb[61].mxu0  ;;  %v4771_v31 = vadd.f32 %v2229_v26, %v2228_v16 }
 0x1bf   : > { %v2505_v15 = vadd.f32 %v2504_v56, %v2503_v17  ;;  %v2512_v32 = vadd.f32 %v2511_v51, %v2510_v60  ;;  %v2155_v6 = vrot.slane %v2154_v59, 4  ;;  %v2434_v45 = vmul.f32 %v3660_v48, %v4447_v14  ;;  %v4781_v60 = vpop.f32.mrb[46].mxu1 }
 0x1c0   : > { %v2145_v62 = vrot.slane %v2144_v42, 1  ;;  %v2149_v40 = vadd.f32 %v2148_v1, %v2147_v3  ;;  %v2516_v53 = vrot.slane %v2515_v29, 4  ;;  %v4774_v38 = vadd.f32 %v2138_v11, %v2137_v63  ;;  %5619 = vst [vmem:[#allocation83_spill] sm:$0xff] %v4781_v60  ;;  %v5620_v3 = vld [vmem:[#allocation14_spill] sm:$0xff] }
 0x1c1   : > { %v2506_v47 = vrot.slane %v2505_v15, 1  ;;  %v2513_v25 = vrot.slane %v2512_v32, 1  ;;  %v2156_v4 = vadd.f32 %v2155_v6, %v2154_v59  ;;  %v2522_v17 = vadd.f32 %v2434_v45, %v2432_v41  ;;  %v4776_v36 = vpop.f32.mrb[62].mxu0  ;;  %v5621_v6 = vld [vmem:[#allocation16_spill] sm:$0xff] }
 0x1c2   : > { %v2150_v56 = vrot.slane %v2149_v40, 2  ;;  %v2517_v0 = vadd.f32 %v2516_v53, %v2515_v29  ;;  %v2435_v16 = vmul.f32 %v3662_v50, %v4453_v30  ;;  %v4779_v26 = vpop.f32.mrb[63].mxu0  ;;  %v4785_v11 = vmul.f32 %v4760_v34, %v5620_v3 }
 0x1c3   : > { %v2507_v19 = vadd.f32 %v2506_v47, %v2505_v15  ;;  %v2514_v14 = vadd.f32 %v2513_v25, %v2512_v32  ;;  %v2157_v48 = vrot.slane %v2156_v4, 2  ;;  %v2523_v1 = vrot.slane %v2522_v17, 4  ;;  %v4790_v47 = vpop.f32.mrb[47].mxu1 }
 0x1c4   : > { %v2151_v63 = vadd.f32 %v2150_v56, %v2149_v40  ;;  %v2518_v51 = vrot.slane %v2517_v0, 2  ;;  %v2161_v15 = vadd.f32 %v3666_v22, %v3662_v50  ;;  %v2437_v45 = vmul.f32 %v3666_v22, %v5621_v6  ;;  %5622 = vst [vmem:[#allocation14_spill] sm:$0xff] %v4790_v47 }
 0x1c5   : > { %v2743_v41 = vsel %vm1600_vm2, %v2507_v19, %v2493_v54  ;;  %v2750_v59 = vsel %vm1600_vm2, %v2514_v14, %v2500_v10  ;;  %v2158_v29 = vadd.f32 %v2157_v48, %v2156_v4  ;;  %v2524_v30 = vadd.f32 %v2523_v1, %v2522_v17 }
 0x1c6   : > { %v2152_v32 = vrot.slane %v2151_v63, 1  ;;  %v2519_v53 = vadd.f32 %v2518_v51, %v2517_v0  ;;  %v2162_v25 = vrot.slane %v2161_v15, 4  ;;  %3667 = vpow2.f32 %v4736_v20 }
 0x1c7   : > { %v4793_v3 = vadd.f32 %v2145_v62, %v2144_v42  ;;  %v2525_v60 = vrot.slane %v2524_v30, 2  ;;  %v2529_v54 = vadd.f32 %v2437_v45, %v2435_v16  ;;  %v1487_v40 = vrot.slane %v4740_v12, 2  ;;  %v5623_v42 = vld [vmem:[#allocation12_spill] sm:$0xff] }
 0x1c8   : > { %v2520_v50 = vrot.slane %v2519_v53, 1  ;;  %v2159_v19 = vrot.slane %v2158_v29, 1  ;;  %v2163_v10 = vadd.f32 %v2162_v25, %v2161_v15  ;;  %v1492_v4 = vrot.slane %v4683_v55, 4 }
 0x1c9   : > { %v4797_v17 = vadd.f32 %v2152_v32, %v2151_v63  ;;  %v2526_v22 = vadd.f32 %v2525_v60, %v2524_v30  ;;  %v2530_v56 = vrot.slane %v2529_v54, 4  ;;  %v1488_v0 = vmax.f32 %v4740_v12, %v1487_v40 }
 0x1ca   : > { %v2521_v14 = vadd.f32 %v2520_v50, %v2519_v53  ;;  %v2164_v48 = vrot.slane %v2163_v10, 2  ;;  %v1493_v20 = vmax.f32 %v4683_v55, %v1492_v4  ;;  %v1935_v62 = vsub.f32 %v5623_v42, %v4637_v18  ;;  %v5624_v53 = vld [vmem:[#allocation13_spill] sm:$0xff] }
 0x1cb   : > { %v2527_v16 = vrot.slane %v2526_v22, 1  ;;  %v2531_v1 = vadd.f32 %v2530_v56, %v2529_v54  ;;  %v1489_v51 = vrot.slane %v1488_v0, 1  ;;  %v1798_v15 = vrot.slane %v4589_v33, %v4571_v49  ;;  %v5625_v54 = vld [vmem:[#allocation15_spill] sm:$0xff] }
 0x1cc   : > { %v2744_v63 = vsel %vm1602_vm3, %v2521_v14, %v2743_v41  ;;  %v4806_v6 = vadd.f32 %v2164_v48, %v2163_v10  ;;  %v1494_v60 = vrot.slane %v1493_v20, 2  ;;  %v2015_v30 = vmul.f32 1.442695, %v1935_v62 }
 0x1cd   : > { %v2528_v12 = vadd.f32 %v2527_v16, %v2526_v22  ;;  %v2532_v45 = vrot.slane %v2531_v1, 2  ;;  %v1490_v32 = vmax.f32 %v1488_v0, %v1489_v51  ;;  %v1936_v55 = vsub.f32 %v5624_v53, %v1798_v15 }
 0x1ce   : > { %v4809_v25 = vadd.f32 %v2159_v19, %v2158_v29  ;;  %v1495_v40 = vmax.f32 %v1493_v20, %v1494_v60  ;;  %3669 = vpow2.f32 %v2015_v30  ;;  %v1937_v50 = vsub.f32 %v5625_v54, %v4637_v18  ;;  %v5626_v19 = vld [vmem:[#allocation17_spill] sm:$0xff]  ;;  %v5627_v18 = vld [vmem:[#allocation18_spill] sm:$0xff] }
 0x1cf   : > { %v4814_v4 = vsel %vm1602_vm3, %v2528_v12, %v2750_v59  ;;  %v2533_v41 = vadd.f32 %v2532_v45, %v2531_v1  ;;  %v4818_v10 = vsel %vm1602_vm3, %v1490_v32, %v4679_v21  ;;  %v2017_v22 = vmul.f32 1.442695, %v1936_v55  ;;  %v5628_v30 = vld [vmem:[#allocation54_spill] sm:$0xff]  ;;  %v4835_v32 = vpop.f32.mrb[48].mxu1 }
 0x1d0   : > { %v3668_v56 = vpop.eup %3667  ;;  %v2166_v0 = vrot.slane %v4806_v6, 1  ;;  %v1496_v14 = vrot.slane %v1495_v40, 1  ;;  %v2019_v29 = vmul.f32 1.442695, %v1937_v50  ;;  %v1938_v48 = vsub.f32 %v5626_v19, %v1798_v15  ;;  %5629 = vst [vmem:[#allocation16_spill] sm:$0xff] %v4835_v32 }
 0x1d1   : > { %v2534_v20 = vrot.slane %v2533_v41, 1  ;;  %v2168_v42 = vadd.f32 %v3668_v56, %v4760_v34  ;;  %v2438_v62 = vmul.f32 %v3668_v56, %v5627_v18  ;;  %3671 = vpow2.f32 %v2017_v22  ;;  %v5631_v22 = vld [vmem:[#allocation23_spill] sm:$0xff] }
 0x1d2   : > { %v1497_v59 = vmax.f32 %v1495_v40, %v1496_v14  ;;  %3673 = vpow2.f32 %v2019_v29  ;;  %v2021_v16 = vmul.f32 1.442695, %v1938_v48  ;;  %v1498_v21 = vmax.f32 %v4624_v24, %v4644_v7 }
 0x1d3   : > { %v2535_v1 = vadd.f32 %v2534_v20, %v2533_v41  ;;  %v2169_v51 = vrot.slane %v2168_v42, 4  ;;  %v2536_v60 = vadd.f32 %v2438_v62, %v4785_v11  ;;  %v1802_v12 = vrot.slane %v5628_v30, %v4568_v23  ;;  %v5630_v11 = vld [vmem:[#allocation19_spill] sm:$0xff] }
 0x1d4   : > { %v4831_v15 = vsel %vm1602_vm3, %v1497_v59, %v4698_v2  ;;  %3675 = vpow2.f32 %v2021_v16  ;;  %v1499_v34 = vrot.slane %v1498_v21, 4  ;;  %v1505_v45 = vmax.f32 %v4632_v5, %v4649_v8 }
 0x1d5   : > { %v4838_v53 = vsel %vm1604_vm4, %v2535_v1, %v2744_v63  ;;  %v2170_v55 = vadd.f32 %v2169_v51, %v2168_v42  ;;  %v2537_v40 = vrot.slane %v2536_v60, 4  ;;  %v1939_v54 = vsub.f32 %v5630_v11, %v1802_v12  ;;  %v5632_v42 = vld [vmem:[#allocation21_spill] sm:$0xff]  ;;  %v5633_v1 = vld [vmem:[#allocation20_spill] sm:$0xff] }
 0x1d6   : > { %v1500_v50 = vmax.f32 %v1498_v21, %v1499_v34  ;;  %v1506_v41 = vrot.slane %v1505_v45, 4  ;;  %v1806_v2 = vrot.slane %v5628_v30, %v4571_v49  ;;  %v1941_v56 = vsub.f32 %v5631_v22, %v1802_v12  ;;  %v5635_v11 = vld [vmem:[#allocation25_spill] sm:$0xff]  ;;  %v5636_v22 = vld [vmem:[#allocation22_spill] sm:$0xff] }
 0x1d7   : > { %v2171_v14 = vrot.slane %v2170_v55, 2  ;;  %v2538_v29 = vadd.f32 %v2537_v40, %v2536_v60  ;;  %v2023_v19 = vmul.f32 1.442695, %v1939_v54  ;;  %v1706_v48 = vcombine.high %v4589_v33, %v4589_v33  ;;  %v4850_v60 = vpop.f32.mrb[49].mxu1 }
 0x1d8   : > { %v3670_v20 = vpop.eup %3669  ;;  %v1501_v63 = vrot.slane %v1500_v50, 2  ;;  %v1507_v18 = vmax.f32 %v1505_v45, %v1506_v41  ;;  %v1940_v62 = vsub.f32 %v5632_v42, %v1806_v2  ;;  %v2027_v59 = vmul.f32 1.442695, %v1941_v56  ;;  %5634 = vst [vmem:[#allocation12_spill] sm:$0xff] %v4850_v60 }
 0x1d9   : > { %v4847_v16 = vadd.f32 %v2171_v14, %v2170_v55  ;;  %v2539_v21 = vrot.slane %v2538_v29, 2  ;;  %v2439_v51 = vmul.f32 %v3670_v20, %v5633_v1  ;;  %3677 = vpow2.f32 %v2023_v19 }
 0x1da   : > { %v1502_v30 = vmax.f32 %v1500_v50, %v1501_v63  ;;  %v1508_v12 = vrot.slane %v1507_v18, 2  ;;  %v2025_v34 = vmul.f32 1.442695, %v1940_v62  ;;  %3679 = vpow2.f32 %v2027_v59  ;;  %v5637_v62 = vld [vmem:[#allocation24_spill] sm:$0xff] }
 0x1db   : > { %v3672_v40 = vpop.eup %3671  ;;  %v4853_v33 = vadd.f32 %v2166_v0, %v4806_v6  ;;  %v2540_v45 = vadd.f32 %v2539_v21, %v2538_v29  ;;  %v1942_v54 = vsub.f32 %v5635_v11, %v1806_v2  ;;  %v1810_v55 = vrot.slane %v1706_v48, %v4568_v23  ;;  %v5638_v21 = vld [vmem:[#allocation27_spill] sm:$0xff]  ;;  %v4861_v11 = vpop.f32.mrb[50].mxu1 }
 0x1dc   : > { %v3674_v41 = vpop.eup %3673  ;;  %v2440_v56 = vmul.f32 %v3672_v40, %v5636_v22  ;;  %v1503_v14 = vrot.slane %v1502_v30, 1  ;;  %v1509_v19 = vmax.f32 %v1507_v18, %v1508_v12  ;;  %3681 = vpow2.f32 %v2025_v34  ;;  %5639 = vst [vmem:[#allocation13_spill] sm:$0xff] %v4861_v11  ;;  %v5640_v18 = vld [vmem:[#allocation26_spill] sm:$0xff] }
 0x1dd   : > { %v2173_v50 = vrot.slane %v4847_v16, 1  ;;  %v2541_v63 = vrot.slane %v2540_v45, 1  ;;  %v2175_v42 = vadd.f32 %v3674_v41, %v3670_v20  ;;  %v2441_v59 = vmul.f32 %v3674_v41, %v5637_v62  ;;  %v4868_v41 = vpop.f32.mrb[51].mxu1  ;;  %v5648_v11 = vld [vmem:[#allocation30_spill] sm:$0xff] }
 0x1de   : > { %v3676_v1 = vpop.eup %3675  ;;  %v1504_v6 = vmax.f32 %v1502_v30, %v1503_v14  ;;  %v1510_v0 = vrot.slane %v1509_v19, 1  ;;  %v2029_v29 = vmul.f32 1.442695, %v1942_v54  ;;  %v1943_v2 = vsub.f32 %v5638_v21, %v1810_v55  ;;  %5641 = vst [vmem:[#allocation15_spill] sm:$0xff] %v4868_v41 }
 0x1df   : > { %v2542_v60 = vadd.f32 %v2541_v63, %v2540_v45  ;;  %v2176_v32 = vrot.slane %v2175_v42, 4  ;;  %v2543_v22 = vadd.f32 %v2441_v59, %v2439_v51  ;;  %v2182_v47 = vadd.f32 %v3676_v1, %v3672_v40 }
 0x1e0   : > { %v2442_v12 = vmul.f32 %v3676_v1, %v5640_v18  ;;  %v4866_v34 = vsel %vm1604_vm4, %v1504_v6, %v4818_v10  ;;  %v1511_v20 = vmax.f32 %v1509_v19, %v1510_v0  ;;  %3683 = vpow2.f32 %v2029_v29  ;;  %v5642_v6 = vld [vmem:[#allocation31_spill] sm:$0xff]  ;;  %v4880_v29 = vpop.f32.mrb[52].mxu1 }
 0x1e1   : > { %v4872_v30 = vsel %vm1604_vm4, %v2542_v60, %v4814_v4  ;;  %v2177_v54 = vadd.f32 %v2176_v32, %v2175_v42  ;;  %v2544_v14 = vrot.slane %v2543_v22, 4  ;;  %v2183_v45 = vrot.slane %v2182_v47, 4  ;;  %5643 = vst [vmem:[#allocation17_spill] sm:$0xff] %v4880_v29  ;;  %v5644_v60 = vld [vmem:[#allocation28_spill] sm:$0xff] }
 0x1e2   : > { %v2550_v63 = vadd.f32 %v2442_v12, %v2440_v56  ;;  %v4876_v51 = vsel %vm1604_vm4, %v1511_v20, %v4831_v15  ;;  %v2031_v40 = vmul.f32 1.442695, %v1943_v2  ;;  %v1814_v10 = vrot.slane %v1706_v48, %v4571_v49  ;;  %v5645_v56 = vld [vmem:[#allocation29_spill] sm:$0xff]  ;;  %v4884_v15 = vpop.f32.mrb[53].mxu1 }
 0x1e3   : > { %v3678_v62 = vpop.eup %3677  ;;  %v2178_v19 = vrot.slane %v2177_v54, 2  ;;  %v2545_v59 = vadd.f32 %v2544_v14, %v2543_v22  ;;  %v2184_v1 = vadd.f32 %v2183_v45, %v2182_v47  ;;  %v1945_v0 = vsub.f32 %v5642_v6, %v1810_v55  ;;  %5646 = vst [vmem:[#allocation18_spill] sm:$0xff] %v4884_v15  ;;  %v5647_v47 = vld [vmem:[#allocation32_spill] sm:$0xff] }
 0x1e4   : > { %v3680_v4 = vpop.eup %3679  ;;  %v2551_v32 = vrot.slane %v2550_v63, 4  ;;  %v2443_v42 = vmul.f32 %v3678_v62, %v5644_v60  ;;  %3685 = vpow2.f32 %v2031_v40  ;;  %v1944_v21 = vsub.f32 %v5645_v56, %v1814_v10  ;;  %v4888_v40 = vpop.f32.mrb[54].mxu1 }
 0x1e5   : > { %v2179_v2 = vadd.f32 %v2178_v19, %v2177_v54  ;;  %v2546_v18 = vrot.slane %v2545_v59, 2  ;;  %v2185_v48 = vrot.slane %v2184_v1, 2  ;;  %v2189_v12 = vadd.f32 %v3680_v4, %v3678_v62  ;;  %5649 = vst [vmem:[#allocation54_spill] sm:$0xff] %v4888_v40 }
 0x1e6   : > { %v3682_v20 = vpop.eup %3681  ;;  %v2552_v22 = vadd.f32 %v2551_v32, %v2550_v63  ;;  %v2445_v14 = vmul.f32 %v3680_v4, %v5647_v47  ;;  %v2033_v55 = vmul.f32 1.442695, %v1944_v21  ;;  %v2035_v45 = vmul.f32 1.442695, %v1945_v0 }
 0x1e7   : > { %v2180_v6 = vrot.slane %v2179_v2, 1  ;;  %v2547_v29 = vadd.f32 %v2546_v18, %v2545_v59  ;;  %v2186_v41 = vadd.f32 %v2185_v48, %v2184_v1  ;;  %v2444_v60 = vmul.f32 %v3682_v20, %v5648_v11  ;;  %v5650_v1 = vld [vmem:[#allocation33_spill] sm:$0xff]  ;;  %v4896_v11 = vpop.f32.mrb[55].mxu1 }
 0x1e8   : > { %v2553_v56 = vrot.slane %v2552_v22, 2  ;;  %v2190_v27 = vrot.slane %v2189_v12, 4  ;;  %v2557_v15 = vadd.f32 %v2445_v14, %v2443_v42  ;;  %3687 = vpow2.f32 %v2033_v55  ;;  %5651 = vst [vmem:[#allocation19_spill] sm:$0xff] %v4896_v11  ;;  %v5652_v42 = vld [vmem:[#allocation34_spill] sm:$0xff] }
 0x1e9   : > { %v4891_v54 = vadd.f32 %v2173_v50, %v4847_v16  ;;  %v4893_v62 = vadd.f32 %v2180_v6, %v2179_v2  ;;  %v2548_v63 = vrot.slane %v2547_v29, 1  ;;  %3689 = vpow2.f32 %v2035_v45 }
 0x1ea   : > { %v3684_v19 = vpop.eup %3683  ;;  %v2554_v0 = vadd.f32 %v2553_v56, %v2552_v22  ;;  %v2191_v4 = vadd.f32 %v2190_v27, %v2189_v12  ;;  %v2558_v59 = vrot.slane %v2557_v15, 4  ;;  %v1946_v32 = vsub.f32 %v5650_v1, %v1814_v10  ;;  %v5654_v1 = vld [vmem:[#allocation40_spill] sm:$0xff] }
 0x1eb   : > { %v2549_v21 = vadd.f32 %v2548_v63, %v2547_v29  ;;  %v2187_v18 = vrot.slane %v2186_v41, 1  ;;  %v2196_v48 = vadd.f32 %v3684_v19, %v3682_v20  ;;  %v2446_v47 = vmul.f32 %v3684_v19, %v5652_v42  ;;  %v5653_v63 = vld [vmem:[#allocation35_spill] sm:$0xff]  ;;  %v4917_v42 = vpop.f32.mrb[56].mxu1 }
 0x1ec   : > { %v2555_v14 = vrot.slane %v2554_v0, 1  ;;  %v2192_v16 = vrot.slane %v2191_v4, 2  ;;  %v2559_v50 = vadd.f32 %v2558_v59, %v2557_v15  ;;  %v2037_v2 = vmul.f32 1.442695, %v1946_v32  ;;  %5655 = vst [vmem:[#allocation23_spill] sm:$0xff] %v4917_v42 }
 0x1ed   : > { %v2746_v55 = vsel %vm1606_vm5, %v2549_v21, %v4838_v53  ;;  %v2197_v45 = vrot.slane %v2196_v48, 4  ;;  %v2564_v22 = vadd.f32 %v2446_v47, %v2444_v60  ;;  %v1512_v27 = vmax.f32 %v4659_v37, %v4685_v28 }
 0x1ee   : > { %v3686_v10 = vpop.eup %3685  ;;  %v2556_v12 = vadd.f32 %v2555_v14, %v2554_v0  ;;  %v4903_v29 = vadd.f32 %v2192_v16, %v2191_v4  ;;  %v2560_v20 = vrot.slane %v2559_v50, 2  ;;  %3691 = vpow2.f32 %v2037_v2 }
 0x1ef   : > { %v2198_v6 = vadd.f32 %v2197_v45, %v2196_v48  ;;  %v2565_v56 = vrot.slane %v2564_v22, 4  ;;  %v2447_v15 = vmul.f32 %v3686_v10, %v5653_v63  ;;  %v1513_v19 = vrot.slane %v1512_v27, 4  ;;  %v5657_v45 = vld [vmem:[#allocation36_spill] sm:$0xff]  ;;  %v5659_v63 = vld [vmem:[#allocation37_spill] sm:$0xff] }
 0x1f0   : > { %v4906_v59 = vadd.f32 %v2187_v18, %v2186_v41  ;;  %v2753_v53 = vsel %vm1606_vm5, %v2556_v12, %v4872_v30  ;;  %v2561_v60 = vadd.f32 %v2560_v20, %v2559_v50  ;;  %v4912_v32 = vmul.f32 %v4705_v43, %v5654_v1  ;;  %v5656_v30 = vld [vmem:[#allocation42_spill] sm:$0xff]  ;;  %v4928_v12 = vpop.f32.mrb[57].mxu1 }
 0x1f1   : > { %v2199_v0 = vrot.slane %v2198_v6, 2  ;;  %v2566_v4 = vadd.f32 %v2565_v56, %v2564_v22  ;;  %v1514_v21 = vmax.f32 %v1512_v27, %v1513_v19  ;;  %v1519_v48 = vmax.f32 %v4669_v35, %v4693_v57  ;;  %5658 = vst [vmem:[#allocation21_spill] sm:$0xff] %v4928_v12 }
 0x1f2   : > { %v3688_v41 = vpop.eup %3687  ;;  %v2194_v18 = vrot.slane %v4903_v29, 1  ;;  %v2562_v47 = vrot.slane %v2561_v60, 1  ;;  %v4922_v14 = vmul.f32 %v4710_v46, %v5656_v30  ;;  %v2122_v43 = vrot.slane %v4720_v9, 2  ;;  %v4937_v46 = vpop.f32.mrb[58].mxu1 }
 0x1f3   : > { %v3690_v16 = vpop.eup %3689  ;;  %v4925_v50 = vadd.f32 %v2199_v0, %v2198_v6  ;;  %v2567_v2 = vrot.slane %v2566_v4, 2  ;;  %v2448_v22 = vmul.f32 %v3688_v41, %v5657_v45  ;;  %v1515_v27 = vrot.slane %v1514_v21, 2  ;;  %5661 = vst [vmem:[#allocation20_spill] sm:$0xff] %v4937_v46  ;;  %v4945_v46 = vpop.f32.mrb[59].mxu1 }
 0x1f4   : > { %v2563_v20 = vadd.f32 %v2562_v47, %v2561_v60  ;;  %v2203_v56 = vadd.f32 %v3690_v16, %v3686_v10  ;;  %v2449_v19 = vmul.f32 %v3690_v16, %v5659_v63  ;;  %v1520_v1 = vrot.slane %v1519_v48, 4  ;;  %5662 = vst [vmem:[#allocation25_spill] sm:$0xff] %v4945_v46 }
 0x1f5   : > { %v2568_v6 = vadd.f32 %v2567_v2, %v2566_v4  ;;  %v1516_v0 = vmax.f32 %v1514_v21, %v1515_v27  ;;  %v4940_v30 = vmul.f32 0.0, %v4639_v52  ;;  %v2123_v60 = vadd.f32 %v2122_v43, %v4720_v9 }
 0x1f6   : > { %v2747_v10 = vsel %vm1608_vm6, %v2563_v20, %v2746_v55  ;;  %v2204_v47 = vrot.slane %v2203_v56, 4  ;;  %v2571_v16 = vadd.f32 %v2449_v19, %v2447_v15  ;;  %v1521_v45 = vmax.f32 %v1519_v48, %v1520_v1  ;;  %v5664_v48 = vld [vmem:[#allocation38_spill] sm:$0xff] }
 0x1f7   : > { %v2569_v12 = vrot.slane %v2568_v6, 1  ;;  %v1517_v42 = vrot.slane %v1516_v0, 1  ;;  %v2124_v11 = vrot.slane %v2123_v60, 1  ;;  %v5663_v52 = vrot.slane %v4747_v58, 2 }
 0x1f8   : > { %v3692_v4 = vpop.eup %3691  ;;  %v2205_v21 = vadd.f32 %v2204_v47, %v2203_v56  ;;  %v2572_v2 = vrot.slane %v2571_v16, 4  ;;  %v1522_v27 = vrot.slane %v1521_v45, 2 }
 0x1f9   : > { %v2221_v9 = vadd.f32 %v5663_v52, %v4747_v58  ;;  %v2570_v55 = vadd.f32 %v2569_v12, %v2568_v6  ;;  %v2210_v15 = vadd.f32 %v3692_v4, %v3688_v41  ;;  %v2450_v43 = vmul.f32 %v3692_v4, %v5664_v48 }
 0x1fa   : > { %v1518_v20 = vmax.f32 %v1516_v0, %v1517_v42  ;;  %v2206_v19 = vrot.slane %v2205_v21, 2  ;;  %v2573_v1 = vadd.f32 %v2572_v2, %v2571_v16  ;;  %v1523_v63 = vmax.f32 %v1521_v45, %v1522_v27 }
 0x1fb   : > { %v2125_v56 = vadd.f32 %v2124_v11, %v2123_v60  ;;  %v2754_v47 = vsel %vm1608_vm6, %v2570_v55, %v2753_v53  ;;  %v2211_v46 = vrot.slane %v2210_v15, 4  ;;  %v2578_v40 = vadd.f32 %v2450_v43, %v2448_v22  ;;  %v5665_v53 = vld [vmem:[#allocation44_spill] sm:$0xff] }
 0x1fc   : > { %v4960_v57 = vsel %vm1606_vm5, %v1518_v20, %v4866_v34  ;;  %v2207_v28 = vadd.f32 %v2206_v19, %v2205_v21  ;;  %v2574_v58 = vrot.slane %v2573_v1, 2  ;;  %v1524_v52 = vrot.slane %v1523_v63, 1 }
 0x1fd   : > { %v2195_v42 = vadd.f32 %v2194_v18, %v4903_v29  ;;  %v2212_v41 = vadd.f32 %v2211_v46, %v2210_v15  ;;  %v2579_v12 = vrot.slane %v2578_v40, 4  ;;  %v2375_v11 = vsel %vm1600_vm2, %v4774_v38, %v2125_v56  ;;  %v4974_v29 = vld [vmem:[%s417_s8] sm:$0x3]  ;;  %s3789_s8 = sshll.u32 %s3898_s30, 4  ;;  %s3790_s8 = int_to_ptr.vmem [resolvable:$false] %s3789_s8 }
 0x1fe   : > { %v2453_v22 = vmul.f32 %v4714_v61, %v5665_v53  ;;  %v2575_v6 = vadd.f32 %v2574_v58, %v2573_v1  ;;  %v1525_v34 = vmax.f32 %v1523_v63, %v1524_v52  ;;  %v2208_v0 = vrot.slane %v2207_v28, 1  ;;  %v5670_v53 = vld [vmem:[#allocation71_spill] sm:$0xff]  ;;  %s3791_s12 = scalar_lea.vmem %s3790_s8, 1024  ;;  %p3792_p6 = scmp.lt.s32.totalorder %s5383_s17, %s3790_s8 }
 0x1ff   : > { %v2222_v60 = vrot.slane %v2221_v9, 1  ;;  %v2213_v16 = vrot.slane %v2212_v41, 2  ;;  %v2580_v45 = vadd.f32 %v2579_v12, %v2578_v40  ;;  %v2376_v4 = vsel %vm1602_vm3, %v4797_v17, %v2375_v11  ;;  %v5669_v11 = vld [vmem:[#allocation46_spill] sm:$0xff]  ;;  %p3793_p7 = scmp.lt.s32.totalorder %s3791_s12, %s3785_s28 }
 0x200   : > { %v2585_v21 = vadd.f32 %v2453_v22, %v4912_v32  ;;  %v2576_v18 = vrot.slane %v2575_v6, 1  ;;  %v4978_v38 = vsel %vm1606_vm5, %v1525_v34, %v4876_v51  ;;  %v2209_v46 = vadd.f32 %v2208_v0, %v2207_v28  ;;  %v5671_v22 = vld [vmem:[#allocation73_spill] sm:$0xff]  ;;  %v5005_v0 = vpop.f32.mrb[60].mxu1 }
 0x201   : > { %v2377_v61 = vsel %vm1604_vm4, %v4853_v33, %v2376_v4  ;;  %v2214_v63 = vadd.f32 %v2213_v16, %v2212_v41  ;;  %v2581_v2 = vrot.slane %v2580_v45, 2  ;;  %v2223_v55 = vadd.f32 %v2222_v60, %v2221_v9  ;;  %v5007_v4 = vpop.f32.mrb[61].mxu1  ;;  %p3794_p8 = por %p3793_p7, %p3792_p6 }
 0x202   : > { %v2378_v40 = vsel %vm1606_vm5, %v4893_v62, %v2377_v61  ;;  %v2586_v27 = vrot.slane %v2585_v21, 4  ;;  %v2577_v17 = vadd.f32 %v2576_v18, %v2575_v6  ;;  %v4987_v15 = vrot.slane %v4974_v29, %v4568_v23  ;;  %v5667_v62 = vld [vmem:[#allocation59_spill] sm:$0xff]  ;;  %v5672_v6 = vld [vmem:[#allocation69_spill] sm:$0xff]  ;;  %v5673_v18 = vld [vmem:[#allocation74_spill] sm:$0xff] }
 0x203   : > { %v2379_v32 = vsel %vm1608_vm6, %v2195_v42, %v2378_v40  ;;  %v2582_v51 = vadd.f32 %v2581_v2, %v2580_v45  ;;  %v2129_v33 = vrot.slane %v4726_v44, 2  ;;  %v4994_v19 = vmul.f32 0.0, %v5667_v62  ;;  %v5675_v61 = vld [vmem:[#allocation79_spill] sm:$0xff]  ;;  %v5014_v40 = vpop.f32.mrb[62].mxu1  ;;  %p3795_p11 = pnand %p3794_p8, %p3788_p4 }
 0x204   : > { %5666 = vst [vmem:[#allocation22_spill] sm:$0xff] %v4987_v15  ;;  %v2380_v28 = vsel %vm1610_vm7, %v2209_v46, %v2379_v32  ;;  %v2587_v48 = vadd.f32 %v2586_v27, %v2585_v21  ;;  %v2748_v43 = vsel %vm1610_vm7, %v2577_v17, %v2747_v10  ;;  %v2215_v9 = vrot.slane %v2214_v63, 1  ;;  %v5677_v32 = vld [vmem:[#allocation80_spill] sm:$0xff]  ;;  %v5019_v62 = vpop.f32.mrb[63].mxu1 }
 0x205   : > { %v2381_v20 = vsel %vm1612_vm8, %v2223_v55, %v2380_v28  ;;  %v2583_v1 = vrot.slane %v2582_v51, 1  ;;  %v2130_v52 = vadd.f32 %v2129_v33, %v4726_v44  ;;  %v5668_v42 = vrot.slane %v4925_v50, 1  ;;  %5679 = vst [vmem:[#allocation24_spill] sm:$0xff] %v5019_v62 }
 0x206   : > { %v2407_v56 = vadd.f32 %v2381_v20, %v4940_v30  ;;  %v2588_v58 = vrot.slane %v2587_v48, 2  ;;  %v2216_v12 = vadd.f32 %v2215_v9, %v2214_v63  ;;  %v2454_v10 = vmul.f32 %v5670_v53, %v5669_v11  ;;  %v5676_v63 = vld [vmem:[#allocation75_spill] sm:$0xff] }
 0x207   : > { %v2202_v41 = vadd.f32 %v5668_v42, %v4925_v50  ;;  %v1526_v34 = vmax.f32 %v5672_v6, %v5671_v22  ;;  %v2584_v60 = vadd.f32 %v2583_v1, %v2582_v51  ;;  %v2131_v45 = vrot.slane %v2130_v52, 1  ;;  %v5674_v50 = vld [vmem:[#allocation70_spill] sm:$0xff]  ;;  %v5678_v51 = vld [vmem:[#allocation77_spill] sm:$0xff] }
 0x208   : > { %v2589_v16 = vadd.f32 %v2588_v58, %v2587_v48  ;;  %3693 = vrcp.f32 %v2407_v56  ;;  %v2592_v44 = vadd.f32 %v2454_v10, %v4922_v14  ;;  %v1533_v46 = vmax.f32 %v5674_v50, %v5673_v18 }
 0x209   : > { %v1527_v21 = vrot.slane %v1526_v34, 4  ;;  %v1540_v2 = vmax.f32 %v5676_v63, %v5675_v61  ;;  %v2755_v27 = vsel %vm1610_vm7, %v2584_v60, %v2754_v47  ;;  %v2132_v55 = vadd.f32 %v2131_v45, %v2130_v52 }
 0x20a   : > { %v2590_v17 = vrot.slane %v2589_v16, 1  ;;  %v1547_v28 = vmax.f32 %v5678_v51, %v5677_v32  ;;  %v2593_v48 = vrot.slane %v2592_v44, 4  ;;  %v1534_v14 = vrot.slane %v1533_v46, 4 }
 0x20b   : > { %v1528_v33 = vmax.f32 %v1526_v34, %v1527_v21  ;;  %v1541_v20 = vrot.slane %v1540_v2, 4  ;;  %v2382_v1 = vsel %vm1600_vm2, %v4793_v3, %v2132_v55  ;;  %v1554_v47 = vmax.f32 %v4765_v13, %v4776_v36 }
 0x20c   : > { %v2591_v9 = vadd.f32 %v2590_v17, %v2589_v16  ;;  %v1548_v56 = vrot.slane %v1547_v28, 4  ;;  %v2383_v58 = vsel %vm1602_vm3, %v4809_v25, %v2382_v1  ;;  %v2594_v52 = vadd.f32 %v2593_v48, %v2592_v44 }
 0x20d   : > { %v1529_v42 = vrot.slane %v1528_v33, 2  ;;  %v1535_v11 = vmax.f32 %v1533_v46, %v1534_v14  ;;  %v2384_v10 = vsel %vm1604_vm4, %v4891_v54, %v2383_v58  ;;  %v1542_v34 = vmax.f32 %v1540_v2, %v1541_v20 }
 0x20e   : > { %v2749_v53 = vsel %vm1612_vm8, %v2591_v9, %v2748_v43  ;;  %v1549_v3 = vmax.f32 %v1547_v28, %v1548_v56  ;;  %v2385_v16 = vsel %vm1606_vm5, %v4906_v59, %v2384_v10  ;;  %v2595_v45 = vrot.slane %v2594_v52, 2 }
 0x20f   : > { %v2775_v60 = vadd.f32 %v2749_v53, %v4940_v30  ;;  %v1530_v25 = vmax.f32 %v1528_v33, %v1529_v42  ;;  %v2386_v44 = vsel %vm1608_vm6, %v2202_v41, %v2385_v16  ;;  %v1536_v21 = vrot.slane %v1535_v11, 2 }
 0x210   : > { %v1543_v46 = vrot.slane %v1542_v34, 2  ;;  %v1550_v17 = vrot.slane %v1549_v3, 2  ;;  %v2387_v43 = vsel %vm1610_vm7, %v2216_v12, %v2386_v44  ;;  %v2596_v55 = vadd.f32 %v2595_v45, %v2594_v52 }
 0x211   : > { %v1531_v54 = vrot.slane %v1530_v25, 1  ;;  %v1555_v2 = vrot.slane %v1554_v47, 4  ;;  %v2388_v30 = vsel %vm1612_vm8, %v4771_v31, %v2387_v43  ;;  %v1537_v48 = vmax.f32 %v1535_v11, %v1536_v21 }
 0x212   : > { %v3694_v28 = vpop.eup %3693  ;;  %v1544_v59 = vmax.f32 %v1542_v34, %v1543_v46  ;;  %v1551_v14 = vmax.f32 %v1549_v3, %v1550_v17  ;;  %v2408_v41 = vadd.f32 %v2388_v30, %v4994_v19  ;;  %v2597_v20 = vrot.slane %v2596_v55, 1 }
 0x213   : > { %v2802_v33 = vmul.f32 %v3694_v28, %v2775_v60  ;;  %v1532_v9 = vmax.f32 %v1530_v25, %v1531_v54  ;;  %v1538_v1 = vrot.slane %v1537_v48, 1  ;;  %v1556_v12 = vmax.f32 %v1554_v47, %v1555_v2 }
 0x214   : > { %v1545_v56 = vrot.slane %v1544_v59, 1  ;;  %v1552_v58 = vrot.slane %v1551_v14, 1  ;;  %v2598_v42 = vadd.f32 %v2597_v20, %v2596_v55  ;;  %3695 = vrcp.f32 %v2408_v41 }
 0x215   : > { %v2818_v52 = vadd.f32 %v4987_v15, %v2802_v33  ;;  %v1625_v31 = vsel %vm1608_vm6, %v1532_v9, %v4960_v57  ;;  %v1539_v11 = vmax.f32 %v1537_v48, %v1538_v1  ;;  %v1557_v34 = vrot.slane %v1556_v12, 2 }
 0x216   : > { %v1546_v53 = vmax.f32 %v1544_v59, %v1545_v56  ;;  %v1553_v10 = vmax.f32 %v1551_v14, %v1552_v58  ;;  %v2756_v60 = vsel %vm1612_vm8, %v2598_v42, %v2755_v27  ;;  %v1561_v21 = vmax.f32 %v4767_v39, %v4779_v26 }
 0x217   : > { %v2842_v3 = vand.u32 2147483647, %v2818_v52  ;;  %2822 = vst [vmem:[%s5049_s13] sm:$0xff] %v2818_v52  ;;  %v2776_v47 = vadd.f32 %v2756_v60, %v4994_v19  ;;  %v1632_v16 = vsel %vm1608_vm6, %v1539_v11, %v4978_v38  ;;  %v1558_v25 = vmax.f32 %v1556_v12, %v1557_v34 }
 0x218   : > { %v1626_v45 = vsel %vm1610_vm7, %v1546_v53, %v1625_v31  ;;  %v1633_v44 = vsel %vm1610_vm7, %v1553_v10, %v1632_v16  ;;  %v1562_v17 = vrot.slane %v1561_v21, 4  ;;  %v5061_v38 = vrot.slane %v4974_v29, %v4571_v49  ;;  %v2826_v29 = vld [vmem:[%s5071_s14] sm:$0xff] }
 0x219   : > { %v2846_v57 = vsub.f32 0.0, %v2842_v3  ;;  %v1559_v46 = vrot.slane %v1558_v25, 1  ;;  %v2830_v11 = vmax.f32 %v2818_v52, 0.0  ;;  %v2834_v53 = vmul.f32 %v2826_v29, %v2818_v52  ;;  %v5683_v3 = vld [vmem:[#allocation49_spill] sm:$0xff]  ;;  %v5688_v29 = vld [vmem:[#allocation43_spill] sm:$0xff] }
 0x21a   : > { %v1563_v19 = vmax.f32 %v1561_v21, %v1562_v17  ;;  %5680 = vst [vmem:[#allocation27_spill] sm:$0xff] %v5061_v38 }
 0x21b   : > { %v2850_v27 = vmul.f32 1.442695, %v2846_v57  ;;  %v1560_v43 = vmax.f32 %v1558_v25, %v1559_v46  ;;  %v5082_v21 = vsub.f32 %v2830_v11, %v2834_v53 }
 0x21c   : > { %v1564_v2 = vrot.slane %v1563_v19, 2 }
 0x21d   : > { %3697 = vpow2.f32 %v2850_v27  ;;  %v1627_v55 = vsel %vm1612_vm8, %v1560_v43, %v1626_v45  ;;  %5684 = vst [vmem:[#allocation28_spill] sm:$0xff] %v5082_v21 }
 0x21e   : > { %v3696_v54 = vpop.eup %3695  ;;  %v1565_v30 = vmax.f32 %v1563_v19, %v1564_v2  ;;  %v1645_v59 = vsub.f32 -inf, %v1627_v55 }
 0x21f   : > { %v2803_v28 = vmul.f32 %v3696_v54, %v2776_v47  ;;  %v5712_v54 = vld [vmem:[#allocation64_spill] sm:$0xff] }
 0x220   : > { %v1566_v14 = vrot.slane %v1565_v30, 1  ;;  %v1651_v1 = vmul.f32 1.442695, %v1645_v59 }
 0x221   : > { %v5065_v48 = vadd.f32 %v5061_v38, %v2803_v28  ;;  %v5686_v28 = vld [vmem:[#allocation39_spill] sm:$0xff] }
 0x222   : > { %v1567_v41 = vmax.f32 %v1565_v30, %v1566_v14  ;;  %3699 = vpow2.f32 %v1651_v1  ;;  %v5689_v1 = vld [vmem:[#allocation45_spill] sm:$0xff] }
 0x223   : > { %5681 = vst [vmem:[#allocation26_spill] sm:$0xff] %v5065_v48  ;;  %v2843_v33 = vand.u32 2147483647, %v5065_v48  ;;  %2823 = vst [vmem:[%s5049_s13 + $0x8] sm:$0xff] %v5065_v48 }
 0x224   : > { %v1634_v56 = vsel %vm1612_vm8, %v1567_v41, %v1633_v44 }
 0x225   : > { %v2847_v20 = vsub.f32 0.0, %v2843_v33  ;;  %v1646_v12 = vsub.f32 -inf, %v1634_v56  ;;  %v1709_v42 = vcombine.low %v1627_v55, %v1634_v56  ;;  %v1710_v31 = vcombine.high %v1627_v55, %v1634_v56  ;;  %v5687_v33 = vld [vmem:[#allocation41_spill] sm:$0xff] }
 0x227   : > { %v5074_v9 = vpop.eup %3697  ;;  %v2852_v58 = vmul.f32 1.442695, %v2847_v20  ;;  %v1717_v60 = vrot.slane %v1709_v42, %v5683_v3  ;;  %v1724_v47 = vrot.slane %v1710_v31, %v5683_v3  ;;  %v1653_v16 = vmul.f32 1.442695, %v1646_v12 }
 0x228   : > { %5682 = vst [vmem:[#allocation31_spill] sm:$0xff] %v5074_v9  ;;  %v2858_v10 = vadd.f32 1.0, %v5074_v9  ;;  %v2861_v34 = vmul.f32 -0.5, %v5074_v9 }
 0x229   : > { %3701 = vpow2.f32 %v2852_v58  ;;  %v1725_v25 = vcombine.high %v1717_v60, %v1717_v60  ;;  %v1726_v57 = vcombine.high %v1724_v47, %v1724_v47  ;;  %v1733_v44 = vrot.slane %v1717_v60, %v5683_v3 }
 0x22a   : > { %v2862_v45 = vadd.f32 1.0, %v2861_v34  ;;  %v1740_v52 = vrot.slane %v1724_v47, %v5683_v3  ;;  %3703 = vlog2.f32 %v2858_v10 }
 0x22b   : > { %v5086_v46 = vrot.slane %v1726_v57, %v5683_v3  ;;  %v1826_v27 = vrot.slane %v1733_v44, %v4568_v23  ;;  %v1830_v17 = vrot.slane %v1733_v44, %v4571_v49  ;;  %v1747_v43 = vrot.slane %v1725_v25, %v5683_v3  ;;  %v5690_v3 = vld [vmem:[#allocation47_spill] sm:$0xff] }
 0x22c   : > { %3705 = vpow2.f32 %v1653_v16  ;;  %v1755_v19 = vcombine.high %v1733_v44, %v1733_v44  ;;  %v5092_v55 = vmul.f32 %v5074_v9, %v2862_v45  ;;  %v5099_v59 = vrot.slane %v1740_v52, %v4568_v23  ;;  %v5116_v57 = vpop.eup %3699  ;;  %v5691_v44 = vld [vmem:[#allocation48_spill] sm:$0xff] }
 0x22d   : > { %v1758_v2 = vcombine.high %v5086_v46, %v5086_v46  ;;  %v1951_v30 = vsub.f32 %v5686_v28, %v1826_v27  ;;  %v5102_v14 = vrot.slane %v1740_v52, %v4571_v49  ;;  %v1952_v41 = vsub.f32 %v5687_v33, %v1830_v17 }
 0x22e   : > { %5685 = vst [vmem:[#allocation29_spill] sm:$0xff] %v5092_v55  ;;  %v1953_v20 = vsub.f32 %v5688_v29, %v1826_v27  ;;  %v1954_v56 = vsub.f32 %v5689_v1, %v1830_v17  ;;  %v1834_v58 = vrot.slane %v1747_v43, %v4568_v23  ;;  %v1838_v11 = vrot.slane %v1747_v43, %v4571_v49  ;;  %v5692_v17 = vld [vmem:[#allocation50_spill] sm:$0xff] }
 0x22f   : > { %v1882_v12 = vrot.slane %v1758_v2, %v4568_v23  ;;  %v1886_v42 = vrot.slane %v1758_v2, %v4571_v49  ;;  %v2047_v31 = vmul.f32 1.442695, %v1951_v30  ;;  %v2049_v53 = vmul.f32 1.442695, %v1952_v41 }
 0x230   : > { %v2051_v10 = vmul.f32 1.442695, %v1953_v20  ;;  %v2053_v34 = vmul.f32 1.442695, %v1954_v56  ;;  %v1955_v60 = vsub.f32 %v5690_v3, %v1834_v58  ;;  %v1956_v27 = vsub.f32 %v5691_v44, %v1838_v11  ;;  %v5695_v20 = vld [vmem:[#allocation51_spill] sm:$0xff]  ;;  %v5698_v3 = vld [vmem:[#allocation53_spill] sm:$0xff] }
 0x231   : > { %v1979_v47 = vsub.f32 %v4765_v13, %v1882_v12  ;;  %v1980_v16 = vsub.f32 %v4767_v39, %v1886_v42  ;;  %v1981_v45 = vsub.f32 %v4776_v36, %v1882_v12  ;;  %v1982_v25 = vsub.f32 %v4779_v26, %v1886_v42 }
 0x232   : > { %3707 = vpow2.f32 %v2047_v31  ;;  %v1957_v2 = vsub.f32 %v5692_v17, %v1834_v58  ;;  %v5120_v28 = vcombine.high %v1740_v52, %v1740_v52  ;;  %v2055_v41 = vmul.f32 1.442695, %v1955_v60  ;;  %v5699_v60 = vld [vmem:[#allocation55_spill] sm:$0xff] }
 0x233   : > { %v5122_v30 = vpop.eup %3701  ;;  %3709 = vpow2.f32 %v2049_v53  ;;  %v2103_v33 = vmul.f32 1.442695, %v1979_v47  ;;  %v2105_v13 = vmul.f32 1.442695, %v1980_v16  ;;  %v2107_v36 = vmul.f32 1.442695, %v1981_v45 }
 0x234   : > { %5693 = vst [vmem:[#allocation32_spill] sm:$0xff] %v5122_v30  ;;  %v5124_v39 = vpop.eup %3703  ;;  %3711 = vpow2.f32 %v2051_v10  ;;  %v2109_v26 = vmul.f32 1.442695, %v1982_v25  ;;  %v2057_v29 = vmul.f32 1.442695, %v1956_v27  ;;  %v1958_v1 = vsub.f32 %v5695_v20, %v1838_v11  ;;  %v5697_v10 = vld [vmem:[#allocation52_spill] sm:$0xff] }
 0x235   : > { %5694 = vst [vmem:[#allocation30_spill] sm:$0xff] %v5124_v39  ;;  %3713 = vpow2.f32 %v2053_v34  ;;  %v1842_v56 = vrot.slane %v1755_v19, %v4568_v23  ;;  %v1846_v52 = vrot.slane %v1755_v19, %v4571_v49  ;;  %v1757_v12 = vcombine.high %v1747_v43, %v1747_v43  ;;  %v5700_v19 = vld [vmem:[#allocation56_spill] sm:$0xff] }
 0x236   : > { %v5129_v58 = vpop.eup %3705  ;;  %3715 = vpow2.f32 %v2103_v33  ;;  %v1967_v42 = vsub.f32 %v4659_v37, %v5099_v59  ;;  %v1968_v31 = vsub.f32 %v4669_v35, %v5102_v14  ;;  %v2059_v53 = vmul.f32 1.442695, %v1957_v2 }
 0x237   : > { %5696 = vst [vmem:[#allocation33_spill] sm:$0xff] %v5129_v58  ;;  %3717 = vpow2.f32 %v2105_v13  ;;  %v1959_v34 = vsub.f32 %v5697_v10, %v1842_v56  ;;  %v1960_v11 = vsub.f32 %v5698_v3, %v1846_v52  ;;  %v1961_v47 = vsub.f32 %v5699_v60, %v1842_v56  ;;  %v5701_v56 = vld [vmem:[#allocation57_spill] sm:$0xff]  ;;  %v5704_v3 = vld [vmem:[#allocation60_spill] sm:$0xff]  ;;  %v5705_v60 = vld [vmem:[#allocation67_spill] sm:$0xff] }
 0x238   : > { %3719 = vpow2.f32 %v2107_v36  ;;  %v1962_v16 = vsub.f32 %v5700_v19, %v1846_v52  ;;  %v1850_v45 = vrot.slane %v1757_v12, %v4568_v23  ;;  %v5142_v43 = vrot.slane %v5086_v46, %v4568_v23 }
 0x239   : > { %3721 = vpow2.f32 %v2109_v26  ;;  %v2061_v37 = vmul.f32 1.442695, %v1958_v1  ;;  %v1854_v35 = vrot.slane %v1757_v12, %v4571_v49  ;;  %v5147_v25 = vrot.slane %v5086_v46, %v4571_v49 }
 0x23a   : > { %3723 = vpow2.f32 %v2055_v41  ;;  %v2063_v44 = vmul.f32 1.442695, %v1959_v34  ;;  %v1963_v27 = vsub.f32 %v4624_v24, %v1850_v45  ;;  %v1965_v2 = vsub.f32 %v4644_v7, %v1850_v45  ;;  %v5703_v7 = vld [vmem:[#allocation65_spill] sm:$0xff] }
 0x23b   : > { %3725 = vpow2.f32 %v2057_v29  ;;  %v1964_v17 = vsub.f32 %v4632_v5, %v1854_v35  ;;  %v1966_v33 = vsub.f32 %v4649_v8, %v1854_v35  ;;  %v2065_v36 = vmul.f32 1.442695, %v1960_v11  ;;  %v5702_v29 = vld [vmem:[#allocation58_spill] sm:$0xff] }
 0x23c   : > { %v3708_v13 = vpop.eup %3707  ;;  %3727 = vpow2.f32 %v2059_v53  ;;  %v2067_v26 = vmul.f32 1.442695, %v1961_v47  ;;  %v2069_v20 = vmul.f32 1.442695, %v1962_v16  ;;  %v2071_v41 = vmul.f32 1.442695, %v1963_v27 }
 0x23d   : > { %v3710_v1 = vpop.eup %3709  ;;  %v2455_v46 = vmul.f32 %v3708_v13, %v5701_v56  ;;  %3729 = vpow2.f32 %v2061_v37  ;;  %v5154_v52 = vmul.f32 1.442695, %v1967_v42  ;;  %v2073_v5 = vmul.f32 1.442695, %v1964_v17  ;;  %v5706_v16 = vld [vmem:[#allocation61_spill] sm:$0xff] }
 0x23e   : > { %v3712_v24 = vpop.eup %3711  ;;  %v2456_v12 = vmul.f32 %v3710_v1, %v5702_v29  ;;  %v5157_v10 = vmul.f32 1.442695, %v1968_v31  ;;  %v1969_v8 = vsub.f32 %v5703_v7, %v5099_v59  ;;  %3731 = vpow2.f32 %v2063_v44  ;;  %v5710_v7 = vld [vmem:[#allocation62_spill] sm:$0xff] }
 0x23f   : > { %v3714_v53 = vpop.eup %3713  ;;  %v2231_v34 = vadd.f32 %v3712_v24, %v3708_v13  ;;  %v2457_v11 = vmul.f32 %v3712_v24, %v5704_v3  ;;  %v1970_v47 = vsub.f32 %v5705_v60, %v5102_v14  ;;  %3733 = vpow2.f32 %v2065_v36 }
 0x240   : > { %v5164_v19 = vpop.eup %3715  ;;  %v2238_v42 = vadd.f32 %v3714_v53, %v3710_v1  ;;  %v2458_v45 = vmul.f32 %v3714_v53, %v5706_v16  ;;  %v2075_v37 = vmul.f32 1.442695, %v1965_v2  ;;  %3735 = vpow2.f32 %v2067_v26 }
 0x241   : > { %v5167_v31 = vpop.eup %3717  ;;  %v2232_v35 = vrot.slane %v2231_v34, 4  ;;  %v2599_v27 = vadd.f32 %v2457_v11, %v2455_v46  ;;  %v5169_v59 = vmul.f32 1.442695, %v1966_v33  ;;  %3737 = vpow2.f32 %v2069_v20 }
 0x242   : > { %v5171_v17 = vpop.eup %3719  ;;  %v2239_v44 = vrot.slane %v2238_v42, 4  ;;  %v2606_v13 = vadd.f32 %v2458_v45, %v2456_v12  ;;  %3739 = vpow2.f32 %v2071_v41  ;;  %v5179_v56 = vmul.f32 1.442695, %v1969_v8  ;;  %v5711_v41 = vld [vmem:[#allocation63_spill] sm:$0xff] }
 0x243   : > { %5707 = vst [vmem:[#allocation34_spill] sm:$0xff] %v5171_v17  ;;  %v5175_v1 = vpop.eup %3721  ;;  %v2329_v2 = vadd.f32 %v5171_v17, %v5164_v19  ;;  %v2600_v36 = vrot.slane %v2599_v27, 4  ;;  %v5181_v33 = vadd.f32 %v2232_v35, %v2231_v34  ;;  %3741 = vpow2.f32 %v2073_v5  ;;  %v5718_v17 = vld [vmem:[#allocation78_spill] sm:$0xff] }
 0x244   : > { %5708 = vst [vmem:[#allocation35_spill] sm:$0xff] %v5175_v1  ;;  %v3724_v26 = vpop.eup %3723  ;;  %v2336_v46 = vadd.f32 %v5175_v1, %v5167_v31  ;;  %v2607_v24 = vrot.slane %v2606_v13, 4  ;;  %v5185_v29 = vadd.f32 %v2239_v44, %v2238_v42  ;;  %3743 = vpow2.f32 %v2075_v37  ;;  %v5713_v42 = vld [vmem:[#allocation66_spill] sm:$0xff]  ;;  %v5717_v1 = vld [vmem:[#allocation76_spill] sm:$0xff] }
 0x245   : > { %v3726_v20 = vpop.eup %3725  ;;  %v2330_v12 = vrot.slane %v2329_v2, 4  ;;  %v2459_v53 = vmul.f32 %v3724_v26, %v5710_v7  ;;  %v2601_v3 = vadd.f32 %v2600_v36, %v2599_v27  ;;  %3745 = vpow2.f32 %v5169_v59 }
 0x246   : > { %5709 = vst [vmem:[#allocation40_spill] sm:$0xff] %v5185_v29  ;;  %v3728_v11 = vpop.eup %3727  ;;  %v2337_v60 = vrot.slane %v2336_v46, 4  ;;  %v2460_v8 = vmul.f32 %v3726_v20, %v5711_v41  ;;  %v2608_v16 = vadd.f32 %v2607_v24, %v2606_v13  ;;  %3747 = vpow2.f32 %v5154_v52 }
 0x247   : > { %v3730_v34 = vpop.eup %3729  ;;  %v2331_v45 = vadd.f32 %v2330_v12, %v2329_v2  ;;  %v2245_v35 = vadd.f32 %v3728_v11, %v3724_v26  ;;  %v2461_v14 = vmul.f32 %v3728_v11, %v5712_v54  ;;  %v2602_v38 = vrot.slane %v2601_v3, 2  ;;  %v5716_v11 = vld [vmem:[#allocation72_spill] sm:$0xff] }
 0x248   : > { %v2338_v5 = vadd.f32 %v2337_v60, %v2336_v46  ;;  %v2252_v15 = vadd.f32 %v3730_v34, %v3726_v20  ;;  %v2462_v44 = vmul.f32 %v3730_v34, %v5713_v42  ;;  %v2609_v48 = vrot.slane %v2608_v16, 2  ;;  %v3732_v58 = vpop.eup %3731 }
 0x249   : > { %v2332_v7 = vrot.slane %v2331_v45, 2  ;;  %v2246_v27 = vrot.slane %v2245_v35, 4  ;;  %v2603_v36 = vadd.f32 %v2602_v38, %v2601_v3  ;;  %v2613_v21 = vadd.f32 %v2461_v14, %v2459_v53  ;;  %v3734_v30 = vpop.eup %3733 }
 0x24a   : > { %v2339_v41 = vrot.slane %v2338_v5, 2  ;;  %v2253_v13 = vrot.slane %v2252_v15, 4  ;;  %v2610_v37 = vadd.f32 %v2609_v48, %v2608_v16  ;;  %v2620_v24 = vadd.f32 %v2462_v44, %v2460_v8  ;;  %v3736_v2 = vpop.eup %3735  ;;  %v5714_v48 = vld [vmem:[#allocation68_spill] sm:$0xff] }
 0x24b   : > { %v2247_v54 = vadd.f32 %v2246_v27, %v2245_v35  ;;  %v2614_v12 = vrot.slane %v2613_v21, 4  ;;  %v5192_v46 = vmul.f32 1.442695, %v1970_v47  ;;  %v3738_v20 = vpop.eup %3737  ;;  %v2604_v60 = vrot.slane %v2603_v36, 1 }
 0x24c   : > { %v2254_v34 = vadd.f32 %v2253_v13, %v2252_v15  ;;  %v2621_v42 = vrot.slane %v2620_v24, 4  ;;  %v3740_v38 = vpop.eup %3739  ;;  %v5195_v14 = vadd.f32 %v2332_v7, %v2331_v45  ;;  %v2463_v8 = vmul.f32 %v3732_v58, %v5714_v48 }
 0x24d   : > { %v2248_v53 = vrot.slane %v2247_v54, 2  ;;  %v2615_v3 = vadd.f32 %v2614_v12, %v2613_v21  ;;  %v5198_v16 = vpop.eup %3741  ;;  %v5200_v44 = vadd.f32 %v2339_v41, %v2338_v5  ;;  %v2611_v47 = vrot.slane %v2610_v37, 1 }
 0x24e   : > { %v2255_v35 = vrot.slane %v2254_v34, 2  ;;  %v2622_v27 = vadd.f32 %v2621_v42, %v2620_v24  ;;  %v2464_v39 = vmul.f32 %v3734_v30, %v5716_v11  ;;  %v2259_v15 = vadd.f32 %v3736_v2, %v3732_v58  ;;  %v3744_v13 = vpop.eup %3743 }
 0x24f   : > { %5715 = vst [vmem:[#allocation42_spill] sm:$0xff] %v5200_v44  ;;  %v2249_v26 = vadd.f32 %v2248_v53, %v2247_v54  ;;  %v2616_v55 = vrot.slane %v2615_v3, 2  ;;  %v2605_v9 = vadd.f32 %v2604_v60, %v2603_v36  ;;  %v2465_v21 = vmul.f32 %v3736_v2, %v5717_v1 }
 0x250   : > { %v2256_v45 = vadd.f32 %v2255_v35, %v2254_v34  ;;  %v2623_v7 = vrot.slane %v2622_v27, 2  ;;  %v2260_v62 = vrot.slane %v2259_v15, 4  ;;  %v2266_v29 = vadd.f32 %v3738_v20, %v3734_v30 }
 0x251   : > { %v2250_v12 = vrot.slane %v2249_v26, 1  ;;  %v2617_v48 = vadd.f32 %v2616_v55, %v2615_v3  ;;  %v2612_v5 = vadd.f32 %v2611_v47, %v2610_v37  ;;  %v2627_v44 = vadd.f32 %v2465_v21, %v2463_v8  ;;  %v5719_v55 = vld [vmem:[#allocation81_spill] sm:$0xff]  ;;  %v5720_v8 = vld [vmem:[#allocation82_spill] sm:$0xff]  ;;  %v5721_v21 = vld [vmem:[#allocation83_spill] sm:$0xff] }
 0x252   : > { %v2624_v41 = vadd.f32 %v2623_v7, %v2622_v27  ;;  %v2466_v24 = vmul.f32 %v3738_v20, %v5718_v17  ;;  %v2257_v42 = vrot.slane %v2256_v45, 1  ;;  %v2261_v53 = vadd.f32 %v2260_v62, %v2259_v15 }
 0x253   : > { %v2618_v54 = vrot.slane %v2617_v48, 1  ;;  %v2267_v11 = vrot.slane %v2266_v29, 4  ;;  %v5205_v58 = vadd.f32 %v2250_v12, %v2249_v26  ;;  %v2628_v60 = vrot.slane %v2627_v44, 4 }
 0x254   : > { %v2625_v36 = vrot.slane %v2624_v41, 1  ;;  %v2634_v34 = vadd.f32 %v2466_v24, %v2464_v39  ;;  %v2262_v1 = vrot.slane %v2261_v53, 2  ;;  %v2467_v3 = vmul.f32 %v3740_v38, %v5719_v55 }
 0x255   : > { %v2619_v35 = vadd.f32 %v2618_v54, %v2617_v48  ;;  %v2268_v2 = vadd.f32 %v2267_v11, %v2266_v29  ;;  %v2629_v37 = vadd.f32 %v2628_v60, %v2627_v44  ;;  %v5210_v17 = vmul.f32 %v5198_v16, %v5720_v8 }
 0x256   : > { %v2626_v30 = vadd.f32 %v2625_v36, %v2624_v41  ;;  %v2635_v47 = vrot.slane %v2634_v34, 4  ;;  %v2263_v20 = vadd.f32 %v2262_v1, %v2261_v53  ;;  %v2273_v27 = vadd.f32 %v3744_v13, %v3740_v38 }
 0x257   : > { %v2757_v62 = vsel %vm1600_vm2, %v2619_v35, %v2605_v9  ;;  %v2269_v26 = vrot.slane %v2268_v2, 2  ;;  %v2630_v39 = vrot.slane %v2629_v37, 2  ;;  %v2469_v29 = vmul.f32 %v3744_v13, %v5721_v21 }
 0x258   : > { %v2764_v15 = vsel %vm1600_vm2, %v2626_v30, %v2612_v5  ;;  %v2636_v7 = vadd.f32 %v2635_v47, %v2634_v34  ;;  %v2264_v12 = vrot.slane %v2263_v20, 1  ;;  %v2274_v41 = vrot.slane %v2273_v27, 4 }
 0x259   : > { %v2270_v48 = vadd.f32 %v2269_v26, %v2268_v2  ;;  %v2631_v44 = vadd.f32 %v2630_v39, %v2629_v37  ;;  %v2641_v54 = vadd.f32 %v2469_v29, %v2467_v3  ;;  %v5217_v9 = vadd.f32 %v2257_v42, %v2256_v45 }
 0x25a   : > { %v2637_v24 = vrot.slane %v2636_v7, 2  ;;  %v5219_v53 = vadd.f32 %v2264_v12, %v2263_v20  ;;  %v2275_v38 = vadd.f32 %v2274_v41, %v2273_v27  ;;  %3749 = vpow2.f32 %v5157_v10  ;;  %v5723_v27 = vld [vmem:[#allocation14_spill] sm:$0xff]  ;;  %v5725_v41 = vld [vmem:[#allocation12_spill] sm:$0xff] }
 0x25b   : > { %v2632_v5 = vrot.slane %v2631_v44, 1  ;;  %v2642_v13 = vrot.slane %v2641_v54, 4  ;;  %3751 = vpow2.f32 %v5179_v56  ;;  %v2271_v36 = vrot.slane %v2270_v48, 1 }
 0x25c   : > { %v2638_v11 = vadd.f32 %v2637_v24, %v2636_v7  ;;  %v2276_v60 = vrot.slane %v2275_v38, 2  ;;  %3753 = vpow2.f32 %v5192_v46  ;;  %v5722_v59 = vsub.f32 %v5672_v6, %v5142_v43  ;;  %v5724_v7 = vld [vmem:[#allocation16_spill] sm:$0xff] }
 0x25d   : > { %v2633_v45 = vadd.f32 %v2632_v5, %v2631_v44  ;;  %v2643_v34 = vadd.f32 %v2642_v13, %v2641_v54  ;;  %v1972_v35 = vsub.f32 %v5674_v50, %v5147_v25  ;;  %v1973_v56 = vsub.f32 %v5671_v22, %v5142_v43  ;;  %v5726_v54 = vld [vmem:[#allocation13_spill] sm:$0xff] }
 0x25e   : > { %v2087_v52 = vmul.f32 1.442695, %v5722_v59  ;;  %v2639_v42 = vrot.slane %v2638_v11, 1  ;;  %v5229_v10 = vadd.f32 %v2276_v60, %v2275_v38  ;;  %v1974_v1 = vsub.f32 %v5673_v18, %v5147_v25  ;;  %v3746_v18 = vpop.eup %3745 }
 0x25f   : > { %v2758_v46 = vsel %vm1602_vm3, %v2633_v45, %v2757_v62  ;;  %v2644_v6 = vrot.slane %v2643_v34, 2  ;;  %v2089_v55 = vmul.f32 1.442695, %v1972_v35  ;;  %v5236_v3 = vadd.f32 %v2271_v36, %v2270_v48  ;;  %v3748_v20 = vpop.eup %3747  ;;  %v5727_v45 = vld [vmem:[#allocation15_spill] sm:$0xff] }
 0x260   : > { %3755 = vpow2.f32 %v2087_v52  ;;  %v2640_v2 = vadd.f32 %v2639_v42, %v2638_v11  ;;  %v2091_v30 = vmul.f32 1.442695, %v1973_v56  ;;  %v2093_v37 = vmul.f32 1.442695, %v1974_v1  ;;  %v5728_v56 = vld [vmem:[#allocation17_spill] sm:$0xff] }
 0x261   : > { %v1874_v50 = vrot.slane %v5120_v28, %v4568_v23  ;;  %v2645_v8 = vadd.f32 %v2644_v6, %v2643_v34  ;;  %3757 = vpow2.f32 %v2089_v55  ;;  %v5245_v22 = vrot.slane %v5120_v28, %v4571_v49 }
 0x262   : > { %v5241_v47 = vsel %vm1602_vm3, %v2640_v2, %v2764_v15  ;;  %v2278_v43 = vrot.slane %v5229_v10, 1  ;;  %3759 = vpow2.f32 %v2091_v30  ;;  %v2280_v23 = vadd.f32 %v3746_v18, %v5198_v16 }
 0x263   : > { %v1975_v25 = vsub.f32 %v5676_v63, %v1874_v50  ;;  %v1977_v62 = vsub.f32 %v5675_v61, %v1874_v50  ;;  %v2646_v26 = vrot.slane %v2645_v8, 1  ;;  %v2470_v15 = vmul.f32 %v3746_v18, %v5723_v27 }
 0x264   : > { %3761 = vpow2.f32 %v2093_v37  ;;  %v3750_v39 = vpop.eup %3749  ;;  %v2471_v21 = vmul.f32 %v3748_v20, %v5724_v7  ;;  %v1976_v28 = vsub.f32 %v5678_v51, %v5245_v22  ;;  %v2281_v63 = vrot.slane %v2280_v23, 4 }
 0x265   : > { %v2095_v49 = vmul.f32 1.442695, %v1975_v25  ;;  %v2099_v29 = vmul.f32 1.442695, %v1977_v62  ;;  %v3752_v12 = vpop.eup %3751  ;;  %v2647_v48 = vadd.f32 %v2646_v26, %v2645_v8  ;;  %v2648_v61 = vadd.f32 %v2470_v15, %v5210_v17  ;;  %v5729_v26 = vld [vmem:[#allocation18_spill] sm:$0xff] }
 0x266   : > { %v2472_v44 = vmul.f32 %v3750_v39, %v5725_v41  ;;  %v3754_v24 = vpop.eup %3753  ;;  %v2287_v16 = vadd.f32 %v3752_v12, %v3748_v20  ;;  %v2473_v38 = vmul.f32 %v3752_v12, %v5726_v54  ;;  %v2097_v5 = vmul.f32 1.442695, %v1976_v28  ;;  %v5730_v12 = vld [vmem:[#allocation54_spill] sm:$0xff] }
 0x267   : > { %3763 = vpow2.f32 %v2095_v49  ;;  %v5259_v11 = vsel %vm1604_vm4, %v2647_v48, %v2758_v46  ;;  %v2282_v13 = vadd.f32 %v2281_v63, %v2280_v23  ;;  %v2649_v36 = vrot.slane %v2648_v61, 4 }
 0x268   : > { %v2294_v51 = vadd.f32 %v3754_v24, %v3750_v39  ;;  %v2288_v59 = vrot.slane %v2287_v16, 4  ;;  %v2655_v52 = vadd.f32 %v2473_v38, %v2471_v21  ;;  %v2474_v42 = vmul.f32 %v3754_v24, %v5727_v45 }
 0x269   : > { %3765 = vpow2.f32 %v2097_v5  ;;  %v2283_v17 = vrot.slane %v2282_v13, 2  ;;  %v2650_v34 = vadd.f32 %v2649_v36, %v2648_v61  ;;  %v1978_v8 = vsub.f32 %v5677_v32, %v5245_v22 }
 0x26a   : > { %v3756_v60 = vpop.eup %3755  ;;  %v2295_v35 = vrot.slane %v2294_v51, 4  ;;  %v2289_v2 = vadd.f32 %v2288_v59, %v2287_v16  ;;  %v2656_v6 = vrot.slane %v2655_v52, 4  ;;  %v2662_v55 = vadd.f32 %v2474_v42, %v2472_v44 }
 0x26b   : > { %v2475_v1 = vmul.f32 %v3756_v60, %v5728_v56  ;;  %3767 = vpow2.f32 %v2099_v29  ;;  %v3758_v46 = vpop.eup %3757  ;;  %v2284_v30 = vadd.f32 %v2283_v17, %v2282_v13  ;;  %v2651_v37 = vrot.slane %v2650_v34, 2 }
 0x26c   : > { %v2296_v50 = vadd.f32 %v2295_v35, %v2294_v51  ;;  %v3760_v18 = vpop.eup %3759  ;;  %v2290_v25 = vrot.slane %v2289_v2, 2  ;;  %v2657_v62 = vadd.f32 %v2656_v6, %v2655_v52  ;;  %v2663_v20 = vrot.slane %v2662_v55, 4 }
 0x26d   : > { %v2476_v23 = vmul.f32 %v3758_v46, %v5729_v26  ;;  %v2285_v15 = vrot.slane %v2284_v30, 1  ;;  %v2652_v39 = vadd.f32 %v2651_v37, %v2650_v34  ;;  %v2301_v21 = vadd.f32 %v3760_v18, %v3756_v60 }
 0x26e   : > { %v3762_v27 = vpop.eup %3761  ;;  %v2297_v7 = vrot.slane %v2296_v50, 2  ;;  %v2291_v49 = vadd.f32 %v2290_v25, %v2289_v2  ;;  %v2658_v28 = vrot.slane %v2657_v62, 2  ;;  %v2664_v29 = vadd.f32 %v2663_v20, %v2662_v55  ;;  %v5731_v2 = vld [vmem:[#allocation19_spill] sm:$0xff] }
 0x26f   : > { %v2477_v48 = vmul.f32 %v3760_v18, %v5730_v12  ;;  %v5268_v63 = vadd.f32 %v2278_v43, %v5229_v10  ;;  %v2653_v32 = vrot.slane %v2652_v39, 1  ;;  %v2302_v61 = vrot.slane %v2301_v21, 4 }
 0x270   : > { %v2298_v22 = vadd.f32 %v2297_v7, %v2296_v50  ;;  %v2292_v44 = vrot.slane %v2291_v49, 1  ;;  %v2659_v24 = vadd.f32 %v2658_v28, %v2657_v62  ;;  %v2665_v16 = vrot.slane %v2664_v29, 2  ;;  %v5733_v50 = vld [vmem:[#allocation21_spill] sm:$0xff]  ;;  %v5734_v7 = vld [vmem:[#allocation20_spill] sm:$0xff] }
 0x271   : > { %v3764_v41 = vpop.eup %3763  ;;  %v2669_v54 = vadd.f32 %v2477_v48, %v2475_v1  ;;  %v5270_v38 = vadd.f32 %v2285_v15, %v2284_v30  ;;  %v2654_v5 = vadd.f32 %v2653_v32, %v2652_v39  ;;  %v2303_v13 = vadd.f32 %v2302_v61, %v2301_v21  ;;  %v5732_v30 = vld [vmem:[#allocation23_spill] sm:$0xff] }
 0x272   : > { %v2308_v36 = vadd.f32 %v3762_v27, %v3758_v46  ;;  %v2660_v60 = vrot.slane %v2659_v24, 1  ;;  %v2299_v59 = vrot.slane %v2298_v22, 1  ;;  %v2666_v52 = vadd.f32 %v2665_v16, %v2664_v29 }
 0x273   : > { %v5272_v51 = vpop.eup %3765  ;;  %v2670_v10 = vrot.slane %v2669_v54, 4  ;;  %v2766_v43 = vsel %vm1604_vm4, %v2654_v5, %v5241_v47  ;;  %v5276_v45 = vadd.f32 %v2292_v44, %v2291_v49  ;;  %v2304_v42 = vrot.slane %v2303_v13, 2 }
 0x274   : > { %v2309_v17 = vrot.slane %v2308_v36, 4  ;;  %v2661_v35 = vadd.f32 %v2660_v60, %v2659_v24  ;;  %v2667_v56 = vrot.slane %v2666_v52, 1  ;;  %v2478_v6 = vmul.f32 %v3762_v27, %v5731_v2 }
 0x275   : > { %v3768_v34 = vpop.eup %3767  ;;  %v2671_v1 = vadd.f32 %v2670_v10, %v2669_v54  ;;  %v2305_v55 = vadd.f32 %v2304_v42, %v2303_v13  ;;  %v2479_v37 = vmul.f32 %v3764_v41, %v5732_v30  ;;  %v5282_v18 = vmul.f32 %v5272_v51, %v5733_v50  ;;  %v5740_v50 = vld [vmem:[#allocation35_spill] sm:$0xff] }
 0x276   : > { %v2310_v46 = vadd.f32 %v2309_v17, %v2308_v36  ;;  %v2760_v47 = vsel %vm1606_vm5, %v2661_v35, %v5259_v11  ;;  %v2668_v25 = vadd.f32 %v2667_v56, %v2666_v52  ;;  %v2676_v20 = vadd.f32 %v2478_v6, %v2476_v23 }
 0x277   : > { %v2672_v62 = vrot.slane %v2671_v1, 2  ;;  %v2306_v26 = vrot.slane %v2305_v55, 1  ;;  %v2315_v39 = vadd.f32 %v3768_v34, %v3764_v41  ;;  %v2481_v21 = vmul.f32 %v3768_v34, %v5734_v7 }
 0x278   : > { %v2311_v15 = vrot.slane %v2310_v46, 2  ;;  %v2767_v27 = vsel %vm1606_vm5, %v2668_v25, %v2766_v43  ;;  %v2677_v28 = vrot.slane %v2676_v20, 4  ;;  %v2101_v29 = vmul.f32 1.442695, %v1978_v8  ;;  %v5741_v25 = vld [vmem:[#allocation31_spill] sm:$0xff] }
 0x279   : > { %v2673_v49 = vadd.f32 %v2672_v62, %v2671_v1  ;;  %v2316_v48 = vrot.slane %v2315_v39, 4  ;;  %v2683_v32 = vadd.f32 %v2481_v21, %v2479_v37  ;;  %v2483_v61 = vmul.f32 %v5164_v19, %v5005_v0  ;;  %v5739_v37 = vld [vmem:[#allocation24_spill] sm:$0xff]  ;;  %v2827_v62 = vld [vmem:[%s5071_s14 + $0x8] sm:$0xff] }
 0x27a   : > { %v2312_v12 = vadd.f32 %v2311_v15, %v2310_v46  ;;  %v2678_v44 = vadd.f32 %v2677_v28, %v2676_v20  ;;  %3769 = vpow2.f32 %v2101_v29  ;;  %v2484_v23 = vmul.f32 %v5167_v31, %v5007_v4  ;;  %v5736_v4 = vld [vmem:[#allocation34_spill] sm:$0xff] }
 0x27b   : > { %v2674_v11 = vrot.slane %v2673_v49, 1  ;;  %v5292_v41 = vadd.f32 %v2299_v59, %v2298_v22  ;;  %v2317_v16 = vadd.f32 %v2316_v48, %v2315_v39  ;;  %v2684_v54 = vrot.slane %v2683_v32, 4  ;;  %v5745_v15 = vld [vmem:[#allocation30_spill] sm:$0xff] }
 0x27c   : > { %v2313_v24 = vrot.slane %v2312_v12, 1  ;;  %v2679_v13 = vrot.slane %v2678_v44, 2  ;;  %v5295_v8 = vmul.f32 0.0, %v5116_v57  ;;  %v5735_v36 = vrot.slane %v5181_v33, 2 }
 0x27d   : > { %v2675_v5 = vadd.f32 %v2674_v11, %v2673_v49  ;;  %v2318_v19 = vrot.slane %v2317_v16, 2  ;;  %v2685_v60 = vadd.f32 %v2684_v54, %v2683_v32  ;;  %v2334_v52 = vrot.slane %v5195_v14, 1 }
 0x27e   : > { %v2235_v0 = vadd.f32 %v5735_v36, %v5181_v33  ;;  %v2485_v31 = vmul.f32 %v5736_v4, %v5014_v40  ;;  %v2680_v59 = vadd.f32 %v2679_v13, %v2678_v44  ;;  %v2307_v43 = vadd.f32 %v2306_v26, %v2305_v55  ;;  %v5737_v33 = vld [vmem:[#allocation40_spill] sm:$0xff]  ;;  %v5746_v44 = vld [vmem:[#allocation25_spill] sm:$0xff] }
 0x27f   : > { %v2761_v22 = vsel %vm1608_vm6, %v2675_v5, %v2760_v47  ;;  %v2319_v42 = vadd.f32 %v2318_v19, %v2317_v16  ;;  %v2686_v17 = vrot.slane %v2685_v60, 2  ;;  %v2335_v57 = vadd.f32 %v2334_v52, %v5195_v14 }
 0x280   : > { %v2236_v10 = vrot.slane %v2235_v0, 1  ;;  %v2697_v34 = vadd.f32 %v2485_v31, %v2483_v61  ;;  %v2681_v35 = vrot.slane %v2680_v59, 1  ;;  %v5738_v1 = vrot.slane %v5737_v33, 2 }
 0x281   : > { %v2314_v6 = vadd.f32 %v2313_v24, %v2312_v12  ;;  %v2687_v46 = vadd.f32 %v2686_v17, %v2685_v60  ;;  %v2320_v30 = vrot.slane %v2319_v42, 1  ;;  %v2486_v47 = vmul.f32 %v5740_v50, %v5739_v37 }
 0x282   : > { %v2237_v56 = vadd.f32 %v2236_v10, %v2235_v0  ;;  %v2242_v2 = vadd.f32 %v5738_v1, %v5737_v33  ;;  %v2698_v40 = vrot.slane %v2697_v34, 4  ;;  %v5742_v55 = vand.u32 2147483647, %v5741_v25  ;;  %v5749_v33 = vld [vmem:[#allocation28_spill] sm:$0xff]  ;;  %v5750_v1 = vld [vmem:[#allocation42_spill] sm:$0xff] }
 0x283   : > { %v2682_v14 = vadd.f32 %v2681_v35, %v2680_v59  ;;  %v2860_v39 = vmul.f32 0.6931472, %v5745_v15  ;;  %v2688_v7 = vrot.slane %v2687_v46, 1  ;;  %v2321_v21 = vadd.f32 %v2320_v30, %v2319_v42  ;;  %v5747_v59 = vld [vmem:[#allocation29_spill] sm:$0xff] }
 0x284   : > { %vm5312_vm9 = vcmp.lt.f32.partialorder %v5742_v55, 0.0004427343  ;;  %v2389_v20 = vsel %vm1600_vm2, %v5205_v58, %v2237_v56  ;;  %v2243_v26 = vrot.slane %v2242_v2, 1  ;;  %v2699_v28 = vadd.f32 %v2698_v40, %v2697_v34  ;;  %v3770_v29 = vpop.eup %3769  ;;  %v5748_v34 = vld [vmem:[#allocation32_spill] sm:$0xff] }
 0x285   : > { %v2390_v49 = vsel %vm1602_vm3, %v5219_v53, %v2389_v20  ;;  %v2768_v12 = vsel %vm1608_vm6, %v2682_v14, %v2767_v27  ;;  %v2704_v61 = vadd.f32 %v2486_v47, %v2484_v23  ;;  %v2689_v11 = vadd.f32 %v2688_v7, %v2687_v46  ;;  %v5751_v20 = vld [vmem:[#allocation33_spill] sm:$0xff] }
 0x286   : > { %v2391_v48 = vsel %vm1604_vm4, %v5268_v63, %v2390_v49  ;;  %v2244_v32 = vadd.f32 %v2243_v26, %v2242_v2  ;;  %v2322_v58 = vadd.f32 %v3770_v29, %v5272_v51  ;;  %v2482_v24 = vmul.f32 %v3770_v29, %v5746_v44 }
 0x287   : > { %v2392_v16 = vsel %vm1606_vm5, %v5276_v45, %v2391_v48  ;;  %v2700_v53 = vrot.slane %v2699_v28, 2  ;;  %v2705_v27 = vrot.slane %v2704_v61, 4  ;;  %v2762_v13 = vsel %vm1610_vm7, %v2689_v11, %v2761_v22 }
 0x288   : > { %v2393_v54 = vsel %vm1608_vm6, %v2307_v43, %v2392_v16  ;;  %v2396_v5 = vsel %vm1600_vm2, %v5217_v9, %v2244_v32  ;;  %v2323_v63 = vrot.slane %v2322_v58, 4  ;;  %v2690_v23 = vadd.f32 %v2482_v24, %v5282_v18  ;;  %v5753_v16 = vld [vmem:[#allocation22_spill] sm:$0xff] }
 0x289   : > { %v2394_v36 = vsel %vm1610_vm7, %v2321_v21, %v2393_v54  ;;  %v2701_v0 = vadd.f32 %v2700_v53, %v2699_v28  ;;  %v2397_v45 = vsel %vm1602_vm3, %v5236_v3, %v2396_v5  ;;  %v2706_v19 = vadd.f32 %v2705_v27, %v2704_v61  ;;  %v5752_v21 = vld [vmem:[#allocation26_spill] sm:$0xff] }
 0x28a   : > { %v2395_v51 = vsel %vm1612_vm8, %v2335_v57, %v2394_v36  ;;  %v2324_v60 = vadd.f32 %v2323_v63, %v2322_v58  ;;  %v2691_v52 = vrot.slane %v2690_v23, 4  ;;  %v2398_v9 = vsel %vm1604_vm4, %v5270_v38, %v2397_v45  ;;  %v5754_v45 = vld [vmem:[#allocation27_spill] sm:$0xff] }
 0x28b   : > { %v2409_v4 = vadd.f32 %v2395_v51, %v5295_v8  ;;  %v2702_v31 = vrot.slane %v2701_v0, 1  ;;  %v2399_v18 = vsel %vm1606_vm5, %v5292_v41, %v2398_v9  ;;  %v2707_v22 = vrot.slane %v2706_v19, 2 }
 0x28c   : > { %v2866_v10 = vsel %vm5312_vm9, %v5747_v59, %v2860_v39  ;;  %v2325_v43 = vrot.slane %v2324_v60, 2  ;;  %v2692_v3 = vadd.f32 %v2691_v52, %v2690_v23  ;;  %v2400_v42 = vsel %vm1608_vm6, %v2314_v6, %v2399_v18 }
 0x28d   : > { %3771 = vrcp.f32 %v2409_v4  ;;  %v2703_v17 = vadd.f32 %v2702_v31, %v2701_v0  ;;  %v2708_v57 = vadd.f32 %v2707_v22, %v2706_v19  ;;  %v2867_v35 = vadd.f32 1.0, %v5748_v34 }
 0x28e   : > { %v2326_v38 = vadd.f32 %v2325_v43, %v2324_v60  ;;  %v2693_v56 = vrot.slane %v2692_v3, 2  ;;  %v2894_v41 = vadd.f32 %v2866_v10, %v5749_v33  ;;  %v2341_v2 = vrot.slane %v5750_v1, 1 }
 0x28f   : > { %v2763_v46 = vsel %vm1612_vm8, %v2703_v17, %v2762_v13  ;;  %3773 = vlog2.f32 %v2867_v35  ;;  %v2709_v6 = vrot.slane %v2708_v57, 1  ;;  %v2870_v25 = vmul.f32 -0.5, %v5748_v34 }
 0x290   : > { %v2694_v30 = vadd.f32 %v2693_v56, %v2692_v3  ;;  %v2777_v40 = vadd.f32 %v2763_v46, %v5295_v8  ;;  %v2327_v37 = vrot.slane %v2326_v38, 1  ;;  %2898 = vst [vmem:[%s5352_s15] sm:$0xff] %v2894_v41  ;;  %v2342_v55 = vadd.f32 %v2341_v2, %v5750_v1 }
 0x291   : > { %v2118_v26 = vmul.f32 0.0, %v5751_v20  ;;  %v2710_v39 = vadd.f32 %v2709_v6, %v2708_v57  ;;  %v2831_v49 = vmax.f32 %v5752_v21, 0.0  ;;  %v2871_v48 = vadd.f32 1.0, %v2870_v25 }
 0x292   : > { %v2695_v50 = vrot.slane %v2694_v30, 1  ;;  %v2328_v47 = vadd.f32 %v2327_v37, %v2326_v38  ;;  %v2835_v32 = vmul.f32 %v2827_v62, %v5752_v21  ;;  %v2873_v58 = vand.u32 2147483647, %v5748_v34 }
 0x294   : > { %v2696_v14 = vadd.f32 %v2695_v50, %v2694_v30  ;;  %v2401_v15 = vsel %vm1610_vm7, %v2328_v47, %v2400_v42  ;;  %v2839_v5 = vsub.f32 %v2831_v49, %v2835_v32  ;;  %vm2874_vm10 = vcmp.lt.f32.partialorder %v2873_v58, 0.0004427343 }
 0x295   : > { %v2402_v8 = vsel %vm1612_vm8, %v2342_v55, %v2401_v15 }
 0x296   : > { %v2769_v28 = vsel %vm1610_vm7, %v2696_v14, %v2768_v12  ;;  %v2410_v29 = vadd.f32 %v2402_v8, %v2118_v26  ;;  %v2872_v12 = vmul.f32 %v5748_v34, %v2871_v48 }
 0x297   : > { %v3772_v7 = vpop.eup %3771  ;;  %v2770_v11 = vsel %vm1612_vm8, %v2710_v39, %v2769_v28 }
 0x298   : > { %v2804_v61 = vmul.f32 %v3772_v7, %v2777_v40  ;;  %v2778_v44 = vadd.f32 %v2770_v11, %v2118_v26  ;;  %3775 = vrcp.f32 %v2410_v29 }
 0x299   : > { %v3774_v24 = vpop.eup %3773 }
 0x29a   : > { %v5367_v54 = vadd.f32 %v5753_v16, %v2804_v61  ;;  %v2869_v53 = vmul.f32 0.6931472, %v3774_v24 }
 0x29c   : > { %v2844_v27 = vand.u32 2147483647, %v5367_v54  ;;  %2824 = vst [vmem:[%s5049_s13 + $0x10] sm:$0xff] %v5367_v54  ;;  %v2875_v13 = vsel %vm2874_vm10, %v2872_v12, %v2869_v53 }
 0x29d   : > { %v2895_v23 = vadd.f32 %v2875_v13, %v2839_v5 }
 0x29e   : > { %v2848_v63 = vsub.f32 0.0, %v2844_v27 }
 0x29f   : > { %2899 = vst [vmem:[%s5352_s15 + $0x8] sm:$0xff] %v2895_v23 }
 0x2a0   : > { %v2854_v36 = vmul.f32 1.442695, %v2848_v63 }
 0x2a2   : > { %3777 = vpow2.f32 %v2854_v36  ;;  %v3776_v51 = vpop.eup %3775 }
 0x2a3   : > { %v2805_v0 = vmul.f32 %v3776_v51, %v2778_v44 }
 0x2a5   : > { %v5386_v19 = vadd.f32 %v5754_v45, %v2805_v0 }
 0x2a7   : > { %v2845_v60 = vand.u32 2147483647, %v5386_v19  ;;  %2825 = vst [vmem:[%s5049_s13 + $0x18] sm:$0xff] %v5386_v19 }
 0x2a8   : > { %3798 = shalt.err (!%p3795_p11)
}
 0x2a9   : > { %s3799_s13 = scalar_lea.hbm %s5381_s20, 512  ;;  %s3803_s30 = scalar_lea.hbm %s5491_s5, 1024 }
 0x2aa   : > { %p3800_p12 = scmp.ne.s32.totalorder %s5381_s20, %s3799_s13  ;;  %p3804_p1 = scmp.lt.u32.totalorder %s5381_s20, %s5491_s5 }
 0x2ab   : > { %p3805_p2 = scmp.lt.u32.totalorder %s3803_s30, %s3799_s13  ;;  %p3807_p4 = scmp.lt.u32.totalorder %s3799_s13, %s5381_s20 }
 0x2ac   : > { %p3801_p13 = pnand %p3800_p12, %p3977_p5 }
 0x2ad   : > { %p3806_p3 = por %p3805_p2, %p3804_p1 }
 0x2ae   : > { %p3802_p0 = pneg %p3801_p13 }
 0x2af   : > { %p3808_p6 = por %p3807_p4, %p3806_p3 }
 0x2b1   : > { %p3809_p7 = pnand %p3808_p6, %p3802_p0 }
 0x2b3   : > { %3812 = shalt.err (!%p3809_p7)
}
 0x2b4   : > { %s3899_s28 = smov 256   ;;  %s3900_s12 = smov 512   ;;  %v2849_v52 = vsub.f32 0.0, %v2845_v60  ;;  %v3778_v4 = vpop.eup %3777  ;;  %v2828_v22 = vld [vmem:[%s5071_s14 + $0x10] sm:$0xff]  ;;  %v2832_v10 = vmax.f32 %v5367_v54, 0.0  ;;  %v2829_v1 = vld [vmem:[%s5071_s14 + $0x18] sm:$0xff] }
 0x2b5   : > { %s3901_s27 = smov 16   ;;  %s5755_s16 = scalar_lea.sflag [#allocation7], %s5028_s11  ;;  %v2876_v31 = vadd.f32 1.0, %v3778_v4  ;;  %v2879_v18 = vmul.f32 -0.5, %v3778_v4  ;;  %v2836_v43 = vmul.f32 %v2828_v22, %v5367_v54  ;;  %v2882_v3 = vand.u32 2147483647, %v3778_v4 }
 0x2b6   : > { %3561 = dma.vmem_to_hbm [thread:$0]  (%p3977_p5), %s5383_s17, 512, %s5381_s20, %s5755_s16, %s3899_s28, %s3900_s12, %s3901_s27   ;;  %v2856_v9 = vmul.f32 1.442695, %v2849_v52  ;;  %v2833_v46 = vmax.f32 %v5386_v19, 0.0  ;;  %v2837_v30 = vmul.f32 %v2829_v1, %v5386_v19 }
 0x2b7   : > { %v2880_v59 = vadd.f32 1.0, %v2879_v18  ;;  %v2840_v38 = vsub.f32 %v2832_v10, %v2836_v43  ;;  %vm2883_vm11 = vcmp.lt.f32.partialorder %v2882_v3, 0.0004427343  ;;  %s2943_s17 = sshll.u32 %s5352_s15, 4  ;;  %s5756_s20 = sshll.u32 %s3887_s24, 8  ;;  %s5433_s17 = int_to_ptr.vmem [resolvable:$true] %s2943_s17 }
 0x2b8   : > { %3779 = vpow2.f32 %v2856_v9  ;;  %v2841_v47 = vsub.f32 %v2833_v46, %v2837_v30  ;;  %s5431_s14 = scalar_lea.hbm %s5492_s6, %s5756_s20  ;;  %s2908_s19 = scalar_lea.sflag [#allocation9], %s5028_s11 }
 0x2b9   : > { %3781 = vlog2.f32 %v2876_v31  ;;  %v2881_v35 = vmul.f32 %v3778_v4, %v2880_v59  ;;  %s3813_s30 = scalar_lea.vmem %s5433_s17, 512  ;;  %s3902_s8 = smov [#allocation8]  }
 0x2ba   : > { %p3814_p8 = scmp.ne.s32.totalorder %s5433_s17, %s3813_s30  ;;  %s3817_s16 = sshll.u32 %s3902_s8, 4  ;;  %s3818_s16 = int_to_ptr.vmem [resolvable:$false] %s3817_s16 }
 0x2bb   : > { %s3819_s24 = scalar_lea.vmem %s3818_s16, 1024  ;;  %p3820_p13 = scmp.lt.s32.totalorder %s5433_s17, %s3818_s16 }
 0x2bc   : > { %p3815_p11 = pnand %p3814_p8, %p3977_p5  ;;  %p3821_p0 = scmp.lt.s32.totalorder %s3819_s24, %s3813_s30 }
 0x2be   : > { %p3816_p12 = pneg %p3815_p11  ;;  %p3822_p1 = por %p3821_p0, %p3820_p13 }
 0x2c0   : > { %p3823_p2 = pnand %p3822_p1, %p3816_p12 }
 0x2c2   : > { %v3780_v42 = vpop.eup %3779 }
 0x2c3   : > { %v3782_v17 = vpop.eup %3781  ;;  %v2885_v57 = vadd.f32 1.0, %v3780_v42  ;;  %v2888_v41 = vmul.f32 -0.5, %v3780_v42  ;;  %v2891_v40 = vand.u32 2147483647, %v3780_v42 }
 0x2c4   : > { %v2878_v34 = vmul.f32 0.6931472, %v3782_v17 }
 0x2c5   : > { %3783 = vlog2.f32 %v2885_v57  ;;  %v2889_v2 = vadd.f32 1.0, %v2888_v41  ;;  %vm2892_vm12 = vcmp.lt.f32.partialorder %v2891_v40, 0.0004427343 }
 0x2c6   : > { %v2884_v56 = vsel %vm2883_vm11, %v2881_v35, %v2878_v34 }
 0x2c7   : > { %v2896_v33 = vadd.f32 %v2884_v56, %v2840_v38  ;;  %v2890_v50 = vmul.f32 %v3780_v42, %v2889_v2 }
 0x2c9   : > { %2900 = vst [vmem:[%s5352_s15 + $0x10] sm:$0xff] %v2896_v33 }
 0x2cf   : > { %v3784_v37 = vpop.eup %3783 }
 0x2d0   : > { %v2887_v6 = vmul.f32 0.6931472, %v3784_v37 }
 0x2d2   : > { %v2893_v25 = vsel %vm2892_vm12, %v2890_v50, %v2887_v6 }
 0x2d3   : > { %v2897_v55 = vadd.f32 %v2893_v25, %v2841_v47 }
 0x2d5   : > { %2901 = vst [vmem:[%s5352_s15 + $0x18] sm:$0xff] %v2897_v55 }
 0x2d6   : > { %3826 = shalt.err (!%p3823_p2)
}
 0x2d7   : > { %s3827_s15 = scalar_lea.hbm %s5431_s14, 512  ;;  %s3831_s18 = scalar_lea.hbm %s5492_s6, 1024 }
 0x2d8   : > { %p3828_p3 = scmp.ne.s32.totalorder %s5431_s14, %s3827_s15  ;;  %p3832_p7 = scmp.lt.u32.totalorder %s5431_s14, %s5492_s6 }
 0x2d9   : > { %p3833_p8 = scmp.lt.u32.totalorder %s3831_s18, %s3827_s15  ;;  %p3835_p12 = scmp.lt.u32.totalorder %s3827_s15, %s5431_s14 }
 0x2da   : > { %p3829_p4 = pnand %p3828_p3, %p3977_p5 }
 0x2db   : > { %p3834_p11 = por %p3833_p8, %p3832_p7 }
 0x2dc   : > { %p3830_p6 = pneg %p3829_p4 }
 0x2dd   : > { %p3836_p13 = por %p3835_p12, %p3834_p11 }
 0x2df   : > { %p3837_p0 = pnand %p3836_p13, %p3830_p6 }
 0x2e1   : > { %3840 = shalt.err (!%p3837_p0)
}
 0x2e2   : > { %3562 = dma.vmem_to_hbm [thread:$0]  (%p3977_p5), %s5433_s17, 512, %s5431_s14, %s2908_s19, %s3899_s28, %s3900_s12, %s3901_s27  }
 0x2e3 PF: > { %s2958_s30 = sand.u32 1, %s3875_s21   ;;  %p3566_p1 = pnand %p3121_p10, %p3988_p9 }
 0x2e4   : > { %s2959_s24 = scalar_lea.sflag [#allocation7], %s2958_s30 }
 0x2e5   : > { %3866 = dma.done.wait (!%p3566_p1), %s2959_s24, 512  }
 0x2e6   : > { %3868 = vsyncadd (!%p3566_p1), %s2959_s24, 4294966784  ;;  %s2968_s7 = scalar_lea.sflag [#allocation9], %s2958_s30 }
 0x2e7   : > { %3870 = dma.done.wait (!%p3566_p1), %s2968_s7, 512  }
 0x2e8   : > { %3872 = vsyncadd (!%p3566_p1), %s2968_s7, 4294966784  ;;  %s23_s26 = sadd.s32 1, %s3895_s26   ;;  %s5757_s21 = smov %s3879_s22 }
 0x2e9   : > { %p20_p2 = scmp.ge.s32.totalorder %s23_s26, 4   ;;  %s5758_s22 = smov %s3883_s23 }
 0x2ea   : > { %s5759_s23 = smov %s3986_s9  ;;  %s5760_s24 = smov %s3891_s25 }
 0x2eb   : > { %s5761_s25 = smov %s5763_s29  ;;  %22 = sbr.rel (!%p20_p2) target bundleno = 6 (0x6), region = 140 }
 0x2f2   :  { %2973 = vsyncpa [#allocation7], 1 }
 0x2f3   :  { %2975 = vsyncpa [#allocation7 + $0x1], 1 }
 0x2f4   :  { %2976 = vsyncpa [#allocation9], 1 }
 0x2f5   :  { %2978 = vsyncpa [#allocation9 + $0x1], 1 }

</bundles_post_ra>
